<compile_context>
chip_gen: v7x
topology: tpu7x:2x2x1
jax: 0.10.0
libtpu: 0.0.40
codegen_flags: <defaults>
</compile_context>

<pallas_src>
import functools

import jax
import jax.numpy as jnp
from jax.experimental import pallas as pl
from jax.experimental.pallas import tpu as pltpu

NS = 0.2            # leaky_relu negative slope
EPS = 1e-5          # InstanceNorm1d eps (PyTorch default, affine=False)
VMEM_LIMIT = 64 * 1024 * 1024


def _cp(sem):
    return pltpu.CompilerParams(dimension_semantics=sem, vmem_limit_bytes=VMEM_LIMIT)


# ----------------------------- in-kernel helpers ---------------------------

def _conv3_windows(x):
    """x: (Cin, T) -> (3*Cin, T): reflect-padded K=3 conv windows stacked on sublanes."""
    T = x.shape[1]
    left = jnp.concatenate([x[:, 1:2], x[:, :T - 1]], axis=1)       # x[t-1], reflect at t=0
    right = jnp.concatenate([x[:, 1:], x[:, T - 2:T - 1]], axis=1)  # x[t+1], reflect at t=T-1
    return jnp.concatenate([left, x, right], axis=0)


def _leaky(x, ns):
    return jnp.where(x >= 0, x, ns * x)


def _inorm(x, eps):
    mean = jnp.mean(x, axis=1, keepdims=True)
    xc = x - mean
    var = jnp.mean(xc * xc, axis=1, keepdims=True)                  # biased var (PyTorch)
    return xc * jax.lax.rsqrt(var + eps)


# ------------------------------ Pallas kernels -----------------------------

def _conv_block_kernel(x_ref, w1_ref, eb1_ref, w2_ref, eb2_ref, oe_ref, oo_ref, *, ns, eps):
    # Fused: conv1(K=3, reflect) + leaky + pixel_shuffle + conv2(K=3, reflect) + leaky
    #        + InstanceNorm(2T) + nearest-upsample residual; per batch row.
    # w1 rows are pre-permuted to [even output channels ; odd output channels] so the
    # pixel shuffle is just a contiguous sublane split (a = even-time phase, b = odd).
    x = x_ref[0]                                                    # (Cin, T) f32
    xw = _conv3_windows(x).astype(jnp.bfloat16)                     # (3*Cin, T)
    h1 = jnp.dot(w1_ref[...], xw, preferred_element_type=jnp.float32) + eb1_ref[0]
    h1 = _leaky(h1, ns)                                             # (2*c_h, T)
    ch = h1.shape[0] // 2
    a = h1[:ch]                                                     # y[2t]   (even phase)
    b = h1[ch:]                                                     # y[2t+1] (odd phase)

    # conv2 over the interleaved length-2T signal, evaluated per phase.
    T = a.shape[1]
    b_l = jnp.concatenate([b[:, :1], b[:, :T - 1]], axis=1)         # y[2t-1]; reflect -> b[0]
    a_r = jnp.concatenate([a[:, 1:], a[:, T - 1:T]], axis=1)        # y[2t+2]; reflect -> a[T-1]
    we = jnp.concatenate([b_l, a, b], axis=0).astype(jnp.bfloat16)  # taps for even outputs
    wo = jnp.concatenate([a, b, a_r], axis=0).astype(jnp.bfloat16)  # taps for odd outputs
    ze = _leaky(jnp.dot(w2_ref[...], we, preferred_element_type=jnp.float32) + eb2_ref[0], ns)
    zo = _leaky(jnp.dot(w2_ref[...], wo, preferred_element_type=jnp.float32) + eb2_ref[0], ns)

    # InstanceNorm over the full 2T sequence (both phases jointly), then nearest-upsample
    # residual (x contributes to both phases).
    n2 = 2.0 * T
    mean = (jnp.sum(ze, axis=1, keepdims=True) + jnp.sum(zo, axis=1, keepdims=True)) / n2
    zec = ze - mean
    zoc = zo - mean
    var = (jnp.sum(zec * zec, axis=1, keepdims=True)
           + jnp.sum(zoc * zoc, axis=1, keepdims=True)) / n2
    inv = jax.lax.rsqrt(var + eps)
    oe_ref[0] = zec * inv + x
    oo_ref[0] = zoc * inv + x


def _dense_block_kernel(x_ref, w1_ref, eb1_ref, w2_ref, eb2_ref, o_ref, *, ns, eps):
    # Two per-timestep linears + leaky + InstanceNorm + residual, fused per batch row.
    x = x_ref[0]                                                    # (C, S) f32
    h = jnp.dot(w1_ref[...], x.astype(jnp.bfloat16), preferred_element_type=jnp.float32)
    h = _leaky(h + eb1_ref[0], ns)
    h = jnp.dot(w2_ref[...], h.astype(jnp.bfloat16), preferred_element_type=jnp.float32)
    h = _leaky(h + eb2_ref[0], ns)
    o_ref[0] = _inorm(h, eps) + x


def _bigru_kernel(gi_ref, whh_ref, bhh_ref, o_ref, h_scr):
    # One grid step per direction (grid=(2,)).  gi: (S, B, 3H) precomputed input-side
    # gate pre-activations (incl. bih + emb).  whh: (H, 3H) bf16 so gh = h @ whh gives
    # all three gates in one MXU push.  Backward direction indexes S-1-t directly.
    d = pl.program_id(0)
    S = gi_ref.shape[0]
    H = whh_ref.shape[0]
    h_scr[...] = jnp.zeros_like(h_scr)
    whh = whh_ref[...]                                              # (H, 3H) bf16
    bhh = bhh_ref[...]                                              # (1, 3H) f32

    def step(t, carry):
        tt = jnp.where(d == 0, t, S - 1 - t)
        gi = gi_ref[tt]                                             # (B, 3H)
        h = h_scr[...]                                              # (B, H)
        gh = jnp.dot(h.astype(jnp.bfloat16), whh,
                     preferred_element_type=jnp.float32) + bhh      # (B, 3H)
        r = jax.nn.sigmoid(gi[:, :H] + gh[:, :H])
        z = jax.nn.sigmoid(gi[:, H:2 * H] + gh[:, H:2 * H])
        n = jnp.tanh(gi[:, 2 * H:] + r * gh[:, 2 * H:])
        h_new = (1.0 - z) * n + z * h
        h_scr[...] = h_new
        o_ref[tt] = h_new
        return carry

    jax.lax.fori_loop(0, S, step, 0)


def _head_kernel(x_ref, r_ref, eb5_ref, w5x_ref, w5r_ref, wl_ref, bl_ref, o_ref, *, ns):
    # dense5(concat(out, rnn, emb)) + leaky + linear + exp, per batch row.
    h = (jnp.dot(w5x_ref[...], x_ref[0].astype(jnp.bfloat16),
                 preferred_element_type=jnp.float32)
         + jnp.dot(w5r_ref[...], r_ref[0].astype(jnp.bfloat16),
                   preferred_element_type=jnp.float32)
         + eb5_ref[0])
    h = _leaky(h, ns)
    y = jnp.dot(wl_ref[...], h.astype(jnp.bfloat16),
                preferred_element_type=jnp.float32) + bl_ref[...]
    o_ref[0] = jnp.exp(y)


# ------------------------------ pallas wrappers -----------------------------

def conv_block(x, p1, p2, emb, *, ns=NS, eps=EPS):
    """Full T -> 2T upsampling conv block, one fused kernel per batch row."""
    B, Cin, T = x.shape
    c2h = p1['wf'].shape[0]
    c_h = c2h // 2
    eb1 = (emb @ p1['we_sum'].T + p1['b'])[..., None]               # (B, 2*c_h, 1)
    eb2 = (emb @ p2['we_sum'].T + p2['b'])[..., None]               # (B, c_h, 1)
    oe, oo = pl.pallas_call(
        functools.partial(_conv_block_kernel, ns=ns, eps=eps),
        out_shape=(jax.ShapeDtypeStruct((B, c_h, T), jnp.float32),
                   jax.ShapeDtypeStruct((B, c_h, T), jnp.float32)),
        grid=(B,),
        in_specs=[
            pl.BlockSpec((1, Cin, T), lambda i: (i, 0, 0)),
            pl.BlockSpec((c2h, 3 * Cin), lambda i: (0, 0)),
            pl.BlockSpec((1, c2h, 1), lambda i: (i, 0, 0)),
            pl.BlockSpec((c_h, 3 * c_h), lambda i: (0, 0)),
            pl.BlockSpec((1, c_h, 1), lambda i: (i, 0, 0)),
        ],
        out_specs=(pl.BlockSpec((1, c_h, T), lambda i: (i, 0, 0)),
                   pl.BlockSpec((1, c_h, T), lambda i: (i, 0, 0))),
        compiler_params=_cp(("parallel",)),
    )(x, p1['wf'], eb1, p2['wf'], eb2)
    # Interleave even/odd phase planes -> (B, c_h, 2T).  (Thin XLA glue.)
    return jnp.stack([oe, oo], axis=-1).reshape(B, c_h, 2 * T)


def dense_block(x, emb, p1, p2, *, ns=NS, eps=EPS):
    B, C, S = x.shape
    eb1 = (emb @ p1['we'].T + p1['b'])[..., None]                   # (B, C, 1)
    eb2 = (emb @ p2['we'].T + p2['b'])[..., None]
    return pl.pallas_call(
        functools.partial(_dense_block_kernel, ns=ns, eps=eps),
        out_shape=jax.ShapeDtypeStruct((B, C, S), jnp.float32),
        grid=(B,),
        in_specs=[
            pl.BlockSpec((1, C, S), lambda i: (i, 0, 0)),
            pl.BlockSpec((C, C), lambda i: (0, 0)),
            pl.BlockSpec((1, C, 1), lambda i: (i, 0, 0)),
            pl.BlockSpec((C, C), lambda i: (0, 0)),
            pl.BlockSpec((1, C, 1), lambda i: (i, 0, 0)),
        ],
        out_specs=pl.BlockSpec((1, C, S), lambda i: (i, 0, 0)),
        compiler_params=_cp(("parallel",)),
    )(x, p1['wx'], eb1, p2['wx'], eb2)


def bi_gru(out, emb, gp):
    """out: (B, c_h, S). Returns GRU output stacked per direction, (2, S, B, H)."""
    B, C, S = out.shape
    H = gp['whh_t'].shape[1]
    # Hoisted input projection (one matmul for all timesteps), emb folded into bias.
    bias = gp['bih'][:, None, :] + jnp.einsum('be,dge->dbg', emb, gp['wih_e'])   # (2,B,3H)
    gi = jnp.einsum('bcs,dgc->dsbg', out, gp['wih_x']) + bias[:, None]           # (2,S,B,3H)
    return pl.pallas_call(
        _bigru_kernel,
        out_shape=jax.ShapeDtypeStruct((2, S, B, H), jnp.float32),
        grid=(2,),
        in_specs=[
            pl.BlockSpec((None, S, B, 3 * H), lambda d: (d, 0, 0, 0)),
            pl.BlockSpec((None, H, 3 * H), lambda d: (d, 0, 0)),
            pl.BlockSpec((None, 1, 3 * H), lambda d: (d, 0, 0)),
        ],
        out_specs=pl.BlockSpec((None, S, B, H), lambda d: (d, 0, 0, 0)),
        scratch_shapes=[pltpu.VMEM((B, H), jnp.float32)],
        compiler_params=_cp(("parallel",)),
    )(gi, gp['whh_t'], gp['bhh'])


def head(out, rnn, emb, p5, plin, *, ns=NS):
    """dense5(concat(out, rnn, emb)) + leaky + linear + exp, per batch row."""
    B, C, S = out.shape
    H = rnn.shape[-1]
    c_out = plin['w'].shape[0]
    # GRU output (2, S, B, H) -> (B, 2H, S), fwd rows first (matches dense5 columns).
    rnn_b = rnn.transpose(2, 0, 3, 1).reshape(B, 2 * H, S)
    eb5 = (emb @ p5['we'].T + p5['b'])[..., None]                   # (B, c_h, 1)
    return pl.pallas_call(
        functools.partial(_head_kernel, ns=ns),
        out_shape=jax.ShapeDtypeStruct((B, c_out, S), jnp.float32),
        grid=(B,),
        in_specs=[
            pl.BlockSpec((1, C, S), lambda i: (i, 0, 0)),
            pl.BlockSpec((1, 2 * H, S), lambda i: (i, 0, 0)),
            pl.BlockSpec((1, C, 1), lambda i: (i, 0, 0)),
            pl.BlockSpec((C, C), lambda i: (0, 0)),
            pl.BlockSpec((C, 2 * H), lambda i: (0, 0)),
            pl.BlockSpec((c_out, C), lambda i: (0, 0)),
            pl.BlockSpec((c_out, 1), lambda i: (0, 0)),
        ],
        out_specs=pl.BlockSpec((1, c_out, S), lambda i: (i, 0, 0)),
        compiler_params=_cp(("parallel",)),
    )(out, rnn_b, eb5, p5['wx'], p5['wr'], plin['w'], plin['b'][:, None])


# ------------------------------- full forward -------------------------------

def decoder_forward(params, x, c):
    emb2, emb4, emb6, emb8, embd2, embd4, embrnn = c
    out = conv_block(x, params['conv1'], params['conv2'], embrnn)    # T  -> 2T
    out = conv_block(out, params['conv3'], params['conv4'], embd4)   # 2T -> 4T
    out = conv_block(out, params['conv5'], params['conv6'], embd2)   # 4T -> 8T
    out = dense_block(out, emb8, params['dense1'], params['dense2'])
    out = dense_block(out, emb6, params['dense3'], params['dense4'])
    rnn = bi_gru(out, emb4, params['gru'])
    return head(out, rnn, emb2, params['dense5'], params['linear'])


# --------------------------- deterministic params ---------------------------

def init_params(key, c_in, c_out, c_h, emb):
    keys = iter(jax.random.split(key, 64))

    def rnd(shape, scale):
        return jax.random.normal(next(keys), shape, jnp.float32) * scale

    def conv_p(cin_x, cout, phase_perm=False):
        k = 3
        cin_t = cin_x + emb
        s = 1.0 / (cin_t * k) ** 0.5
        w = rnd((cout, cin_t, k), s)                 # PyTorch Conv1d layout
        b = rnd((cout,), s)
        wx, we = w[:, :cin_x, :], w[:, cin_x:, :]
        wf = wx.transpose(0, 2, 1).reshape(cout, k * cin_x)        # folded K taps
        we_sum = we.sum(axis=2)                                    # emb const over time
        if phase_perm:
            # Reorder output channels to [even ; odd] so pixel shuffle is a sublane split.
            perm = jnp.concatenate([jnp.arange(0, cout, 2), jnp.arange(1, cout, 2)])
            wf, we_sum, b = wf[perm], we_sum[perm], b[perm]
        return {'wf': wf.astype(jnp.bfloat16), 'we_sum': we_sum, 'b': b}

    def lin_p(cin_x, cout, extra=0):
        cin_t = cin_x + extra + emb
        s = 1.0 / cin_t ** 0.5
        w = rnd((cout, cin_t), s)
        b = rnd((cout,), s)
        p = {'wx': w[:, :cin_x].astype(jnp.bfloat16),
             'we': w[:, cin_x + extra:], 'b': b}
        if extra:
            p['wr'] = w[:, cin_x:cin_x + extra].astype(jnp.bfloat16)
        return p

    H = c_h // 2

    def gru_p():
        s = 1.0 / H ** 0.5

        def one_dir():
            wih = rnd((3 * H, c_h + emb), s)         # gate order [r, z, n]
            whh = rnd((3 * H, H), s)
            bih = rnd((3 * H,), s)
            bhh = rnd((3 * H,), s)
            return wih, whh, bih, bhh

        wih_f, whh_f, bih_f, bhh_f = one_dir()
        wih_b, whh_b, bih_b, bhh_b = one_dir()
        return {
            'wih_x': jnp.stack([wih_f[:, :c_h], wih_b[:, :c_h]]),            # (2,3H,c_h)
            'wih_e': jnp.stack([wih_f[:, c_h:], wih_b[:, c_h:]]),            # (2,3H,emb)
            'bih': jnp.stack([bih_f, bih_b]),                                # (2,3H)
            'whh_t': jnp.stack([whh_f.T, whh_b.T]).astype(jnp.bfloat16),     # (2,H,3H)
            'bhh': jnp.stack([bhh_f, bhh_b])[:, None, :],                    # (2,1,3H)
        }

    def plain_lin(cin, cout):
        s = 1.0 / cin ** 0.5
        return {'w': rnd((cout, cin), s).astype(jnp.bfloat16), 'b': rnd((cout,), s)}

    return {
        'conv1': conv_p(c_in, 2 * c_h, phase_perm=True),
        'conv2': conv_p(c_h, c_h),
        'conv3': conv_p(c_h, 2 * c_h, phase_perm=True),
        'conv4': conv_p(c_h, c_h),
        'conv5': conv_p(c_h, 2 * c_h, phase_perm=True),
        'conv6': conv_p(c_h, c_h),
        'dense1': lin_p(c_h, c_h),
        'dense2': lin_p(c_h, c_h),
        'dense3': lin_p(c_h, c_h),
        'dense4': lin_p(c_h, c_h),
        'gru': gru_p(),
        'dense5': lin_p(c_h, c_h, extra=c_h),
        'linear': plain_lin(c_h, c_out),
    }


if __name__ == "__main__":
    # Small shapes consistent with the module (c_in == c_h required by residuals).
    B, T = 2, 8
    c_in = c_h = 32
    c_out = 33
    emb = 16

    key = jax.random.PRNGKey(0)
    kp, kx, *kc = jax.random.split(key, 10)
    params = init_params(kp, c_in, c_out, c_h, emb)
    x = jax.random.normal(kx, (B, c_in, T), jnp.float32)
    # c = (emb2, emb4, emb6, emb8, embd2, embd4, embrnn), each (B, emb_size)
    c = tuple(jax.random.normal(kc[i], (B, emb), jnp.float32) for i in range(7))

    fwd = jax.jit(decoder_forward)
    out = fwd(params, x, c)
    jax.block_until_ready(out)

    assert out.shape == (B, c_out, 8 * T), out.shape
    assert bool(jnp.all(jnp.isfinite(out)))
    print("KERNEL_OK")
</pallas_src>

<mosaic_0001>
module attributes {stable_mosaic.version = 11 : i64} {
  func.func @_conv_block_kernel(%arg0: i32, %arg1: memref<1x32x8xf32, #tpu.memory_space<vmem>>, %arg2: memref<64x96xbf16, #tpu.memory_space<vmem>>, %arg3: memref<1x64x1xf32, #tpu.memory_space<vmem>>, %arg4: memref<32x96xbf16, #tpu.memory_space<vmem>>, %arg5: memref<1x32x1xf32, #tpu.memory_space<vmem>>, %arg6: memref<1x32x8xf32, #tpu.memory_space<vmem>>, %arg7: memref<1x32x8xf32, #tpu.memory_space<vmem>>) attributes {dimension_semantics = [#tpu.dimension_semantics<parallel>], iteration_bounds = array<i64: 2>, scalar_prefetch = 0 : i64, scratch_operands = 0 : i64, tpu.core_type = #tpu.core_type<tc>, window_params = [{transform_indices = @transform_0, window_bounds = array<i64: 1, 32, 8>}, {pipeline_mode = #tpu.pipeline_mode<synchronous>, transform_indices = @transform_1, window_bounds = array<i64: 64, 96>}, {transform_indices = @transform_2, window_bounds = array<i64: 1, 64, 1>}, {pipeline_mode = #tpu.pipeline_mode<synchronous>, transform_indices = @transform_3, window_bounds = array<i64: 32, 96>}, {transform_indices = @transform_4, window_bounds = array<i64: 1, 32, 1>}, {transform_indices = @transform_5, window_bounds = array<i64: 1, 32, 8>}, {transform_indices = @transform_6, window_bounds = array<i64: 1, 32, 8>}]} {
    %c0 = arith.constant 0 : index
    %c0_0 = arith.constant 0 : index
    %c0_1 = arith.constant 0 : index
    %0 = vector.load %arg1[%c0, %c0_0, %c0_1] : memref<1x32x8xf32, #tpu.memory_space<vmem>>, vector<1x32x8xf32>
    %1 = vector.shape_cast %0 : vector<1x32x8xf32> to vector<32x8xf32>
    %2 = vector.extract_strided_slice %1 {offsets = [0, 1], sizes = [32, 1], strides = [1, 1]} : vector<32x8xf32> to vector<32x1xf32>
    %3 = vector.extract_strided_slice %1 {offsets = [0, 0], sizes = [32, 7], strides = [1, 1]} : vector<32x8xf32> to vector<32x7xf32>
    %4 = tpu.concatenate %2, %3 in 1 : vector<32x1xf32>, vector<32x7xf32> -> vector<32x8xf32>
    %5 = vector.extract_strided_slice %1 {offsets = [0, 1], sizes = [32, 7], strides = [1, 1]} : vector<32x8xf32> to vector<32x7xf32>
    %6 = vector.extract_strided_slice %1 {offsets = [0, 6], sizes = [32, 1], strides = [1, 1]} : vector<32x8xf32> to vector<32x1xf32>
    %7 = tpu.concatenate %5, %6 in 1 : vector<32x7xf32>, vector<32x1xf32> -> vector<32x8xf32>
    %8 = tpu.concatenate %4, %1, %7 in 0 : vector<32x8xf32>, vector<32x8xf32>, vector<32x8xf32> -> vector<96x8xf32>
    %9 = arith.truncf %8 : vector<96x8xf32> to vector<96x8xbf16>
    %c0_2 = arith.constant 0 : index
    %c0_3 = arith.constant 0 : index
    %10 = vector.load %arg2[%c0_2, %c0_3] : memref<64x96xbf16, #tpu.memory_space<vmem>>, vector<64x96xbf16>
    %cst = arith.constant dense<0.000000e+00> : vector<64x8xf32>
    %11 = tpu.matmul %10, %9, %cst {dimension_numbers = #tpu.dot_dimension_numbers<[1], [0], [0], [1], [0, 0, 1, 1], [], []>} : vector<64x96xbf16>, vector<96x8xbf16>, vector<64x8xf32> -> vector<64x8xf32>
    %c0_4 = arith.constant 0 : index
    %c0_5 = arith.constant 0 : index
    %c0_6 = arith.constant 0 : index
    %12 = vector.load %arg3[%c0_4, %c0_5, %c0_6] : memref<1x64x1xf32, #tpu.memory_space<vmem>>, vector<1x64x1xf32>
    %13 = vector.shape_cast %12 : vector<1x64x1xf32> to vector<64x1xf32>
    %14 = vector.broadcast %13 : vector<64x1xf32> to vector<64x8xf32>
    %15 = arith.addf %11, %14 : vector<64x8xf32>
    %cst_7 = arith.constant 0.000000e+00 : f32
    %16 = vector.broadcast %cst_7 : f32 to vector<64x8xf32>
    %17 = arith.cmpf oge, %15, %16 : vector<64x8xf32>
    %cst_8 = arith.constant 2.000000e-01 : f32
    %18 = vector.broadcast %cst_8 : f32 to vector<64x8xf32>
    %19 = arith.mulf %18, %15 : vector<64x8xf32>
    %20 = arith.select %17, %15, %19 : vector<64x8xi1>, vector<64x8xf32>
    %21 = vector.extract_strided_slice %20 {offsets = [0, 0], sizes = [32, 8], strides = [1, 1]} : vector<64x8xf32> to vector<32x8xf32>
    %22 = vector.extract_strided_slice %20 {offsets = [32, 0], sizes = [32, 8], strides = [1, 1]} : vector<64x8xf32> to vector<32x8xf32>
    %23 = vector.extract_strided_slice %22 {offsets = [0, 0], sizes = [32, 1], strides = [1, 1]} : vector<32x8xf32> to vector<32x1xf32>
    %24 = vector.extract_strided_slice %22 {offsets = [0, 0], sizes = [32, 7], strides = [1, 1]} : vector<32x8xf32> to vector<32x7xf32>
    %25 = tpu.concatenate %23, %24 in 1 : vector<32x1xf32>, vector<32x7xf32> -> vector<32x8xf32>
    %26 = vector.extract_strided_slice %21 {offsets = [0, 1], sizes = [32, 7], strides = [1, 1]} : vector<32x8xf32> to vector<32x7xf32>
    %27 = vector.extract_strided_slice %21 {offsets = [0, 7], sizes = [32, 1], strides = [1, 1]} : vector<32x8xf32> to vector<32x1xf32>
    %28 = tpu.concatenate %26, %27 in 1 : vector<32x7xf32>, vector<32x1xf32> -> vector<32x8xf32>
    %29 = tpu.concatenate %25, %21, %22 in 0 : vector<32x8xf32>, vector<32x8xf32>, vector<32x8xf32> -> vector<96x8xf32>
    %30 = arith.truncf %29 : vector<96x8xf32> to vector<96x8xbf16>
    %31 = tpu.concatenate %21, %22, %28 in 0 : vector<32x8xf32>, vector<32x8xf32>, vector<32x8xf32> -> vector<96x8xf32>
    %32 = arith.truncf %31 : vector<96x8xf32> to vector<96x8xbf16>
    %c0_9 = arith.constant 0 : index
    %c0_10 = arith.constant 0 : index
    %33 = vector.load %arg4[%c0_9, %c0_10] : memref<32x96xbf16, #tpu.memory_space<vmem>>, vector<32x96xbf16>
    %cst_11 = arith.constant dense<0.000000e+00> : vector<32x8xf32>
    %34 = tpu.matmul %33, %30, %cst_11 {dimension_numbers = #tpu.dot_dimension_numbers<[1], [0], [0], [1], [0, 0, 1, 1], [], []>} : vector<32x96xbf16>, vector<96x8xbf16>, vector<32x8xf32> -> vector<32x8xf32>
    %c0_12 = arith.constant 0 : index
    %c0_13 = arith.constant 0 : index
    %c0_14 = arith.constant 0 : index
    %35 = vector.load %arg5[%c0_12, %c0_13, %c0_14] : memref<1x32x1xf32, #tpu.memory_space<vmem>>, vector<1x32x1xf32>
    %36 = vector.shape_cast %35 : vector<1x32x1xf32> to vector<32x1xf32>
    %37 = vector.broadcast %36 : vector<32x1xf32> to vector<32x8xf32>
    %38 = arith.addf %34, %37 : vector<32x8xf32>
    %cst_15 = arith.constant 0.000000e+00 : f32
    %39 = vector.broadcast %cst_15 : f32 to vector<32x8xf32>
    %40 = arith.cmpf oge, %38, %39 : vector<32x8xf32>
    %cst_16 = arith.constant 2.000000e-01 : f32
    %41 = vector.broadcast %cst_16 : f32 to vector<32x8xf32>
    %42 = arith.mulf %41, %38 : vector<32x8xf32>
    %43 = arith.select %40, %38, %42 : vector<32x8xi1>, vector<32x8xf32>
    %c0_17 = arith.constant 0 : index
    %c0_18 = arith.constant 0 : index
    %44 = vector.load %arg4[%c0_17, %c0_18] : memref<32x96xbf16, #tpu.memory_space<vmem>>, vector<32x96xbf16>
    %cst_19 = arith.constant dense<0.000000e+00> : vector<32x8xf32>
    %45 = tpu.matmul %44, %32, %cst_19 {dimension_numbers = #tpu.dot_dimension_numbers<[1], [0], [0], [1], [0, 0, 1, 1], [], []>} : vector<32x96xbf16>, vector<96x8xbf16>, vector<32x8xf32> -> vector<32x8xf32>
    %c0_20 = arith.constant 0 : index
    %c0_21 = arith.constant 0 : index
    %c0_22 = arith.constant 0 : index
    %46 = vector.load %arg5[%c0_20, %c0_21, %c0_22] : memref<1x32x1xf32, #tpu.memory_space<vmem>>, vector<1x32x1xf32>
    %47 = vector.shape_cast %46 : vector<1x32x1xf32> to vector<32x1xf32>
    %48 = vector.broadcast %47 : vector<32x1xf32> to vector<32x8xf32>
    %49 = arith.addf %45, %48 : vector<32x8xf32>
    %cst_23 = arith.constant 0.000000e+00 : f32
    %50 = vector.broadcast %cst_23 : f32 to vector<32x8xf32>
    %51 = arith.cmpf oge, %49, %50 : vector<32x8xf32>
    %cst_24 = arith.constant 2.000000e-01 : f32
    %52 = vector.broadcast %cst_24 : f32 to vector<32x8xf32>
    %53 = arith.mulf %52, %49 : vector<32x8xf32>
    %54 = arith.select %51, %49, %53 : vector<32x8xi1>, vector<32x8xf32>
    %cst_25 = arith.constant dense<0.000000e+00> : vector<32xf32>
    %55 = vector.multi_reduction <add>, %43, %cst_25 [1] : vector<32x8xf32> to vector<32xf32>
    %56 = vector.shape_cast %55 : vector<32xf32> to vector<32x1xf32>
    %cst_26 = arith.constant dense<0.000000e+00> : vector<32xf32>
    %57 = vector.multi_reduction <add>, %54, %cst_26 [1] : vector<32x8xf32> to vector<32xf32>
    %58 = vector.shape_cast %57 : vector<32xf32> to vector<32x1xf32>
    %59 = arith.addf %56, %58 : vector<32x1xf32>
    %cst_27 = arith.constant 1.600000e+01 : f32
    %60 = vector.broadcast %cst_27 : f32 to vector<32x1xf32>
    %61 = arith.divf %59, %60 : vector<32x1xf32>
    %62 = vector.broadcast %61 : vector<32x1xf32> to vector<32x8xf32>
    %63 = arith.subf %43, %62 : vector<32x8xf32>
    %64 = vector.broadcast %61 : vector<32x1xf32> to vector<32x8xf32>
    %65 = arith.subf %54, %64 : vector<32x8xf32>
    %66 = arith.mulf %63, %63 : vector<32x8xf32>
    %cst_28 = arith.constant dense<0.000000e+00> : vector<32xf32>
    %67 = vector.multi_reduction <add>, %66, %cst_28 [1] : vector<32x8xf32> to vector<32xf32>
    %68 = vector.shape_cast %67 : vector<32xf32> to vector<32x1xf32>
    %69 = arith.mulf %65, %65 : vector<32x8xf32>
    %cst_29 = arith.constant dense<0.000000e+00> : vector<32xf32>
    %70 = vector.multi_reduction <add>, %69, %cst_29 [1] : vector<32x8xf32> to vector<32xf32>
    %71 = vector.shape_cast %70 : vector<32xf32> to vector<32x1xf32>
    %72 = arith.addf %68, %71 : vector<32x1xf32>
    %cst_30 = arith.constant 1.600000e+01 : f32
    %73 = vector.broadcast %cst_30 : f32 to vector<32x1xf32>
    %74 = arith.divf %72, %73 : vector<32x1xf32>
    %cst_31 = arith.constant 9.99999974E-6 : f32
    %75 = vector.broadcast %cst_31 : f32 to vector<32x1xf32>
    %76 = arith.addf %74, %75 : vector<32x1xf32>
    %77 = math.rsqrt %76 : vector<32x1xf32>
    %78 = vector.broadcast %77 : vector<32x1xf32> to vector<32x8xf32>
    %79 = arith.mulf %63, %78 : vector<32x8xf32>
    %80 = arith.addf %79, %1 : vector<32x8xf32>
    %c0_32 = arith.constant 0 : index
    %c0_33 = arith.constant 0 : index
    %c0_34 = arith.constant 0 : index
    %81 = vector.load %arg6[%c0_32, %c0_33, %c0_34] : memref<1x32x8xf32, #tpu.memory_space<vmem>>, vector<1x32x8xf32>
    %82 = vector.shape_cast %81 : vector<1x32x8xf32> to vector<32x8xf32>
    %83 = vector.shape_cast %80 : vector<32x8xf32> to vector<1x32x8xf32>
    tpu.vector_store %arg6[%c0_32, %c0_33, %c0_34], %83 {strides = array<i32>} : memref<1x32x8xf32, #tpu.memory_space<vmem>>, vector<1x32x8xf32>,
    %84 = vector.broadcast %77 : vector<32x1xf32> to vector<32x8xf32>
    %85 = arith.mulf %65, %84 : vector<32x8xf32>
    %86 = arith.addf %85, %1 : vector<32x8xf32>
    %c0_35 = arith.constant 0 : index
    %c0_36 = arith.constant 0 : index
    %c0_37 = arith.constant 0 : index
    %87 = vector.load %arg7[%c0_35, %c0_36, %c0_37] : memref<1x32x8xf32, #tpu.memory_space<vmem>>, vector<1x32x8xf32>
    %88 = vector.shape_cast %87 : vector<1x32x8xf32> to vector<32x8xf32>
    %89 = vector.shape_cast %86 : vector<32x8xf32> to vector<1x32x8xf32>
    tpu.vector_store %arg7[%c0_35, %c0_36, %c0_37], %89 {strides = array<i32>} : memref<1x32x8xf32, #tpu.memory_space<vmem>>, vector<1x32x8xf32>,
    return
  }
  func.func @transform_0(%arg0: i32) -> (i32, i32, i32) {
    %c0_i32 = arith.constant 0 : i32
    %c0_i32_0 = arith.constant 0 : i32
    %c0_i32_1 = arith.constant 0 : i32
    return %arg0, %c0_i32, %c0_i32_0 : i32, i32, i32
  }
  func.func @transform_1(%arg0: i32) -> (i32, i32) {
    %c0_i32 = arith.constant 0 : i32
    %c0_i32_0 = arith.constant 0 : i32
    %c0_i32_1 = arith.constant 0 : i32
    return %c0_i32, %c0_i32_0 : i32, i32
  }
  func.func @transform_2(%arg0: i32) -> (i32, i32, i32) {
    %c0_i32 = arith.constant 0 : i32
    %c0_i32_0 = arith.constant 0 : i32
    %c0_i32_1 = arith.constant 0 : i32
    return %arg0, %c0_i32, %c0_i32_0 : i32, i32, i32
  }
  func.func @transform_3(%arg0: i32) -> (i32, i32) {
    %c0_i32 = arith.constant 0 : i32
    %c0_i32_0 = arith.constant 0 : i32
    %c0_i32_1 = arith.constant 0 : i32
    return %c0_i32, %c0_i32_0 : i32, i32
  }
  func.func @transform_4(%arg0: i32) -> (i32, i32, i32) {
    %c0_i32 = arith.constant 0 : i32
    %c0_i32_0 = arith.constant 0 : i32
    %c0_i32_1 = arith.constant 0 : i32
    return %arg0, %c0_i32, %c0_i32_0 : i32, i32, i32
  }
  func.func @transform_5(%arg0: i32) -> (i32, i32, i32) {
    %c0_i32 = arith.constant 0 : i32
    %c0_i32_0 = arith.constant 0 : i32
    %c0_i32_1 = arith.constant 0 : i32
    return %arg0, %c0_i32, %c0_i32_0 : i32, i32, i32
  }
  func.func @transform_6(%arg0: i32) -> (i32, i32, i32) {
    %c0_i32 = arith.constant 0 : i32
    %c0_i32_0 = arith.constant 0 : i32
    %c0_i32_1 = arith.constant 0 : i32
    return %arg0, %c0_i32, %c0_i32_0 : i32, i32, i32
  }
}

module attributes {stable_mosaic.version = 11 : i64} {
  func.func @_conv_block_kernel(%arg0: i32, %arg1: memref<1x32x16xf32, #tpu.memory_space<vmem>>, %arg2: memref<64x96xbf16, #tpu.memory_space<vmem>>, %arg3: memref<1x64x1xf32, #tpu.memory_space<vmem>>, %arg4: memref<32x96xbf16, #tpu.memory_space<vmem>>, %arg5: memref<1x32x1xf32, #tpu.memory_space<vmem>>, %arg6: memref<1x32x16xf32, #tpu.memory_space<vmem>>, %arg7: memref<1x32x16xf32, #tpu.memory_space<vmem>>) attributes {dimension_semantics = [#tpu.dimension_semantics<parallel>], iteration_bounds = array<i64: 2>, scalar_prefetch = 0 : i64, scratch_operands = 0 : i64, tpu.core_type = #tpu.core_type<tc>, window_params = [{transform_indices = @transform_0, window_bounds = array<i64: 1, 32, 16>}, {pipeline_mode = #tpu.pipeline_mode<synchronous>, transform_indices = @transform_1, window_bounds = array<i64: 64, 96>}, {transform_indices = @transform_2, window_bounds = array<i64: 1, 64, 1>}, {pipeline_mode = #tpu.pipeline_mode<synchronous>, transform_indices = @transform_3, window_bounds = array<i64: 32, 96>}, {transform_indices = @transform_4, window_bounds = array<i64: 1, 32, 1>}, {transform_indices = @transform_5, window_bounds = array<i64: 1, 32, 16>}, {transform_indices = @transform_6, window_bounds = array<i64: 1, 32, 16>}]} {
    %c0 = arith.constant 0 : index
    %c0_0 = arith.constant 0 : index
    %c0_1 = arith.constant 0 : index
    %0 = vector.load %arg1[%c0, %c0_0, %c0_1] : memref<1x32x16xf32, #tpu.memory_space<vmem>>, vector<1x32x16xf32>
    %1 = vector.shape_cast %0 : vector<1x32x16xf32> to vector<32x16xf32>
    %2 = vector.extract_strided_slice %1 {offsets = [0, 1], sizes = [32, 1], strides = [1, 1]} : vector<32x16xf32> to vector<32x1xf32>
    %3 = vector.extract_strided_slice %1 {offsets = [0, 0], sizes = [32, 15], strides = [1, 1]} : vector<32x16xf32> to vector<32x15xf32>
    %4 = tpu.concatenate %2, %3 in 1 : vector<32x1xf32>, vector<32x15xf32> -> vector<32x16xf32>
    %5 = vector.extract_strided_slice %1 {offsets = [0, 1], sizes = [32, 15], strides = [1, 1]} : vector<32x16xf32> to vector<32x15xf32>
    %6 = vector.extract_strided_slice %1 {offsets = [0, 14], sizes = [32, 1], strides = [1, 1]} : vector<32x16xf32> to vector<32x1xf32>
    %7 = tpu.concatenate %5, %6 in 1 : vector<32x15xf32>, vector<32x1xf32> -> vector<32x16xf32>
    %8 = tpu.concatenate %4, %1, %7 in 0 : vector<32x16xf32>, vector<32x16xf32>, vector<32x16xf32> -> vector<96x16xf32>
    %9 = arith.truncf %8 : vector<96x16xf32> to vector<96x16xbf16>
    %c0_2 = arith.constant 0 : index
    %c0_3 = arith.constant 0 : index
    %10 = vector.load %arg2[%c0_2, %c0_3] : memref<64x96xbf16, #tpu.memory_space<vmem>>, vector<64x96xbf16>
    %cst = arith.constant dense<0.000000e+00> : vector<64x16xf32>
    %11 = tpu.matmul %10, %9, %cst {dimension_numbers = #tpu.dot_dimension_numbers<[1], [0], [0], [1], [0, 0, 1, 1], [], []>} : vector<64x96xbf16>, vector<96x16xbf16>, vector<64x16xf32> -> vector<64x16xf32>
    %c0_4 = arith.constant 0 : index
    %c0_5 = arith.constant 0 : index
    %c0_6 = arith.constant 0 : index
    %12 = vector.load %arg3[%c0_4, %c0_5, %c0_6] : memref<1x64x1xf32, #tpu.memory_space<vmem>>, vector<1x64x1xf32>
    %13 = vector.shape_cast %12 : vector<1x64x1xf32> to vector<64x1xf32>
    %14 = vector.broadcast %13 : vector<64x1xf32> to vector<64x16xf32>
    %15 = arith.addf %11, %14 : vector<64x16xf32>
    %cst_7 = arith.constant 0.000000e+00 : f32
    %16 = vector.broadcast %cst_7 : f32 to vector<64x16xf32>
    %17 = arith.cmpf oge, %15, %16 : vector<64x16xf32>
    %cst_8 = arith.constant 2.000000e-01 : f32
    %18 = vector.broadcast %cst_8 : f32 to vector<64x16xf32>
    %19 = arith.mulf %18, %15 : vector<64x16xf32>
    %20 = arith.select %17, %15, %19 : vector<64x16xi1>, vector<64x16xf32>
    %21 = vector.extract_strided_slice %20 {offsets = [0, 0], sizes = [32, 16], strides = [1, 1]} : vector<64x16xf32> to vector<32x16xf32>
    %22 = vector.extract_strided_slice %20 {offsets = [32, 0], sizes = [32, 16], strides = [1, 1]} : vector<64x16xf32> to vector<32x16xf32>
    %23 = vector.extract_strided_slice %22 {offsets = [0, 0], sizes = [32, 1], strides = [1, 1]} : vector<32x16xf32> to vector<32x1xf32>
    %24 = vector.extract_strided_slice %22 {offsets = [0, 0], sizes = [32, 15], strides = [1, 1]} : vector<32x16xf32> to vector<32x15xf32>
    %25 = tpu.concatenate %23, %24 in 1 : vector<32x1xf32>, vector<32x15xf32> -> vector<32x16xf32>
    %26 = vector.extract_strided_slice %21 {offsets = [0, 1], sizes = [32, 15], strides = [1, 1]} : vector<32x16xf32> to vector<32x15xf32>
    %27 = vector.extract_strided_slice %21 {offsets = [0, 15], sizes = [32, 1], strides = [1, 1]} : vector<32x16xf32> to vector<32x1xf32>
    %28 = tpu.concatenate %26, %27 in 1 : vector<32x15xf32>, vector<32x1xf32> -> vector<32x16xf32>
    %29 = tpu.concatenate %25, %21, %22 in 0 : vector<32x16xf32>, vector<32x16xf32>, vector<32x16xf32> -> vector<96x16xf32>
    %30 = arith.truncf %29 : vector<96x16xf32> to vector<96x16xbf16>
    %31 = tpu.concatenate %21, %22, %28 in 0 : vector<32x16xf32>, vector<32x16xf32>, vector<32x16xf32> -> vector<96x16xf32>
    %32 = arith.truncf %31 : vector<96x16xf32> to vector<96x16xbf16>
    %c0_9 = arith.constant 0 : index
    %c0_10 = arith.constant 0 : index
    %33 = vector.load %arg4[%c0_9, %c0_10] : memref<32x96xbf16, #tpu.memory_space<vmem>>, vector<32x96xbf16>
    %cst_11 = arith.constant dense<0.000000e+00> : vector<32x16xf32>
    %34 = tpu.matmul %33, %30, %cst_11 {dimension_numbers = #tpu.dot_dimension_numbers<[1], [0], [0], [1], [0, 0, 1, 1], [], []>} : vector<32x96xbf16>, vector<96x16xbf16>, vector<32x16xf32> -> vector<32x16xf32>
    %c0_12 = arith.constant 0 : index
    %c0_13 = arith.constant 0 : index
    %c0_14 = arith.constant 0 : index
    %35 = vector.load %arg5[%c0_12, %c0_13, %c0_14] : memref<1x32x1xf32, #tpu.memory_space<vmem>>, vector<1x32x1xf32>
    %36 = vector.shape_cast %35 : vector<1x32x1xf32> to vector<32x1xf32>
    %37 = vector.broadcast %36 : vector<32x1xf32> to vector<32x16xf32>
    %38 = arith.addf %34, %37 : vector<32x16xf32>
    %cst_15 = arith.constant 0.000000e+00 : f32
    %39 = vector.broadcast %cst_15 : f32 to vector<32x16xf32>
    %40 = arith.cmpf oge, %38, %39 : vector<32x16xf32>
    %cst_16 = arith.constant 2.000000e-01 : f32
    %41 = vector.broadcast %cst_16 : f32 to vector<32x16xf32>
    %42 = arith.mulf %41, %38 : vector<32x16xf32>
    %43 = arith.select %40, %38, %42 : vector<32x16xi1>, vector<32x16xf32>
    %c0_17 = arith.constant 0 : index
    %c0_18 = arith.constant 0 : index
    %44 = vector.load %arg4[%c0_17, %c0_18] : memref<32x96xbf16, #tpu.memory_space<vmem>>, vector<32x96xbf16>
    %cst_19 = arith.constant dense<0.000000e+00> : vector<32x16xf32>
    %45 = tpu.matmul %44, %32, %cst_19 {dimension_numbers = #tpu.dot_dimension_numbers<[1], [0], [0], [1], [0, 0, 1, 1], [], []>} : vector<32x96xbf16>, vector<96x16xbf16>, vector<32x16xf32> -> vector<32x16xf32>
    %c0_20 = arith.constant 0 : index
    %c0_21 = arith.constant 0 : index
    %c0_22 = arith.constant 0 : index
    %46 = vector.load %arg5[%c0_20, %c0_21, %c0_22] : memref<1x32x1xf32, #tpu.memory_space<vmem>>, vector<1x32x1xf32>
    %47 = vector.shape_cast %46 : vector<1x32x1xf32> to vector<32x1xf32>
    %48 = vector.broadcast %47 : vector<32x1xf32> to vector<32x16xf32>
    %49 = arith.addf %45, %48 : vector<32x16xf32>
    %cst_23 = arith.constant 0.000000e+00 : f32
    %50 = vector.broadcast %cst_23 : f32 to vector<32x16xf32>
    %51 = arith.cmpf oge, %49, %50 : vector<32x16xf32>
    %cst_24 = arith.constant 2.000000e-01 : f32
    %52 = vector.broadcast %cst_24 : f32 to vector<32x16xf32>
    %53 = arith.mulf %52, %49 : vector<32x16xf32>
    %54 = arith.select %51, %49, %53 : vector<32x16xi1>, vector<32x16xf32>
    %cst_25 = arith.constant dense<0.000000e+00> : vector<32xf32>
    %55 = vector.multi_reduction <add>, %43, %cst_25 [1] : vector<32x16xf32> to vector<32xf32>
    %56 = vector.shape_cast %55 : vector<32xf32> to vector<32x1xf32>
    %cst_26 = arith.constant dense<0.000000e+00> : vector<32xf32>
    %57 = vector.multi_reduction <add>, %54, %cst_26 [1] : vector<32x16xf32> to vector<32xf32>
    %58 = vector.shape_cast %57 : vector<32xf32> to vector<32x1xf32>
    %59 = arith.addf %56, %58 : vector<32x1xf32>
    %cst_27 = arith.constant 3.200000e+01 : f32
    %60 = vector.broadcast %cst_27 : f32 to vector<32x1xf32>
    %61 = arith.divf %59, %60 : vector<32x1xf32>
    %62 = vector.broadcast %61 : vector<32x1xf32> to vector<32x16xf32>
    %63 = arith.subf %43, %62 : vector<32x16xf32>
    %64 = vector.broadcast %61 : vector<32x1xf32> to vector<32x16xf32>
    %65 = arith.subf %54, %64 : vector<32x16xf32>
    %66 = arith.mulf %63, %63 : vector<32x16xf32>
    %cst_28 = arith.constant dense<0.000000e+00> : vector<32xf32>
    %67 = vector.multi_reduction <add>, %66, %cst_28 [1] : vector<32x16xf32> to vector<32xf32>
    %68 = vector.shape_cast %67 : vector<32xf32> to vector<32x1xf32>
    %69 = arith.mulf %65, %65 : vector<32x16xf32>
    %cst_29 = arith.constant dense<0.000000e+00> : vector<32xf32>
    %70 = vector.multi_reduction <add>, %69, %cst_29 [1] : vector<32x16xf32> to vector<32xf32>
    %71 = vector.shape_cast %70 : vector<32xf32> to vector<32x1xf32>
    %72 = arith.addf %68, %71 : vector<32x1xf32>
    %cst_30 = arith.constant 3.200000e+01 : f32
    %73 = vector.broadcast %cst_30 : f32 to vector<32x1xf32>
    %74 = arith.divf %72, %73 : vector<32x1xf32>
    %cst_31 = arith.constant 9.99999974E-6 : f32
    %75 = vector.broadcast %cst_31 : f32 to vector<32x1xf32>
    %76 = arith.addf %74, %75 : vector<32x1xf32>
    %77 = math.rsqrt %76 : vector<32x1xf32>
    %78 = vector.broadcast %77 : vector<32x1xf32> to vector<32x16xf32>
    %79 = arith.mulf %63, %78 : vector<32x16xf32>
    %80 = arith.addf %79, %1 : vector<32x16xf32>
    %c0_32 = arith.constant 0 : index
    %c0_33 = arith.constant 0 : index
    %c0_34 = arith.constant 0 : index
    %81 = vector.load %arg6[%c0_32, %c0_33, %c0_34] : memref<1x32x16xf32, #tpu.memory_space<vmem>>, vector<1x32x16xf32>
    %82 = vector.shape_cast %81 : vector<1x32x16xf32> to vector<32x16xf32>
    %83 = vector.shape_cast %80 : vector<32x16xf32> to vector<1x32x16xf32>
    tpu.vector_store %arg6[%c0_32, %c0_33, %c0_34], %83 {strides = array<i32>} : memref<1x32x16xf32, #tpu.memory_space<vmem>>, vector<1x32x16xf32>,
    %84 = vector.broadcast %77 : vector<32x1xf32> to vector<32x16xf32>
    %85 = arith.mulf %65, %84 : vector<32x16xf32>
    %86 = arith.addf %85, %1 : vector<32x16xf32>
    %c0_35 = arith.constant 0 : index
    %c0_36 = arith.constant 0 : index
    %c0_37 = arith.constant 0 : index
    %87 = vector.load %arg7[%c0_35, %c0_36, %c0_37] : memref<1x32x16xf32, #tpu.memory_space<vmem>>, vector<1x32x16xf32>
    %88 = vector.shape_cast %87 : vector<1x32x16xf32> to vector<32x16xf32>
    %89 = vector.shape_cast %86 : vector<32x16xf32> to vector<1x32x16xf32>
    tpu.vector_store %arg7[%c0_35, %c0_36, %c0_37], %89 {strides = array<i32>} : memref<1x32x16xf32, #tpu.memory_space<vmem>>, vector<1x32x16xf32>,
    return
  }
  func.func @transform_0(%arg0: i32) -> (i32, i32, i32) {
    %c0_i32 = arith.constant 0 : i32
    %c0_i32_0 = arith.constant 0 : i32
    %c0_i32_1 = arith.constant 0 : i32
    return %arg0, %c0_i32, %c0_i32_0 : i32, i32, i32
  }
  func.func @transform_1(%arg0: i32) -> (i32, i32) {
    %c0_i32 = arith.constant 0 : i32
    %c0_i32_0 = arith.constant 0 : i32
    %c0_i32_1 = arith.constant 0 : i32
    return %c0_i32, %c0_i32_0 : i32, i32
  }
  func.func @transform_2(%arg0: i32) -> (i32, i32, i32) {
    %c0_i32 = arith.constant 0 : i32
    %c0_i32_0 = arith.constant 0 : i32
    %c0_i32_1 = arith.constant 0 : i32
    return %arg0, %c0_i32, %c0_i32_0 : i32, i32, i32
  }
  func.func @transform_3(%arg0: i32) -> (i32, i32) {
    %c0_i32 = arith.constant 0 : i32
    %c0_i32_0 = arith.constant 0 : i32
    %c0_i32_1 = arith.constant 0 : i32
    return %c0_i32, %c0_i32_0 : i32, i32
  }
  func.func @transform_4(%arg0: i32) -> (i32, i32, i32) {
    %c0_i32 = arith.constant 0 : i32
    %c0_i32_0 = arith.constant 0 : i32
    %c0_i32_1 = arith.constant 0 : i32
    return %arg0, %c0_i32, %c0_i32_0 : i32, i32, i32
  }
  func.func @transform_5(%arg0: i32) -> (i32, i32, i32) {
    %c0_i32 = arith.constant 0 : i32
    %c0_i32_0 = arith.constant 0 : i32
    %c0_i32_1 = arith.constant 0 : i32
    return %arg0, %c0_i32, %c0_i32_0 : i32, i32, i32
  }
  func.func @transform_6(%arg0: i32) -> (i32, i32, i32) {
    %c0_i32 = arith.constant 0 : i32
    %c0_i32_0 = arith.constant 0 : i32
    %c0_i32_1 = arith.constant 0 : i32
    return %arg0, %c0_i32, %c0_i32_0 : i32, i32, i32
  }
}

module attributes {stable_mosaic.version = 11 : i64} {
  func.func @_conv_block_kernel(%arg0: i32, %arg1: memref<1x32x32xf32, #tpu.memory_space<vmem>>, %arg2: memref<64x96xbf16, #tpu.memory_space<vmem>>, %arg3: memref<1x64x1xf32, #tpu.memory_space<vmem>>, %arg4: memref<32x96xbf16, #tpu.memory_space<vmem>>, %arg5: memref<1x32x1xf32, #tpu.memory_space<vmem>>, %arg6: memref<1x32x32xf32, #tpu.memory_space<vmem>>, %arg7: memref<1x32x32xf32, #tpu.memory_space<vmem>>) attributes {dimension_semantics = [#tpu.dimension_semantics<parallel>], iteration_bounds = array<i64: 2>, scalar_prefetch = 0 : i64, scratch_operands = 0 : i64, tpu.core_type = #tpu.core_type<tc>, window_params = [{transform_indices = @transform_0, window_bounds = array<i64: 1, 32, 32>}, {pipeline_mode = #tpu.pipeline_mode<synchronous>, transform_indices = @transform_1, window_bounds = array<i64: 64, 96>}, {transform_indices = @transform_2, window_bounds = array<i64: 1, 64, 1>}, {pipeline_mode = #tpu.pipeline_mode<synchronous>, transform_indices = @transform_3, window_bounds = array<i64: 32, 96>}, {transform_indices = @transform_4, window_bounds = array<i64: 1, 32, 1>}, {transform_indices = @transform_5, window_bounds = array<i64: 1, 32, 32>}, {transform_indices = @transform_6, window_bounds = array<i64: 1, 32, 32>}]} {
    %c0 = arith.constant 0 : index
    %c0_0 = arith.constant 0 : index
    %c0_1 = arith.constant 0 : index
    %0 = vector.load %arg1[%c0, %c0_0, %c0_1] : memref<1x32x32xf32, #tpu.memory_space<vmem>>, vector<1x32x32xf32>
    %1 = vector.shape_cast %0 : vector<1x32x32xf32> to vector<32x32xf32>
    %2 = vector.extract_strided_slice %1 {offsets = [0, 1], sizes = [32, 1], strides = [1, 1]} : vector<32x32xf32> to vector<32x1xf32>
    %3 = vector.extract_strided_slice %1 {offsets = [0, 0], sizes = [32, 31], strides = [1, 1]} : vector<32x32xf32> to vector<32x31xf32>
    %4 = tpu.concatenate %2, %3 in 1 : vector<32x1xf32>, vector<32x31xf32> -> vector<32x32xf32>
    %5 = vector.extract_strided_slice %1 {offsets = [0, 1], sizes = [32, 31], strides = [1, 1]} : vector<32x32xf32> to vector<32x31xf32>
    %6 = vector.extract_strided_slice %1 {offsets = [0, 30], sizes = [32, 1], strides = [1, 1]} : vector<32x32xf32> to vector<32x1xf32>
    %7 = tpu.concatenate %5, %6 in 1 : vector<32x31xf32>, vector<32x1xf32> -> vector<32x32xf32>
    %8 = tpu.concatenate %4, %1, %7 in 0 : vector<32x32xf32>, vector<32x32xf32>, vector<32x32xf32> -> vector<96x32xf32>
    %9 = arith.truncf %8 : vector<96x32xf32> to vector<96x32xbf16>
    %c0_2 = arith.constant 0 : index
    %c0_3 = arith.constant 0 : index
    %10 = vector.load %arg2[%c0_2, %c0_3] : memref<64x96xbf16, #tpu.memory_space<vmem>>, vector<64x96xbf16>
    %cst = arith.constant dense<0.000000e+00> : vector<64x32xf32>
    %11 = tpu.matmul %10, %9, %cst {dimension_numbers = #tpu.dot_dimension_numbers<[1], [0], [0], [1], [0, 0, 1, 1], [], []>} : vector<64x96xbf16>, vector<96x32xbf16>, vector<64x32xf32> -> vector<64x32xf32>
    %c0_4 = arith.constant 0 : index
    %c0_5 = arith.constant 0 : index
    %c0_6 = arith.constant 0 : index
    %12 = vector.load %arg3[%c0_4, %c0_5, %c0_6] : memref<1x64x1xf32, #tpu.memory_space<vmem>>, vector<1x64x1xf32>
    %13 = vector.shape_cast %12 : vector<1x64x1xf32> to vector<64x1xf32>
    %14 = vector.broadcast %13 : vector<64x1xf32> to vector<64x32xf32>
    %15 = arith.addf %11, %14 : vector<64x32xf32>
    %cst_7 = arith.constant 0.000000e+00 : f32
    %16 = vector.broadcast %cst_7 : f32 to vector<64x32xf32>
    %17 = arith.cmpf oge, %15, %16 : vector<64x32xf32>
    %cst_8 = arith.constant 2.000000e-01 : f32
    %18 = vector.broadcast %cst_8 : f32 to vector<64x32xf32>
    %19 = arith.mulf %18, %15 : vector<64x32xf32>
    %20 = arith.select %17, %15, %19 : vector<64x32xi1>, vector<64x32xf32>
    %21 = vector.extract_strided_slice %20 {offsets = [0, 0], sizes = [32, 32], strides = [1, 1]} : vector<64x32xf32> to vector<32x32xf32>
    %22 = vector.extract_strided_slice %20 {offsets = [32, 0], sizes = [32, 32], strides = [1, 1]} : vector<64x32xf32> to vector<32x32xf32>
    %23 = vector.extract_strided_slice %22 {offsets = [0, 0], sizes = [32, 1], strides = [1, 1]} : vector<32x32xf32> to vector<32x1xf32>
    %24 = vector.extract_strided_slice %22 {offsets = [0, 0], sizes = [32, 31], strides = [1, 1]} : vector<32x32xf32> to vector<32x31xf32>
    %25 = tpu.concatenate %23, %24 in 1 : vector<32x1xf32>, vector<32x31xf32> -> vector<32x32xf32>
    %26 = vector.extract_strided_slice %21 {offsets = [0, 1], sizes = [32, 31], strides = [1, 1]} : vector<32x32xf32> to vector<32x31xf32>
    %27 = vector.extract_strided_slice %21 {offsets = [0, 31], sizes = [32, 1], strides = [1, 1]} : vector<32x32xf32> to vector<32x1xf32>
    %28 = tpu.concatenate %26, %27 in 1 : vector<32x31xf32>, vector<32x1xf32> -> vector<32x32xf32>
    %29 = tpu.concatenate %25, %21, %22 in 0 : vector<32x32xf32>, vector<32x32xf32>, vector<32x32xf32> -> vector<96x32xf32>
    %30 = arith.truncf %29 : vector<96x32xf32> to vector<96x32xbf16>
    %31 = tpu.concatenate %21, %22, %28 in 0 : vector<32x32xf32>, vector<32x32xf32>, vector<32x32xf32> -> vector<96x32xf32>
    %32 = arith.truncf %31 : vector<96x32xf32> to vector<96x32xbf16>
    %c0_9 = arith.constant 0 : index
    %c0_10 = arith.constant 0 : index
    %33 = vector.load %arg4[%c0_9, %c0_10] : memref<32x96xbf16, #tpu.memory_space<vmem>>, vector<32x96xbf16>
    %cst_11 = arith.constant dense<0.000000e+00> : vector<32x32xf32>
    %34 = tpu.matmul %33, %30, %cst_11 {dimension_numbers = #tpu.dot_dimension_numbers<[1], [0], [0], [1], [0, 0, 1, 1], [], []>} : vector<32x96xbf16>, vector<96x32xbf16>, vector<32x32xf32> -> vector<32x32xf32>
    %c0_12 = arith.constant 0 : index
    %c0_13 = arith.constant 0 : index
    %c0_14 = arith.constant 0 : index
    %35 = vector.load %arg5[%c0_12, %c0_13, %c0_14] : memref<1x32x1xf32, #tpu.memory_space<vmem>>, vector<1x32x1xf32>
    %36 = vector.shape_cast %35 : vector<1x32x1xf32> to vector<32x1xf32>
    %37 = vector.broadcast %36 : vector<32x1xf32> to vector<32x32xf32>
    %38 = arith.addf %34, %37 : vector<32x32xf32>
    %cst_15 = arith.constant 0.000000e+00 : f32
    %39 = vector.broadcast %cst_15 : f32 to vector<32x32xf32>
    %40 = arith.cmpf oge, %38, %39 : vector<32x32xf32>
    %cst_16 = arith.constant 2.000000e-01 : f32
    %41 = vector.broadcast %cst_16 : f32 to vector<32x32xf32>
    %42 = arith.mulf %41, %38 : vector<32x32xf32>
    %43 = arith.select %40, %38, %42 : vector<32x32xi1>, vector<32x32xf32>
    %c0_17 = arith.constant 0 : index
    %c0_18 = arith.constant 0 : index
    %44 = vector.load %arg4[%c0_17, %c0_18] : memref<32x96xbf16, #tpu.memory_space<vmem>>, vector<32x96xbf16>
    %cst_19 = arith.constant dense<0.000000e+00> : vector<32x32xf32>
    %45 = tpu.matmul %44, %32, %cst_19 {dimension_numbers = #tpu.dot_dimension_numbers<[1], [0], [0], [1], [0, 0, 1, 1], [], []>} : vector<32x96xbf16>, vector<96x32xbf16>, vector<32x32xf32> -> vector<32x32xf32>
    %c0_20 = arith.constant 0 : index
    %c0_21 = arith.constant 0 : index
    %c0_22 = arith.constant 0 : index
    %46 = vector.load %arg5[%c0_20, %c0_21, %c0_22] : memref<1x32x1xf32, #tpu.memory_space<vmem>>, vector<1x32x1xf32>
    %47 = vector.shape_cast %46 : vector<1x32x1xf32> to vector<32x1xf32>
    %48 = vector.broadcast %47 : vector<32x1xf32> to vector<32x32xf32>
    %49 = arith.addf %45, %48 : vector<32x32xf32>
    %cst_23 = arith.constant 0.000000e+00 : f32
    %50 = vector.broadcast %cst_23 : f32 to vector<32x32xf32>
    %51 = arith.cmpf oge, %49, %50 : vector<32x32xf32>
    %cst_24 = arith.constant 2.000000e-01 : f32
    %52 = vector.broadcast %cst_24 : f32 to vector<32x32xf32>
    %53 = arith.mulf %52, %49 : vector<32x32xf32>
    %54 = arith.select %51, %49, %53 : vector<32x32xi1>, vector<32x32xf32>
    %cst_25 = arith.constant dense<0.000000e+00> : vector<32xf32>
    %55 = vector.multi_reduction <add>, %43, %cst_25 [1] : vector<32x32xf32> to vector<32xf32>
    %56 = vector.shape_cast %55 : vector<32xf32> to vector<32x1xf32>
    %cst_26 = arith.constant dense<0.000000e+00> : vector<32xf32>
    %57 = vector.multi_reduction <add>, %54, %cst_26 [1] : vector<32x32xf32> to vector<32xf32>
    %58 = vector.shape_cast %57 : vector<32xf32> to vector<32x1xf32>
    %59 = arith.addf %56, %58 : vector<32x1xf32>
    %cst_27 = arith.constant 6.400000e+01 : f32
    %60 = vector.broadcast %cst_27 : f32 to vector<32x1xf32>
    %61 = arith.divf %59, %60 : vector<32x1xf32>
    %62 = vector.broadcast %61 : vector<32x1xf32> to vector<32x32xf32>
    %63 = arith.subf %43, %62 : vector<32x32xf32>
    %64 = vector.broadcast %61 : vector<32x1xf32> to vector<32x32xf32>
    %65 = arith.subf %54, %64 : vector<32x32xf32>
    %66 = arith.mulf %63, %63 : vector<32x32xf32>
    %cst_28 = arith.constant dense<0.000000e+00> : vector<32xf32>
    %67 = vector.multi_reduction <add>, %66, %cst_28 [1] : vector<32x32xf32> to vector<32xf32>
    %68 = vector.shape_cast %67 : vector<32xf32> to vector<32x1xf32>
    %69 = arith.mulf %65, %65 : vector<32x32xf32>
    %cst_29 = arith.constant dense<0.000000e+00> : vector<32xf32>
    %70 = vector.multi_reduction <add>, %69, %cst_29 [1] : vector<32x32xf32> to vector<32xf32>
    %71 = vector.shape_cast %70 : vector<32xf32> to vector<32x1xf32>
    %72 = arith.addf %68, %71 : vector<32x1xf32>
    %cst_30 = arith.constant 6.400000e+01 : f32
    %73 = vector.broadcast %cst_30 : f32 to vector<32x1xf32>
    %74 = arith.divf %72, %73 : vector<32x1xf32>
    %cst_31 = arith.constant 9.99999974E-6 : f32
    %75 = vector.broadcast %cst_31 : f32 to vector<32x1xf32>
    %76 = arith.addf %74, %75 : vector<32x1xf32>
    %77 = math.rsqrt %76 : vector<32x1xf32>
    %78 = vector.broadcast %77 : vector<32x1xf32> to vector<32x32xf32>
    %79 = arith.mulf %63, %78 : vector<32x32xf32>
    %80 = arith.addf %79, %1 : vector<32x32xf32>
    %c0_32 = arith.constant 0 : index
    %c0_33 = arith.constant 0 : index
    %c0_34 = arith.constant 0 : index
    %81 = vector.load %arg6[%c0_32, %c0_33, %c0_34] : memref<1x32x32xf32, #tpu.memory_space<vmem>>, vector<1x32x32xf32>
    %82 = vector.shape_cast %81 : vector<1x32x32xf32> to vector<32x32xf32>
    %83 = vector.shape_cast %80 : vector<32x32xf32> to vector<1x32x32xf32>
    tpu.vector_store %arg6[%c0_32, %c0_33, %c0_34], %83 {strides = array<i32>} : memref<1x32x32xf32, #tpu.memory_space<vmem>>, vector<1x32x32xf32>,
    %84 = vector.broadcast %77 : vector<32x1xf32> to vector<32x32xf32>
    %85 = arith.mulf %65, %84 : vector<32x32xf32>
    %86 = arith.addf %85, %1 : vector<32x32xf32>
    %c0_35 = arith.constant 0 : index
    %c0_36 = arith.constant 0 : index
    %c0_37 = arith.constant 0 : index
    %87 = vector.load %arg7[%c0_35, %c0_36, %c0_37] : memref<1x32x32xf32, #tpu.memory_space<vmem>>, vector<1x32x32xf32>
    %88 = vector.shape_cast %87 : vector<1x32x32xf32> to vector<32x32xf32>
    %89 = vector.shape_cast %86 : vector<32x32xf32> to vector<1x32x32xf32>
    tpu.vector_store %arg7[%c0_35, %c0_36, %c0_37], %89 {strides = array<i32>} : memref<1x32x32xf32, #tpu.memory_space<vmem>>, vector<1x32x32xf32>,
    return
  }
  func.func @transform_0(%arg0: i32) -> (i32, i32, i32) {
    %c0_i32 = arith.constant 0 : i32
    %c0_i32_0 = arith.constant 0 : i32
    %c0_i32_1 = arith.constant 0 : i32
    return %arg0, %c0_i32, %c0_i32_0 : i32, i32, i32
  }
  func.func @transform_1(%arg0: i32) -> (i32, i32) {
    %c0_i32 = arith.constant 0 : i32
    %c0_i32_0 = arith.constant 0 : i32
    %c0_i32_1 = arith.constant 0 : i32
    return %c0_i32, %c0_i32_0 : i32, i32
  }
  func.func @transform_2(%arg0: i32) -> (i32, i32, i32) {
    %c0_i32 = arith.constant 0 : i32
    %c0_i32_0 = arith.constant 0 : i32
    %c0_i32_1 = arith.constant 0 : i32
    return %arg0, %c0_i32, %c0_i32_0 : i32, i32, i32
  }
  func.func @transform_3(%arg0: i32) -> (i32, i32) {
    %c0_i32 = arith.constant 0 : i32
    %c0_i32_0 = arith.constant 0 : i32
    %c0_i32_1 = arith.constant 0 : i32
    return %c0_i32, %c0_i32_0 : i32, i32
  }
  func.func @transform_4(%arg0: i32) -> (i32, i32, i32) {
    %c0_i32 = arith.constant 0 : i32
    %c0_i32_0 = arith.constant 0 : i32
    %c0_i32_1 = arith.constant 0 : i32
    return %arg0, %c0_i32, %c0_i32_0 : i32, i32, i32
  }
  func.func @transform_5(%arg0: i32) -> (i32, i32, i32) {
    %c0_i32 = arith.constant 0 : i32
    %c0_i32_0 = arith.constant 0 : i32
    %c0_i32_1 = arith.constant 0 : i32
    return %arg0, %c0_i32, %c0_i32_0 : i32, i32, i32
  }
  func.func @transform_6(%arg0: i32) -> (i32, i32, i32) {
    %c0_i32 = arith.constant 0 : i32
    %c0_i32_0 = arith.constant 0 : i32
    %c0_i32_1 = arith.constant 0 : i32
    return %arg0, %c0_i32, %c0_i32_0 : i32, i32, i32
  }
}

module attributes {stable_mosaic.version = 11 : i64} {
  func.func @_dense_block_kernel(%arg0: i32, %arg1: memref<1x32x64xf32, #tpu.memory_space<vmem>>, %arg2: memref<32x32xbf16, #tpu.memory_space<vmem>>, %arg3: memref<1x32x1xf32, #tpu.memory_space<vmem>>, %arg4: memref<32x32xbf16, #tpu.memory_space<vmem>>, %arg5: memref<1x32x1xf32, #tpu.memory_space<vmem>>, %arg6: memref<1x32x64xf32, #tpu.memory_space<vmem>>) attributes {dimension_semantics = [#tpu.dimension_semantics<parallel>], iteration_bounds = array<i64: 2>, scalar_prefetch = 0 : i64, scratch_operands = 0 : i64, tpu.core_type = #tpu.core_type<tc>, window_params = [{transform_indices = @transform_0, window_bounds = array<i64: 1, 32, 64>}, {pipeline_mode = #tpu.pipeline_mode<synchronous>, transform_indices = @transform_1, window_bounds = array<i64: 32, 32>}, {transform_indices = @transform_2, window_bounds = array<i64: 1, 32, 1>}, {pipeline_mode = #tpu.pipeline_mode<synchronous>, transform_indices = @transform_3, window_bounds = array<i64: 32, 32>}, {transform_indices = @transform_4, window_bounds = array<i64: 1, 32, 1>}, {transform_indices = @transform_5, window_bounds = array<i64: 1, 32, 64>}]} {
    %c0 = arith.constant 0 : index
    %c0_0 = arith.constant 0 : index
    %c0_1 = arith.constant 0 : index
    %0 = vector.load %arg1[%c0, %c0_0, %c0_1] : memref<1x32x64xf32, #tpu.memory_space<vmem>>, vector<1x32x64xf32>
    %1 = vector.shape_cast %0 : vector<1x32x64xf32> to vector<32x64xf32>
    %c0_2 = arith.constant 0 : index
    %c0_3 = arith.constant 0 : index
    %2 = vector.load %arg2[%c0_2, %c0_3] : memref<32x32xbf16, #tpu.memory_space<vmem>>, vector<32x32xbf16>
    %3 = arith.truncf %1 : vector<32x64xf32> to vector<32x64xbf16>
    %cst = arith.constant dense<0.000000e+00> : vector<32x64xf32>
    %4 = tpu.matmul %2, %3, %cst {dimension_numbers = #tpu.dot_dimension_numbers<[1], [0], [0], [1], [0, 0, 1, 1], [], []>} : vector<32x32xbf16>, vector<32x64xbf16>, vector<32x64xf32> -> vector<32x64xf32>
    %c0_4 = arith.constant 0 : index
    %c0_5 = arith.constant 0 : index
    %c0_6 = arith.constant 0 : index
    %5 = vector.load %arg3[%c0_4, %c0_5, %c0_6] : memref<1x32x1xf32, #tpu.memory_space<vmem>>, vector<1x32x1xf32>
    %6 = vector.shape_cast %5 : vector<1x32x1xf32> to vector<32x1xf32>
    %7 = vector.broadcast %6 : vector<32x1xf32> to vector<32x64xf32>
    %8 = arith.addf %4, %7 : vector<32x64xf32>
    %cst_7 = arith.constant 0.000000e+00 : f32
    %9 = vector.broadcast %cst_7 : f32 to vector<32x64xf32>
    %10 = arith.cmpf oge, %8, %9 : vector<32x64xf32>
    %cst_8 = arith.constant 2.000000e-01 : f32
    %11 = vector.broadcast %cst_8 : f32 to vector<32x64xf32>
    %12 = arith.mulf %11, %8 : vector<32x64xf32>
    %13 = arith.select %10, %8, %12 : vector<32x64xi1>, vector<32x64xf32>
    %c0_9 = arith.constant 0 : index
    %c0_10 = arith.constant 0 : index
    %14 = vector.load %arg4[%c0_9, %c0_10] : memref<32x32xbf16, #tpu.memory_space<vmem>>, vector<32x32xbf16>
    %15 = arith.truncf %13 : vector<32x64xf32> to vector<32x64xbf16>
    %cst_11 = arith.constant dense<0.000000e+00> : vector<32x64xf32>
    %16 = tpu.matmul %14, %15, %cst_11 {dimension_numbers = #tpu.dot_dimension_numbers<[1], [0], [0], [1], [0, 0, 1, 1], [], []>} : vector<32x32xbf16>, vector<32x64xbf16>, vector<32x64xf32> -> vector<32x64xf32>
    %c0_12 = arith.constant 0 : index
    %c0_13 = arith.constant 0 : index
    %c0_14 = arith.constant 0 : index
    %17 = vector.load %arg5[%c0_12, %c0_13, %c0_14] : memref<1x32x1xf32, #tpu.memory_space<vmem>>, vector<1x32x1xf32>
    %18 = vector.shape_cast %17 : vector<1x32x1xf32> to vector<32x1xf32>
    %19 = vector.broadcast %18 : vector<32x1xf32> to vector<32x64xf32>
    %20 = arith.addf %16, %19 : vector<32x64xf32>
    %cst_15 = arith.constant 0.000000e+00 : f32
    %21 = vector.broadcast %cst_15 : f32 to vector<32x64xf32>
    %22 = arith.cmpf oge, %20, %21 : vector<32x64xf32>
    %cst_16 = arith.constant 2.000000e-01 : f32
    %23 = vector.broadcast %cst_16 : f32 to vector<32x64xf32>
    %24 = arith.mulf %23, %20 : vector<32x64xf32>
    %25 = arith.select %22, %20, %24 : vector<32x64xi1>, vector<32x64xf32>
    %cst_17 = arith.constant dense<0.000000e+00> : vector<32xf32>
    %26 = vector.multi_reduction <add>, %25, %cst_17 [1] : vector<32x64xf32> to vector<32xf32>
    %27 = vector.shape_cast %26 : vector<32xf32> to vector<32x1xf32>
    %cst_18 = arith.constant 6.400000e+01 : f32
    %28 = vector.broadcast %cst_18 : f32 to vector<32x1xf32>
    %29 = arith.divf %27, %28 : vector<32x1xf32>
    %30 = vector.broadcast %29 : vector<32x1xf32> to vector<32x64xf32>
    %31 = arith.subf %25, %30 : vector<32x64xf32>
    %32 = arith.mulf %31, %31 : vector<32x64xf32>
    %cst_19 = arith.constant dense<0.000000e+00> : vector<32xf32>
    %33 = vector.multi_reduction <add>, %32, %cst_19 [1] : vector<32x64xf32> to vector<32xf32>
    %34 = vector.shape_cast %33 : vector<32xf32> to vector<32x1xf32>
    %cst_20 = arith.constant 6.400000e+01 : f32
    %35 = vector.broadcast %cst_20 : f32 to vector<32x1xf32>
    %36 = arith.divf %34, %35 : vector<32x1xf32>
    %cst_21 = arith.constant 9.99999974E-6 : f32
    %37 = vector.broadcast %cst_21 : f32 to vector<32x1xf32>
    %38 = arith.addf %36, %37 : vector<32x1xf32>
    %39 = math.rsqrt %38 : vector<32x1xf32>
    %40 = vector.broadcast %39 : vector<32x1xf32> to vector<32x64xf32>
    %41 = arith.mulf %31, %40 : vector<32x64xf32>
    %42 = arith.addf %41, %1 : vector<32x64xf32>
    %c0_22 = arith.constant 0 : index
    %c0_23 = arith.constant 0 : index
    %c0_24 = arith.constant 0 : index
    %43 = vector.load %arg6[%c0_22, %c0_23, %c0_24] : memref<1x32x64xf32, #tpu.memory_space<vmem>>, vector<1x32x64xf32>
    %44 = vector.shape_cast %43 : vector<1x32x64xf32> to vector<32x64xf32>
    %45 = vector.shape_cast %42 : vector<32x64xf32> to vector<1x32x64xf32>
    tpu.vector_store %arg6[%c0_22, %c0_23, %c0_24], %45 {strides = array<i32>} : memref<1x32x64xf32, #tpu.memory_space<vmem>>, vector<1x32x64xf32>,
    return
  }
  func.func @transform_0(%arg0: i32) -> (i32, i32, i32) {
    %c0_i32 = arith.constant 0 : i32
    %c0_i32_0 = arith.constant 0 : i32
    %c0_i32_1 = arith.constant 0 : i32
    return %arg0, %c0_i32, %c0_i32_0 : i32, i32, i32
  }
  func.func @transform_1(%arg0: i32) -> (i32, i32) {
    %c0_i32 = arith.constant 0 : i32
    %c0_i32_0 = arith.constant 0 : i32
    %c0_i32_1 = arith.constant 0 : i32
    return %c0_i32, %c0_i32_0 : i32, i32
  }
  func.func @transform_2(%arg0: i32) -> (i32, i32, i32) {
    %c0_i32 = arith.constant 0 : i32
    %c0_i32_0 = arith.constant 0 : i32
    %c0_i32_1 = arith.constant 0 : i32
    return %arg0, %c0_i32, %c0_i32_0 : i32, i32, i32
  }
  func.func @transform_3(%arg0: i32) -> (i32, i32) {
    %c0_i32 = arith.constant 0 : i32
    %c0_i32_0 = arith.constant 0 : i32
    %c0_i32_1 = arith.constant 0 : i32
    return %c0_i32, %c0_i32_0 : i32, i32
  }
  func.func @transform_4(%arg0: i32) -> (i32, i32, i32) {
    %c0_i32 = arith.constant 0 : i32
    %c0_i32_0 = arith.constant 0 : i32
    %c0_i32_1 = arith.constant 0 : i32
    return %arg0, %c0_i32, %c0_i32_0 : i32, i32, i32
  }
  func.func @transform_5(%arg0: i32) -> (i32, i32, i32) {
    %c0_i32 = arith.constant 0 : i32
    %c0_i32_0 = arith.constant 0 : i32
    %c0_i32_1 = arith.constant 0 : i32
    return %arg0, %c0_i32, %c0_i32_0 : i32, i32, i32
  }
}

module attributes {stable_mosaic.version = 11 : i64} {
  func.func @_bigru_kernel(%arg0: i32, %arg1: memref<1x64x2x48xf32, #tpu.memory_space<vmem>>, %arg2: memref<1x16x48xbf16, #tpu.memory_space<vmem>>, %arg3: memref<1x1x48xf32, #tpu.memory_space<vmem>>, %arg4: memref<1x64x2x16xf32, #tpu.memory_space<vmem>>, %arg5: memref<2x16xf32, #tpu.memory_space<vmem>>) attributes {dimension_semantics = [#tpu.dimension_semantics<parallel>], iteration_bounds = array<i64: 2>, scalar_prefetch = 0 : i64, scratch_operands = 1 : i64, tpu.core_type = #tpu.core_type<tc>, window_params = [{transform_indices = @transform_0, window_bounds = array<i64: 1, 64, 2, 48>}, {transform_indices = @transform_1, window_bounds = array<i64: 1, 16, 48>}, {transform_indices = @transform_2, window_bounds = array<i64: 1, 1, 48>}, {transform_indices = @transform_3, window_bounds = array<i64: 1, 64, 2, 16>}]} {
    %cst = arith.constant 0.000000e+00 : f32
    %0 = vector.broadcast %cst : f32 to vector<2x16xf32>
    %c0 = arith.constant 0 : index
    %c0_0 = arith.constant 0 : index
    %1 = vector.load %arg5[%c0, %c0_0] : memref<2x16xf32, #tpu.memory_space<vmem>>, vector<2x16xf32>
    tpu.vector_store %arg5[%c0, %c0_0], %0 {strides = array<i32>} : memref<2x16xf32, #tpu.memory_space<vmem>>, vector<2x16xf32>,
    %c0_1 = arith.constant 0 : index
    %c0_2 = arith.constant 0 : index
    %c0_3 = arith.constant 0 : index
    %2 = vector.load %arg2[%c0_1, %c0_2, %c0_3] : memref<1x16x48xbf16, #tpu.memory_space<vmem>>, vector<1x16x48xbf16>
    %3 = vector.shape_cast %2 : vector<1x16x48xbf16> to vector<16x48xbf16>
    %c0_4 = arith.constant 0 : index
    %c0_5 = arith.constant 0 : index
    %c0_6 = arith.constant 0 : index
    %4 = vector.load %arg3[%c0_4, %c0_5, %c0_6] : memref<1x1x48xf32, #tpu.memory_space<vmem>>, vector<1x1x48xf32>
    %5 = vector.shape_cast %4 : vector<1x1x48xf32> to vector<1x48xf32>
    %c0_i32 = arith.constant 0 : i32
    %c64_i32 = arith.constant 64 : i32
    %6 = arith.addi %c0_i32, %c64_i32 : i32
    %c1_i32 = arith.constant 1 : i32
    scf.for %arg6 = %c0_i32 to %6 step %c1_i32  : i32 {
      %c0_i32_8 = arith.constant 0 : i32
      %7 = arith.cmpi eq, %arg0, %c0_i32_8 : i32
      %c63_i32 = arith.constant 63 : i32
      %8 = arith.subi %c63_i32, %arg6 : i32
      %9 = arith.select %7, %arg6, %8 : i32
      %c0_9 = arith.constant 0 : index
      %10 = arith.index_cast %9 : i32 to index
      %c0_10 = arith.constant 0 : index
      %c0_11 = arith.constant 0 : index
      %11 = vector.load %arg1[%c0_9, %10, %c0_10, %c0_11] : memref<1x64x2x48xf32, #tpu.memory_space<vmem>>, vector<1x1x2x48xf32>
      %12 = vector.shape_cast %11 : vector<1x1x2x48xf32> to vector<2x48xf32>
      %c0_12 = arith.constant 0 : index
      %c0_13 = arith.constant 0 : index
      %13 = vector.load %arg5[%c0_12, %c0_13] : memref<2x16xf32, #tpu.memory_space<vmem>>, vector<2x16xf32>
      %14 = arith.truncf %13 : vector<2x16xf32> to vector<2x16xbf16>
      %cst_14 = arith.constant dense<0.000000e+00> : vector<2x48xf32>
      %15 = tpu.matmul %14, %3, %cst_14 {dimension_numbers = #tpu.dot_dimension_numbers<[1], [0], [0], [1], [0, 0, 1, 1], [], []>} : vector<2x16xbf16>, vector<16x48xbf16>, vector<2x48xf32> -> vector<2x48xf32>
      %16 = vector.broadcast %5 : vector<1x48xf32> to vector<2x48xf32>
      %17 = arith.addf %15, %16 : vector<2x48xf32>
      %18 = vector.extract_strided_slice %12 {offsets = [0, 0], sizes = [2, 16], strides = [1, 1]} : vector<2x48xf32> to vector<2x16xf32>
      %19 = vector.extract_strided_slice %17 {offsets = [0, 0], sizes = [2, 16], strides = [1, 1]} : vector<2x48xf32> to vector<2x16xf32>
      %20 = arith.addf %18, %19 : vector<2x16xf32>
      %21 = arith.negf %20 : vector<2x16xf32>
      %22 = math.exp %21 : vector<2x16xf32>
      %cst_15 = arith.constant 1.000000e+00 : f32
      %23 = vector.broadcast %cst_15 : f32 to vector<2x16xf32>
      %24 = arith.addf %23, %22 : vector<2x16xf32>
      %25 = arith.divf %23, %24 : vector<2x16xf32>
      %26 = vector.extract_strided_slice %12 {offsets = [0, 16], sizes = [2, 16], strides = [1, 1]} : vector<2x48xf32> to vector<2x16xf32>
      %27 = vector.extract_strided_slice %17 {offsets = [0, 16], sizes = [2, 16], strides = [1, 1]} : vector<2x48xf32> to vector<2x16xf32>
      %28 = arith.addf %26, %27 : vector<2x16xf32>
      %29 = arith.negf %28 : vector<2x16xf32>
      %30 = math.exp %29 : vector<2x16xf32>
      %cst_16 = arith.constant 1.000000e+00 : f32
      %31 = vector.broadcast %cst_16 : f32 to vector<2x16xf32>
      %32 = arith.addf %31, %30 : vector<2x16xf32>
      %33 = arith.divf %31, %32 : vector<2x16xf32>
      %34 = vector.extract_strided_slice %12 {offsets = [0, 32], sizes = [2, 16], strides = [1, 1]} : vector<2x48xf32> to vector<2x16xf32>
      %35 = vector.extract_strided_slice %17 {offsets = [0, 32], sizes = [2, 16], strides = [1, 1]} : vector<2x48xf32> to vector<2x16xf32>
      %36 = arith.mulf %25, %35 : vector<2x16xf32>
      %37 = arith.addf %34, %36 : vector<2x16xf32>
      %38 = math.tanh %37 : vector<2x16xf32>
      %cst_17 = arith.constant 1.000000e+00 : f32
      %39 = vector.broadcast %cst_17 : f32 to vector<2x16xf32>
      %40 = arith.subf %39, %33 : vector<2x16xf32>
      %41 = arith.mulf %40, %38 : vector<2x16xf32>
      %42 = arith.mulf %33, %13 : vector<2x16xf32>
      %43 = arith.addf %41, %42 : vector<2x16xf32>
      %c0_18 = arith.constant 0 : index
      %c0_19 = arith.constant 0 : index
      %44 = vector.load %arg5[%c0_18, %c0_19] : memref<2x16xf32, #tpu.memory_space<vmem>>, vector<2x16xf32>
      tpu.vector_store %arg5[%c0_18, %c0_19], %43 {strides = array<i32>} : memref<2x16xf32, #tpu.memory_space<vmem>>, vector<2x16xf32>,
      %c0_20 = arith.constant 0 : index
      %45 = arith.index_cast %9 : i32 to index
      %c0_21 = arith.constant 0 : index
      %c0_22 = arith.constant 0 : index
      %46 = vector.load %arg4[%c0_20, %45, %c0_21, %c0_22] : memref<1x64x2x16xf32, #tpu.memory_space<vmem>>, vector<1x1x2x16xf32>
      %47 = vector.shape_cast %46 : vector<1x1x2x16xf32> to vector<2x16xf32>
      %48 = vector.shape_cast %43 : vector<2x16xf32> to vector<1x1x2x16xf32>
      tpu.vector_store %arg4[%c0_20, %45, %c0_21, %c0_22], %48 {strides = array<i32>} : memref<1x64x2x16xf32, #tpu.memory_space<vmem>>, vector<1x1x2x16xf32>,
    }
    %c64_i32_7 = arith.constant 64 : i32
    return
  }
  func.func @transform_0(%arg0: i32) -> (i32, i32, i32, i32) {
    %c0_i32 = arith.constant 0 : i32
    %c0_i32_0 = arith.constant 0 : i32
    %c0_i32_1 = arith.constant 0 : i32
    %c0_i32_2 = arith.constant 0 : i32
    return %arg0, %c0_i32, %c0_i32_0, %c0_i32_1 : i32, i32, i32, i32
  }
  func.func @transform_1(%arg0: i32) -> (i32, i32, i32) {
    %c0_i32 = arith.constant 0 : i32
    %c0_i32_0 = arith.constant 0 : i32
    %c0_i32_1 = arith.constant 0 : i32
    return %arg0, %c0_i32, %c0_i32_0 : i32, i32, i32
  }
  func.func @transform_2(%arg0: i32) -> (i32, i32, i32) {
    %c0_i32 = arith.constant 0 : i32
    %c0_i32_0 = arith.constant 0 : i32
    %c0_i32_1 = arith.constant 0 : i32
    return %arg0, %c0_i32, %c0_i32_0 : i32, i32, i32
  }
  func.func @transform_3(%arg0: i32) -> (i32, i32, i32, i32) {
    %c0_i32 = arith.constant 0 : i32
    %c0_i32_0 = arith.constant 0 : i32
    %c0_i32_1 = arith.constant 0 : i32
    %c0_i32_2 = arith.constant 0 : i32
    return %arg0, %c0_i32, %c0_i32_0, %c0_i32_1 : i32, i32, i32, i32
  }
}

module attributes {stable_mosaic.version = 11 : i64} {
  func.func @_head_kernel(%arg0: i32, %arg1: memref<1x32x64xf32, #tpu.memory_space<vmem>>, %arg2: memref<1x32x64xf32, #tpu.memory_space<vmem>>, %arg3: memref<1x32x1xf32, #tpu.memory_space<vmem>>, %arg4: memref<32x32xbf16, #tpu.memory_space<vmem>>, %arg5: memref<32x32xbf16, #tpu.memory_space<vmem>>, %arg6: memref<33x32xbf16, #tpu.memory_space<vmem>>, %arg7: memref<33x1xf32, #tpu.memory_space<vmem>>, %arg8: memref<1x33x64xf32, #tpu.memory_space<vmem>>) attributes {dimension_semantics = [#tpu.dimension_semantics<parallel>], iteration_bounds = array<i64: 2>, scalar_prefetch = 0 : i64, scratch_operands = 0 : i64, tpu.core_type = #tpu.core_type<tc>, window_params = [{transform_indices = @transform_0, window_bounds = array<i64: 1, 32, 64>}, {transform_indices = @transform_1, window_bounds = array<i64: 1, 32, 64>}, {transform_indices = @transform_2, window_bounds = array<i64: 1, 32, 1>}, {pipeline_mode = #tpu.pipeline_mode<synchronous>, transform_indices = @transform_3, window_bounds = array<i64: 32, 32>}, {pipeline_mode = #tpu.pipeline_mode<synchronous>, transform_indices = @transform_4, window_bounds = array<i64: 32, 32>}, {pipeline_mode = #tpu.pipeline_mode<synchronous>, transform_indices = @transform_5, window_bounds = array<i64: 33, 32>}, {pipeline_mode = #tpu.pipeline_mode<synchronous>, transform_indices = @transform_6, window_bounds = array<i64: 33, 1>}, {transform_indices = @transform_7, window_bounds = array<i64: 1, 33, 64>}]} {
    %c0 = arith.constant 0 : index
    %c0_0 = arith.constant 0 : index
    %0 = vector.load %arg4[%c0, %c0_0] : memref<32x32xbf16, #tpu.memory_space<vmem>>, vector<32x32xbf16>
    %c0_1 = arith.constant 0 : index
    %c0_2 = arith.constant 0 : index
    %c0_3 = arith.constant 0 : index
    %1 = vector.load %arg1[%c0_1, %c0_2, %c0_3] : memref<1x32x64xf32, #tpu.memory_space<vmem>>, vector<1x32x64xf32>
    %2 = vector.shape_cast %1 : vector<1x32x64xf32> to vector<32x64xf32>
    %3 = arith.truncf %2 : vector<32x64xf32> to vector<32x64xbf16>
    %cst = arith.constant dense<0.000000e+00> : vector<32x64xf32>
    %4 = tpu.matmul %0, %3, %cst {dimension_numbers = #tpu.dot_dimension_numbers<[1], [0], [0], [1], [0, 0, 1, 1], [], []>} : vector<32x32xbf16>, vector<32x64xbf16>, vector<32x64xf32> -> vector<32x64xf32>
    %c0_4 = arith.constant 0 : index
    %c0_5 = arith.constant 0 : index
    %5 = vector.load %arg5[%c0_4, %c0_5] : memref<32x32xbf16, #tpu.memory_space<vmem>>, vector<32x32xbf16>
    %c0_6 = arith.constant 0 : index
    %c0_7 = arith.constant 0 : index
    %c0_8 = arith.constant 0 : index
    %6 = vector.load %arg2[%c0_6, %c0_7, %c0_8] : memref<1x32x64xf32, #tpu.memory_space<vmem>>, vector<1x32x64xf32>
    %7 = vector.shape_cast %6 : vector<1x32x64xf32> to vector<32x64xf32>
    %8 = arith.truncf %7 : vector<32x64xf32> to vector<32x64xbf16>
    %cst_9 = arith.constant dense<0.000000e+00> : vector<32x64xf32>
    %9 = tpu.matmul %5, %8, %cst_9 {dimension_numbers = #tpu.dot_dimension_numbers<[1], [0], [0], [1], [0, 0, 1, 1], [], []>} : vector<32x32xbf16>, vector<32x64xbf16>, vector<32x64xf32> -> vector<32x64xf32>
    %10 = arith.addf %4, %9 : vector<32x64xf32>
    %c0_10 = arith.constant 0 : index
    %c0_11 = arith.constant 0 : index
    %c0_12 = arith.constant 0 : index
    %11 = vector.load %arg3[%c0_10, %c0_11, %c0_12] : memref<1x32x1xf32, #tpu.memory_space<vmem>>, vector<1x32x1xf32>
    %12 = vector.shape_cast %11 : vector<1x32x1xf32> to vector<32x1xf32>
    %13 = vector.broadcast %12 : vector<32x1xf32> to vector<32x64xf32>
    %14 = arith.addf %10, %13 : vector<32x64xf32>
    %cst_13 = arith.constant 0.000000e+00 : f32
    %15 = vector.broadcast %cst_13 : f32 to vector<32x64xf32>
    %16 = arith.cmpf oge, %14, %15 : vector<32x64xf32>
    %cst_14 = arith.constant 2.000000e-01 : f32
    %17 = vector.broadcast %cst_14 : f32 to vector<32x64xf32>
    %18 = arith.mulf %17, %14 : vector<32x64xf32>
    %19 = arith.select %16, %14, %18 : vector<32x64xi1>, vector<32x64xf32>
    %c0_15 = arith.constant 0 : index
    %c0_16 = arith.constant 0 : index
    %20 = vector.load %arg6[%c0_15, %c0_16] : memref<33x32xbf16, #tpu.memory_space<vmem>>, vector<33x32xbf16>
    %21 = arith.truncf %19 : vector<32x64xf32> to vector<32x64xbf16>
    %cst_17 = arith.constant dense<0.000000e+00> : vector<33x64xf32>
    %22 = tpu.matmul %20, %21, %cst_17 {dimension_numbers = #tpu.dot_dimension_numbers<[1], [0], [0], [1], [0, 0, 1, 1], [], []>} : vector<33x32xbf16>, vector<32x64xbf16>, vector<33x64xf32> -> vector<33x64xf32>
    %c0_18 = arith.constant 0 : index
    %c0_19 = arith.constant 0 : index
    %23 = vector.load %arg7[%c0_18, %c0_19] : memref<33x1xf32, #tpu.memory_space<vmem>>, vector<33x1xf32>
    %24 = vector.broadcast %23 : vector<33x1xf32> to vector<33x64xf32>
    %25 = arith.addf %22, %24 : vector<33x64xf32>
    %26 = math.exp %25 : vector<33x64xf32>
    %c0_20 = arith.constant 0 : index
    %c0_21 = arith.constant 0 : index
    %c0_22 = arith.constant 0 : index
    %27 = vector.load %arg8[%c0_20, %c0_21, %c0_22] : memref<1x33x64xf32, #tpu.memory_space<vmem>>, vector<1x33x64xf32>
    %28 = vector.shape_cast %27 : vector<1x33x64xf32> to vector<33x64xf32>
    %29 = vector.shape_cast %26 : vector<33x64xf32> to vector<1x33x64xf32>
    tpu.vector_store %arg8[%c0_20, %c0_21, %c0_22], %29 {strides = array<i32>} : memref<1x33x64xf32, #tpu.memory_space<vmem>>, vector<1x33x64xf32>,
    return
  }
  func.func @transform_0(%arg0: i32) -> (i32, i32, i32) {
    %c0_i32 = arith.constant 0 : i32
    %c0_i32_0 = arith.constant 0 : i32
    %c0_i32_1 = arith.constant 0 : i32
    return %arg0, %c0_i32, %c0_i32_0 : i32, i32, i32
  }
  func.func @transform_1(%arg0: i32) -> (i32, i32, i32) {
    %c0_i32 = arith.constant 0 : i32
    %c0_i32_0 = arith.constant 0 : i32
    %c0_i32_1 = arith.constant 0 : i32
    return %arg0, %c0_i32, %c0_i32_0 : i32, i32, i32
  }
  func.func @transform_2(%arg0: i32) -> (i32, i32, i32) {
    %c0_i32 = arith.constant 0 : i32
    %c0_i32_0 = arith.constant 0 : i32
    %c0_i32_1 = arith.constant 0 : i32
    return %arg0, %c0_i32, %c0_i32_0 : i32, i32, i32
  }
  func.func @transform_3(%arg0: i32) -> (i32, i32) {
    %c0_i32 = arith.constant 0 : i32
    %c0_i32_0 = arith.constant 0 : i32
    %c0_i32_1 = arith.constant 0 : i32
    return %c0_i32, %c0_i32_0 : i32, i32
  }
  func.func @transform_4(%arg0: i32) -> (i32, i32) {
    %c0_i32 = arith.constant 0 : i32
    %c0_i32_0 = arith.constant 0 : i32
    %c0_i32_1 = arith.constant 0 : i32
    return %c0_i32, %c0_i32_0 : i32, i32
  }
  func.func @transform_5(%arg0: i32) -> (i32, i32) {
    %c0_i32 = arith.constant 0 : i32
    %c0_i32_0 = arith.constant 0 : i32
    %c0_i32_1 = arith.constant 0 : i32
    return %c0_i32, %c0_i32_0 : i32, i32
  }
  func.func @transform_6(%arg0: i32) -> (i32, i32) {
    %c0_i32 = arith.constant 0 : i32
    %c0_i32_0 = arith.constant 0 : i32
    %c0_i32_1 = arith.constant 0 : i32
    return %c0_i32, %c0_i32_0 : i32, i32
  }
  func.func @transform_7(%arg0: i32) -> (i32, i32, i32) {
    %c0_i32 = arith.constant 0 : i32
    %c0_i32_0 = arith.constant 0 : i32
    %c0_i32_1 = arith.constant 0 : i32
    return %arg0, %c0_i32, %c0_i32_0 : i32, i32, i32
  }
}

</mosaic_0001>

<bundles_post_ra>
// kernel: decoder_forward.8
= control target key start
LH: loop header
LB: loop body
LE: loop exit
PB: predicated region body
PF: predicated region fallthrough
CT: control target
= control target key end

     0   :  { %s2251_s0 = inlined_call_operand.hbm [shape: f32[2,32,16], index: 0, kind: input, shape index: {}]   ;;  %s2252_s1 = inlined_call_operand.hbm [shape: bf16[64,96], index: 1, kind: input, shape index: {}]   ;;  %s2253_s2 = inlined_call_operand.hbm [shape: f32[2,64,1], index: 2, kind: input, shape index: {}]   ;;  %s2254_s3 = inlined_call_operand.hbm [shape: bf16[32,96], index: 3, kind: input, shape index: {}]   ;;  %s2255_s4 = inlined_call_operand.hbm [shape: f32[2,32,1], index: 4, kind: input, shape index: {}]   ;;  %s2256_s5 = inlined_call_operand.hbm [shape: f32[2,32,16], index: 5, kind: output, shape index: {0}]   ;;  %s2257_s6 = inlined_call_operand.hbm [shape: f32[2,32,16], index: 6, kind: output, shape index: {1}]  }
   0x1   :  { %2277 = sst [smem:[#allocation25_spill]] %s2251_s0 }
   0x2   :  { %2278 = sst [smem:[#allocation26_spill]] %s2252_s1 }
   0x3   :  { %12 = vsyncpa [#allocation3], 0 }
   0x4   :  { %14 = vsyncpa [#allocation3 + $0x1], 0 }
   0x5   :  { %15 = vsyncpa [#allocation6], 0 }
   0x6   :  { %16 = vsyncpa [#allocation10], 0 }
   0x7   :  { %18 = vsyncpa [#allocation10 + $0x1], 0 }
   0x8   :  { %19 = vsyncpa [#allocation4], 0 }
   0x9   :  { %21 = vsyncpa [#allocation4 + $0x1], 0 }
   0xa   :  { %22 = vsyncpa [#allocation13], 0 }
   0xb   :  { %24 = vsyncpa [#allocation13 + $0x1], 0  ;;  %s1731_s21 = smov 0   ;;  %s1733_s22 = smov 0  }
   0xc   :  { %s1735_s23 = smov 0   ;;  %s1737_s24 = smov 0  }
   0xd LB: > { %2279 = sst [smem:[#allocation21_spill]] %s1674_s23  ;;  %s1752_s25 = sadd.s32 4294967295, %s1678_s24   ;;  %s1678_s24 = sphi %s1737_s24, %s2314_s24   ;;  %s1674_s23 = sphi %s1735_s23, %s2319_s23   ;;  %s1670_s22 = sphi %s1733_s22, %s2318_s22   ;;  %s1666_s21 = sphi %s1731_s21, %s2317_s21  }
   0xe   : > { %s1144_s26 = sadd.s32 4294967294, %s1678_s24   ;;  %s1756_s27 = sadd.s32 1, %s1678_s24  }
   0xf   : > { %2280 = sst [smem:[#allocation22_spill]] %s1756_s27  ;;  %s37_s28 = sadd.s32 1, %s1674_s23 }
  0x10   : > { %s34_s29 = ssub.s32 %s1678_s24, %s1756_s27  ;;  %p44_p0 = scmp.ne.s32.totalorder %s1674_s23, %s1670_s22 }
  0x11   : > { %p35_p1 = scmp.eq.s32.totalorder %s34_s29, 0  ;;  %p45_p2 = scmp.eq.s32.totalorder %s1678_s24, 0 }
  0x12   : > { %p50_p3 = scmp.ne.s32.totalorder %s1670_s22, %s1666_s21  ;;  %p2258_p4 = scmp.eq.s32.totalorder %s1752_s25, 0 }
  0x13   : > { %s1768_s30 = scalar_select %p35_p1, %s1674_s23, %s37_s28  }
  0x14   : > { %p1770_p5 = por %p45_p2, %p44_p0  ;;  %p1776_p6 = por %p2258_p4, %p50_p3 }
  0x15   : > { %2281 = sst [smem:[#allocation23_spill]] %s1768_s30  ;;  %p168_p7 = scmp.eq.s32.totalorder %s1752_s25, 1 }
  0x16   : > { %s2282_s7 = scalar_select %p1770_p5, 1, 0 }
  0x17   : > { %s2283_s8 = scalar_select %p1776_p6, 1, 0 }
  0x18   : > { %p174_p8 = scmp.eq.s32.totalorder %s1144_s26, 1  ;;  %p1145_p9 = scmp.ge.s32.totalorder %s1678_s24, 1 }
  0x19   : > { %p207_p10 = scmp.lt.s32.totalorder %s1678_s24, 3  ;;  %p1783_p11 = por %p168_p7, %p44_p0 }
  0x1a   : > { %p1787_p12 = por %p174_p8, %p50_p3  ;;  %s1680_s12 = smov [#allocation5]  }
  0x1b   : > { %s2284_s9 = scalar_select %p1783_p11, 1, 0 }
  0x1c   : > { %s2285_s10 = scalar_select %p1787_p12, 1, 0 }
  0x1d   : > { %p1791_p13 = pnand %p1145_p9, %p207_p10  ;;  %s219_s13 = sshll.u32 %s1680_s12, 4  ;;  %s220_s13 = int_to_ptr.vmem [resolvable:$true] %s219_s13 }
  0x1e   : > { %2286 = sst [smem:[#allocation24_spill]] %s2285_s10  ;;  %s246_s15 = sand.u32 1, %s1678_s24  }
  0x1f   : > { %s2287_s11 = scalar_select %p1791_p13, 1, 0 }
  0x20   : > { %p1289_p1 = pneg %p1791_p13  ;;  %s2289_s1 = sld [smem:[#allocation26_spill]] }
  0x22   : > { %p1799_p2 = pnand %p1289_p1, %p2258_p4 }
  0x24   : > { %s2288_s14 = scalar_select %p1799_p2, 1, 0 }
  0x25   : > { %p2266_p8 = pneg %p1799_p2 }
  0x26   : > { %s1418_s18 = scalar_lea.hbm %s2289_s1, 512 }
  0x27   : > { %p1419_p7 = scmp.ne.s32.totalorder %s2289_s1, %s1418_s18  ;;  %p1425_p1 = scmp.lt.u32.totalorder %s1418_s18, %s2289_s1 }
  0x29   : > { %p1421_p9 = pnand %p2266_p8, %p1419_p7 }
  0x2b   : > { %p1422_p10 = pneg %p1421_p9 }
  0x2d   : > { %p1427_p0 = pnand %p1425_p1, %p1422_p10 }
  0x2f   : > { %1430 = shalt.err (!%p1427_p0)
}
  0x30   : > { %s1431_s29 = scalar_lea.vmem %s220_s13, 512  ;;  %p1439_p11 = scmp.lt.s32.totalorder %s220_s13, %s220_s13 }
  0x31   : > { %p1432_p4 = scmp.ne.s32.totalorder %s220_s13, %s1431_s29  ;;  %p1440_p6 = scmp.lt.s32.totalorder %s1431_s29, %s1431_s29 }
  0x33   : > { %p1434_p3 = pnand %p1432_p4, %p2266_p8  ;;  %p1441_p13 = por %p1440_p6, %p1439_p11 }
  0x35   : > { %p1435_p12 = pneg %p1434_p3 }
  0x37   : > { %p1442_p5 = pnand %p1441_p13, %p1435_p12 }
  0x39   : > { %1445 = shalt.err (!%p1442_p5)
}
  0x3a   : > { %s2262_s12 = smov 64   ;;  %s2265_s16 = smov 4  }
  0x3b   : > { %1292 = dma.hbm_to_vmem [thread:$0]  (!%p1799_p2), %s2289_s1, 512, %s220_s13, [#allocation6], %s2262_s12, %s2262_s12, %s2265_s16  }
  0x3c   : > { %s1832_s19 = sand.u32 1, %s1674_s23   ;;  %s2263_s20 = sshll.u32 %s1678_s24, 9 }
  0x3d   : > { %s2264_s26 = sshll.u32 %s1832_s19, 5  ;;  %s2290_s0 = sld [smem:[#allocation25_spill]] }
  0x3e   : > { %p2291_p4 = scmp.ne.s32.totalorder %s2282_s7, 0  ;;  %p2292_p5 = scmp.lt.s32.totalorder %s1678_s24, 2 }
  0x3f   : > { %s250_s17 = scalar_lea.vmem [#allocation2], %s2264_s26  ;;  %s1855_s12 = scalar_lea.sflag [#allocation3], %s246_s15 }
  0x40   : > { %p1847_p6 = pnand %p2292_p5, %p2291_p4  ;;  %s257_s18 = sshll.u32 %s250_s17, 4  ;;  %s1853_s18 = int_to_ptr.vmem [resolvable:$true] %s257_s18 }
  0x42   : > { %s2293_s13 = scalar_select %p1847_p6, 1, 0 }
  0x43   : > { %s1841_s30 = scalar_lea.hbm %s2290_s0, %s2263_s20  ;;  %p1861_p12 = pneg %p1847_p6 }
  0x44   : > { %s1446_s28 = scalar_lea.hbm %s1841_s30, 512  ;;  %s1451_s26 = scalar_lea.hbm %s2290_s0, 1024 }
  0x45   : > { %p1447_p11 = scmp.ne.s32.totalorder %s1841_s30, %s1446_s28  ;;  %p1452_p3 = scmp.lt.u32.totalorder %s1841_s30, %s2290_s0 }
  0x46   : > { %s2294_s7 = scalar_select %p1861_p12, 1, 0 }
  0x47   : > { %p1449_p13 = pnand %p1861_p12, %p1447_p11  ;;  %p1453_p7 = scmp.lt.u32.totalorder %s1451_s26, %s1446_s28 }
  0x48   : > { %p1455_p10 = scmp.lt.u32.totalorder %s1446_s28, %s1841_s30 }
  0x49   : > { %p1450_p0 = pneg %p1449_p13  ;;  %p1454_p9 = por %p1453_p7, %p1452_p3 }
  0x4b   : > { %p1456_p1 = por %p1455_p10, %p1454_p9 }
  0x4d   : > { %p1457_p4 = pnand %p1456_p1, %p1450_p0 }
  0x4f   : > { %1460 = shalt.err (!%p1457_p4)
}
  0x50   : > { %s1461_s15 = scalar_lea.vmem %s1853_s18, 512  ;;  %s1683_s20 = smov [#allocation2]  }
  0x51   : > { %p1462_p5 = scmp.ne.s32.totalorder %s1853_s18, %s1461_s15  ;;  %s1466_s29 = sshll.u32 %s1683_s20, 4  ;;  %s1467_s29 = int_to_ptr.vmem [resolvable:$false] %s1466_s29 }
  0x52   : > { %s1468_s16 = scalar_lea.vmem %s1467_s29, 1024  ;;  %p1469_p8 = scmp.lt.s32.totalorder %s1853_s18, %s1467_s29 }
  0x53   : > { %p1464_p11 = pnand %p1462_p5, %p1861_p12  ;;  %p1470_p2 = scmp.lt.s32.totalorder %s1468_s16, %s1461_s15 }
  0x55   : > { %p1465_p13 = pneg %p1464_p11  ;;  %p1471_p3 = por %p1470_p2, %p1469_p8 }
  0x57   : > { %p1472_p7 = pnand %p1471_p3, %p1465_p13 }
  0x59   : > { %1475 = shalt.err (!%p1472_p7)
}
  0x5a   : > { %s1684_s26 = smov 128   ;;  %s1685_s28 = smov 8  }
  0x5b   : > { %1299 = dma.hbm_to_vmem [thread:$0]  (!%p1847_p6), %s1841_s30, 512, %s1853_s18, %s1855_s12, %s1684_s26, %s1684_s26, %s1685_s28  }
  0x5c   : > { %s1686_s17 = smov [#allocation8]   ;;  %s1152_s29 = sshll.u32 %s1832_s19, 6 }
  0x5d   : > { %s232_s20 = sshll.u32 %s1686_s17, 4  ;;  %s1476_s0 = scalar_lea.hbm %s2254_s3, 256  ;;  %s233_s20 = int_to_ptr.vmem [resolvable:$true] %s232_s20 }
  0x5e   : > { %p1477_p2 = scmp.ne.s32.totalorder %s2254_s3, %s1476_s0  ;;  %p2295_p8 = scmp.ne.s32.totalorder %s2288_s14, 0 }
  0x5f   : > { %p1483_p1 = scmp.lt.u32.totalorder %s1476_s0, %s2254_s3 }
  0x60   : > { %p2296_p0 = pneg %p2295_p8 }
  0x62   : > { %p1479_p9 = pnand %p1477_p2, %p2296_p0 }
  0x64   : > { %p1480_p10 = pneg %p1479_p9 }
  0x66   : > { %p1485_p4 = pnand %p1483_p1, %p1480_p10 }
  0x68   : > { %1488 = shalt.err (!%p1485_p4)
}
  0x69   : > { %s1489_s30 = scalar_lea.vmem %s233_s20, 256  ;;  %p2297_p11 = pmov %p2296_p0 }
  0x6a   : > { %p1490_p5 = scmp.ne.s32.totalorder %s233_s20, %s1489_s30  ;;  %p1497_p7 = scmp.lt.s32.totalorder %s233_s20, %s233_s20 }
  0x6b   : > { %p1498_p6 = scmp.lt.s32.totalorder %s1489_s30, %s1489_s30 }
  0x6c   : > { %p1492_p13 = pnand %p1490_p5, %p2297_p11 }
  0x6d   : > { %p1499_p12 = por %p1498_p6, %p1497_p7 }
  0x6e   : > { %p1493_p3 = pneg %p1492_p13 }
  0x70   : > { %p1500_p0 = pnand %p1499_p12, %p1493_p3 }
  0x72   : > { %1503 = shalt.err (!%p1500_p0)
}
  0x73   : > { %s2298_s1 = smov 4   ;;  %s2299_s23 = smov 64  }
  0x74   : > { %1295 = dma.hbm_to_vmem [thread:$0]  (!%p2295_p8), %s2254_s3, 256, %s233_s20, [#allocation6], %s2299_s23, %s2299_s23, %s2298_s1  }
  0x75   : > { %s1189_s10 = sshll.u32 %s1678_s24, 10  ;;  %s271_s18 = scalar_lea.vmem [#allocation7], %s1152_s29 }
  0x76   : > { %s278_s17 = sshll.u32 %s271_s18, 4  ;;  %s1916_s30 = scalar_lea.hbm %s2253_s2, %s1189_s10  ;;  %s1918_s17 = int_to_ptr.vmem [resolvable:$true] %s278_s17 }
  0x77   : > { %s1504_s14 = scalar_lea.hbm %s1916_s30, 1024  ;;  %p2300_p12 = scmp.ne.s32.totalorder %s2294_s7, 0 }
  0x78   : > { %p1505_p6 = scmp.ne.s32.totalorder %s1916_s30, %s1504_s14  ;;  %s1509_s29 = scalar_lea.hbm %s2253_s2, 2048 }
  0x79   : > { %p1510_p8 = scmp.lt.u32.totalorder %s1916_s30, %s2253_s2  ;;  %p1511_p10 = scmp.lt.u32.totalorder %s1509_s29, %s1504_s14 }
  0x7a   : > { %p1507_p2 = pnand %p1505_p6, %p2300_p12  ;;  %p1513_p4 = scmp.lt.u32.totalorder %s1504_s14, %s1916_s30 }
  0x7b   : > { %p1512_p1 = por %p1511_p10, %p1510_p8 }
  0x7c   : > { %p1508_p9 = pneg %p1507_p2 }
  0x7d   : > { %p1514_p5 = por %p1513_p4, %p1512_p1 }
  0x7f   : > { %p1515_p11 = pnand %p1514_p5, %p1508_p9 }
  0x81   : > { %1518 = shalt.err (!%p1515_p11)
}
  0x82   : > { %s1519_s27 = scalar_lea.vmem %s1918_s17, 1024  ;;  %s1687_s10 = smov [#allocation7]  }
  0x83   : > { %p1520_p13 = scmp.ne.s32.totalorder %s1918_s17, %s1519_s27  ;;  %s1524_s18 = sshll.u32 %s1687_s10, 4  ;;  %s1525_s18 = int_to_ptr.vmem [resolvable:$false] %s1524_s18 }
  0x84   : > { %s1526_s15 = scalar_lea.vmem %s1525_s18, 2048  ;;  %p1527_p0 = scmp.lt.s32.totalorder %s1918_s17, %s1525_s18 }
  0x85   : > { %p1522_p3 = pnand %p1520_p13, %p2300_p12  ;;  %p1528_p6 = scmp.lt.s32.totalorder %s1526_s15, %s1519_s27 }
  0x87   : > { %p1523_p7 = pneg %p1522_p3  ;;  %p1529_p2 = por %p1528_p6, %p1527_p0 }
  0x89   : > { %p1530_p8 = pnand %p1529_p2, %p1523_p7 }
  0x8b   : > { %1533 = shalt.err (!%p1530_p8)
}
  0x8c   : > { %p2301_p9 = scmp.ne.s32.totalorder %s2293_s13, 0  ;;  %s2302_s16 = sshll.u32 %s1678_s24, 9 }
  0x8d   : > { %s1950_s1 = scalar_lea.hbm %s2255_s4, %s2302_s16  ;;  %s2303_s29 = sshll.u32 %s1832_s19, 5 }
  0x8e   : > { %1302 = dma.hbm_to_vmem [thread:$0]  (!%p2301_p9), %s1916_s30, 1024, %s1918_s17, %s1855_s12, %s1684_s26, %s1684_s26, %s1685_s28  }
  0x8f   : > { %s292_s23 = scalar_lea.vmem [#allocation9], %s2303_s29  ;;  %s289_s27 = scalar_lea.sflag [#allocation10], %s1832_s19 }
  0x90   : > { %s299_s0 = sshll.u32 %s292_s23, 4  ;;  %s1534_s10 = scalar_lea.hbm %s1950_s1, 512  ;;  %s1954_s0 = int_to_ptr.vmem [resolvable:$true] %s299_s0 }
  0x91   : > { %p1535_p10 = scmp.ne.s32.totalorder %s1950_s1, %s1534_s10  ;;  %s1539_s30 = scalar_lea.hbm %s2255_s4, 1024 }
  0x92   : > { %p1540_p5 = scmp.lt.u32.totalorder %s1950_s1, %s2255_s4  ;;  %p1541_p11 = scmp.lt.u32.totalorder %s1539_s30, %s1534_s10 }
  0x93   : > { %p1537_p1 = pnand %p1535_p10, %p2300_p12  ;;  %p1543_p3 = scmp.lt.u32.totalorder %s1534_s10, %s1950_s1 }
  0x94   : > { %p1542_p13 = por %p1541_p11, %p1540_p5 }
  0x95   : > { %p1538_p4 = pneg %p1537_p1 }
  0x96   : > { %p1544_p7 = por %p1543_p3, %p1542_p13 }
  0x98   : > { %p1545_p0 = pnand %p1544_p7, %p1538_p4 }
  0x9a   : > { %1548 = shalt.err (!%p1545_p0)
}
  0x9b   : > { %s1549_s16 = scalar_lea.vmem %s1954_s0, 512  ;;  %s1688_s14 = smov [#allocation9]  }
  0x9c   : > { %p1550_p6 = scmp.ne.s32.totalorder %s1954_s0, %s1549_s16  ;;  %s1554_s20 = sshll.u32 %s1688_s14, 4  ;;  %s1555_s20 = int_to_ptr.vmem [resolvable:$false] %s1554_s20 }
  0x9d   : > { %s1556_s29 = scalar_lea.vmem %s1555_s20, 1024  ;;  %p1557_p10 = scmp.lt.s32.totalorder %s1954_s0, %s1555_s20 }
  0x9e   : > { %p1552_p2 = pnand %p1550_p6, %p2300_p12  ;;  %p1558_p1 = scmp.lt.s32.totalorder %s1556_s29, %s1549_s16 }
  0xa0   : > { %p1553_p8 = pneg %p1552_p2  ;;  %p1559_p5 = por %p1558_p1, %p1557_p10 }
  0xa2   : > { %p1560_p11 = pnand %p1559_p5, %p1553_p8 }
  0xa4   : > { %1563 = shalt.err (!%p1560_p11)
}
  0xa5   : > { %1305 = dma.hbm_to_vmem [thread:$0]  (!%p2301_p9), %s1950_s1, 512, %s1954_s0, %s289_s27, %s1684_s26, %s1684_s26, %s1685_s28  }
  0xa6   : > { %p2304_p12 = scmp.ne.s32.totalorder %s2287_s11, 0 }
  0xa7   : > { %s313_s7 = sand.u32 (!%p2304_p12), 1, %s1752_s25   ;;  %s1987_s23 = sand.u32 (!%p2304_p12), 1, %s1670_s22  }
  0xa8   : > { %311 = sbr.rel (%p2304_p12) target bundleno = 1305 (0x519), region = 40  ;;  %s1990_s10 = sshll.u32 (!%p2304_p12), %s1987_s23, 5 }
  0xa9   : > { %s314_s13 = scalar_lea.sflag (!%p2304_p12), [#allocation3], %s313_s7  ;;  %s317_s12 = scalar_lea.vmem (!%p2304_p12), [#allocation2], %s1990_s10 }
  0xaa   : > { %p2305_p4 = scmp.ne.s32.totalorder (!%p2304_p12), %s2283_s8, 0 }
  0xaf   : > { %1637 = dma.done.wait (%p2305_p4), %s314_s13, 512  }
  0xb0   : > { %1639 = vsyncadd (%p2305_p4), %s314_s13, 4294966784  ;;  %p2306_p9 = scmp.eq.s32.totalorder %s1752_s25, 0 }
  0xb2   : > { %1641 = dma.done.wait (%p2306_p9), [#allocation6], 512   ;;  %p2307_p13 = pmov %p2306_p9 }
  0xb3   : > { %s1161_s11 = sshll.u32 %s1987_s23, 6 }
  0xb4   : > { %1643 = vsyncadd (%p2307_p13), [#allocation6], 4294966784  ;;  %s2002_s19 = scalar_lea.vmem [#allocation7], %s1161_s11 }
  0xb5   : > { %1645 = dma.done.wait (%p2305_p4), %s314_s13, 1024  }
  0xb6   : > { %1647 = vsyncadd (%p2305_p4), %s314_s13, 4294966272  ;;  %p2308_p3 = pmov %p2306_p9 }
  0xb8   : > { %1649 = dma.done.wait (%p2308_p3), [#allocation6], 256   ;;  %p2309_p7 = pmov %p2308_p3 }
  0xb9   : > { %s340_s26 = scalar_lea.sflag [#allocation10], %s1987_s23  ;;  %s2014_s28 = scalar_lea.vmem [#allocation9], %s1990_s10 }
  0xba   : > { %1651 = vsyncadd (%p2309_p7), [#allocation6], 4294967040 }
  0xbb   : > { %1653 = dma.done.wait (%p2305_p4), %s340_s26, 512  }
  0xbc   : > { %1655 = vsyncadd (%p2305_p4), %s340_s26, 4294966784  ;;  %v2020_v0 = vld [vmem:[%s317_s12 + $0x10] sm:$0xff]  ;;  %v2022_v1 = vld [vmem:[%s317_s12 + $0x18] sm:$0xff]  ;;  %s1689_s1 = smov 127   ;;  %s1690_s8 = smov 1   ;;  %vm512_vm0 = vcmask 785408  }
  0xbd   : > { %v2024_v2 = vld [vmem:[%s317_s12] sm:$0xff]  ;;  %v1372_v3 = vpack.i.bf16 %v2022_v1, %v2020_v0  ;;  %v2028_v4 = vld [vmem:[%s317_s12 + $0x8] sm:$0xff]  ;;  %v1691_v9 = vmov 0   ;;  %v450_v10 = vld [vmem:[%s2002_s19 + $0x30] sm:$0xff]  ;;  %vm420_vm1 = vcmask 7168   ;;  %v433_v35 = vpack.c.bf16 %v2022_v1, %v2020_v0  ;;  %s1191_s0 = sshll.u32 %s1752_s25, 9 }
  0xbe   : > { %v1362_v5 = vpack.i.bf16 %v2028_v4, %v2024_v2  ;;  %v1404_v6 = vld [vmem:[#allocation5] sm:$0xff]   ;;  %v449_v7 = vld [vmem:[%s2002_s19 + $0x28] sm:$0xff]  ;;  %1383 = vset.pattern.permute.xlu1 %v1691_v9  ;;  %1382 = vset.pattern.permute.xlu0 %v1691_v9  ;;  %v451_v11 = vld [vmem:[%s2002_s19 + $0x38] sm:$0xff]  ;;  %v432_v34 = vpack.c.bf16 %v2028_v4, %v2024_v2  ;;  %vm425_vm2 = vcmask 121856   ;;  %vm828_vm12 = vcmask 130048   ;;  %s379_s27 = scalar_lea.vmem [#allocation11], %s1990_s10  ;;  %s2160_s15 = scalar_lea.hbm %s2256_s5, %s1191_s0 }
  0xbf   : > { %1373 = vrot.lane.b32.xlu1 %v1372_v3, %s1689_s1  ;;  %1231 = vmatprep.mubr.msk.bf16.mxu0 %vm512_vm0, %v1404_v6  ;;  %v448_v8 = vld [vmem:[%s2002_s19 + $0x20] sm:$0xff]  ;;  %v445_v13 = vld [vmem:[%s2002_s19 + $0x8] sm:$0xff]  ;;  %v446_v14 = vld [vmem:[%s2002_s19 + $0x10] sm:$0xff]  ;;  %s961_s17 = sshll.u32 %s379_s27, 4  ;;  %s386_s30 = scalar_lea.vmem [#allocation12], %s1990_s10  ;;  %s2164_s17 = int_to_ptr.vmem [resolvable:$true] %s961_s17 }
  0xc0   : > { %1363 = vrot.lane.b32.xlu0 %v1362_v5, %s1689_s1  ;;  %v444_v12 = vld [vmem:[%s2002_s19] sm:$0xff]  ;;  %v447_v15 = vld [vmem:[%s2002_s19 + $0x18] sm:$0xff]  ;;  %v1405_v42 = vld [vmem:[#allocation5 + $0x8] sm:$0xff]   ;;  %s977_s16 = sshll.u32 %s386_s30, 4  ;;  %s2173_s29 = scalar_lea.hbm %s2257_s6, %s1191_s0  ;;  %s2175_s16 = int_to_ptr.vmem [resolvable:$true] %s977_s16 }
  0xc1   : > { %v1406_v43 = vld [vmem:[#allocation5 + $0x10] sm:$0xff]   ;;  %v1407_v44 = vld [vmem:[#allocation5 + $0x18] sm:$0xff]   ;;  %s943_s7 = scalar_lea.sflag [#allocation4], %s1987_s23  ;;  %s1564_s10 = scalar_lea.vmem %s2164_s17, 512 }
  0xc2   : > { %p1565_p0 = scmp.ne.s32.totalorder %s2164_s17, %s1564_s10  ;;  %p2310_p6 = scmp.ne.s32.totalorder %s2284_s9, 0 }
  0xc3   : > { %1378 = vrot.lane.b32.xlu1 %v1372_v3, %s1690_s8  ;;  %s1692_s13 = smov [#allocation11]  }
  0xc4   : > { %1368 = vrot.lane.b32.xlu0 %v1362_v5, %s1690_s8  ;;  %p1566_p2 = pnand %p1565_p0, %p2310_p6  ;;  %s1568_s12 = sshll.u32 %s1692_s13, 4  ;;  %s1569_s12 = int_to_ptr.vmem [resolvable:$false] %s1568_s12 }
  0xc5   : > { %s1570_s11 = scalar_lea.vmem %s1569_s12, 1024  ;;  %p1571_p10 = scmp.lt.s32.totalorder %s2164_s17, %s1569_s12 }
  0xc6   : > { %p1567_p8 = pneg %p1566_p2  ;;  %p1572_p1 = scmp.lt.s32.totalorder %s1570_s11, %s1564_s10 }
  0xc7   : > { %479 = vperm.xlu1 %1383, %v449_v7  }
  0xc8   : > { %474 = vperm.xlu0 %1382, %v448_v8   ;;  %p1573_p5 = por %p1572_p1, %p1571_p10 }
  0xca   : > { %p1574_p11 = pnand %p1573_p5, %p1567_p8 }
  0xcb   : > { %484 = vperm.xlu1 %1383, %v450_v10  }
  0xcc   : > { %489 = vperm.xlu0 %1382, %v451_v11  }
  0xcf   : > { %454 = vperm.xlu1 %1383, %v444_v12  }
  0xd0   : > { %459 = vperm.xlu0 %1382, %v445_v13  }
  0xd3   : > { %464 = vperm.xlu1 %1383, %v446_v14  }
  0xd4   : > { %469 = vperm.xlu0 %1382, %v447_v15  }
 0x131   : > { %v1374_v16 = vpop.permute.xlu1 %1373 }
 0x132   : > { %v1364_v17 = vpop.permute.xlu0 %1363  ;;  %v1376_v18 = vunpack.i.h.bf16 %v1374_v16  ;;  %v1375_v19 = vunpack.i.l.bf16 %v1374_v16 }
 0x133   : > { %v1366_v24 = vunpack.i.h.bf16 %v1364_v17  ;;  %v1365_v25 = vunpack.i.l.bf16 %v1364_v17 }
 0x135   : > { %v1379_v20 = vpop.permute.xlu1 %1378 }
 0x136   : > { %v1381_v21 = vunpack.i.h.bf16 %v1379_v20  ;;  %v1380_v22 = vunpack.i.l.bf16 %v1379_v20  ;;  %v1369_v23 = vpop.permute.xlu0 %1368 }
 0x137   : > { %v1371_v26 = vunpack.i.h.bf16 %v1369_v23  ;;  %v1370_v27 = vunpack.i.l.bf16 %v1369_v23 }
 0x138   : > { %v423_v30 = vsel %vm420_vm1, %v1375_v19, %v1380_v22  ;;  %v424_v31 = vsel %vm420_vm1, %v1376_v18, %v1381_v21  ;;  %v428_v39 = vsel %vm425_vm2, %v1375_v19, %v1380_v22  ;;  %v429_v40 = vsel %vm425_vm2, %v1376_v18, %v1381_v21 }
 0x139   : > { %v421_v28 = vsel %vm420_vm1, %v1365_v25, %v1370_v27  ;;  %v422_v29 = vsel %vm420_vm1, %v1366_v24, %v1371_v26  ;;  %v431_v33 = vpack.c.bf16 %v424_v31, %v423_v30  ;;  %v426_v36 = vsel %vm425_vm2, %v1365_v25, %v1370_v27 }
 0x13a   : > { %v430_v32 = vpack.c.bf16 %v422_v29, %v421_v28  ;;  %v427_v37 = vsel %vm425_vm2, %v1366_v24, %v1371_v26  ;;  %v435_v41 = vpack.c.bf16 %v429_v40, %v428_v39 }
 0x13b   : > { %v434_v38 = vpack.c.bf16 %v427_v37, %v426_v36  ;;  %v669_v36 = vld [vmem:[%s2014_s28 + $0x18] sm:$0xff]  ;;  %v668_v37 = vld [vmem:[%s2014_s28 + $0x10] sm:$0xff] }
 0x13c   : > { %1219 = vmatprep.subr.bf16.mxu0 %v430_v32 }
 0x13d   : > { %1220 = vmatpush3.bf16.msra.mxu0 %v430_v32 }
 0x13e   : > { %1221 = vmatprep.subr.bf16.mxu0 %v431_v33 }
 0x141   : > { %1222 = vmatpush3.bf16.msra.mxu0 %v431_v33  ;;  %v1408_v33 = vld [vmem:[#allocation8] sm:$0xff]  }
 0x142   : > { %1223 = vmatprep.subr.bf16.mxu0 %v432_v34  ;;  %1251 = vmatprep.mubr.msk.bf16.mxu1 %vm512_vm0, %v1408_v33 }
 0x145   : > { %1224 = vmatpush3.bf16.msra.mxu0 %v432_v34  ;;  %v667_v34 = vld [vmem:[%s2014_s28 + $0x8] sm:$0xff] }
 0x146   : > { %1225 = vmatprep.subr.bf16.mxu0 %v433_v35  ;;  %v480_v45 = vpop.permute.xlu1 %479 }
 0x147   : > { %v475_v46 = vpop.permute.xlu0 %474 }
 0x149   : > { %1226 = vmatpush3.bf16.msra.mxu0 %v433_v35  ;;  %v666_v35 = vld [vmem:[%s2014_s28] sm:$0xff] }
 0x14a   : > { %1227 = vmatprep.subr.bf16.mxu0 %v434_v38  ;;  %v485_v47 = vpop.permute.xlu1 %484 }
 0x14b   : > { %v490_v48 = vpop.permute.xlu0 %489 }
 0x14d   : > { %1228 = vmatpush3.bf16.msra.mxu0 %v434_v38 }
 0x14e   : > { %1229 = vmatprep.subr.bf16.mxu0 %v435_v41  ;;  %v455_v49 = vpop.permute.xlu1 %454 }
 0x14f   : > { %v460_v50 = vpop.permute.xlu0 %459 }
 0x151   : > { %1230 = vmatpush3.bf16.msra.mxu0 %v435_v41 }
 0x152   : > { %v465_v51 = vpop.permute.xlu1 %464 }
 0x153   : > { %v470_v53 = vpop.permute.xlu0 %469 }
 0x154   : > { %1232 = vmatmul.mubr.msk.bf16.vlgmr.msra.gmra.mrb[0].mxu0 %vm512_vm0, %v1405_v42 }
 0x155   : > { %1235 = vmatprep.mubr.msk.bf16.mxu0 %vm512_vm0, %v1406_v43 }
 0x15c   : > { %1236 = vmatmul.mubr.msk.bf16.gmra.mrb[4].mxu0 %vm512_vm0, %v1407_v44 }
 0x15d   : > { %1267 = vmatprep.mubr.msk.bf16.mxu0 %vm512_vm0, %v1408_v33 }
 0x227   : > { %v1233_v52 = vpop.f32.mrb[0].mxu0 }
 0x228   : > { %v559_v54 = vpop.f32.mrb[1].mxu0  ;;  %v568_v55 = vadd.f32 %v1233_v52, %v465_v51 }
 0x229   : > { %v560_v56 = vadd.f32 %v559_v54, %v455_v49  ;;  %v1234_v57 = vpop.f32.mrb[2].mxu0 }
 0x22a   : > { %v571_v58 = vadd.f32 %v1234_v57, %v470_v53  ;;  %v562_v59 = vpop.f32.mrb[3].mxu0  ;;  %v600_v63 = vmul.f32 0.2, %v568_v55  ;;  %vm592_vm6 = vcmp.ge.f32.partialorder %v568_v55, 0.0 }
 0x22b   : > { %v598_v60 = vmul.f32 0.2, %v560_v56  ;;  %v563_v61 = vadd.f32 %v562_v59, %v460_v50  ;;  %vm590_vm3 = vcmp.ge.f32.partialorder %v560_v56, 0.0 }
 0x22c   : > { %vm593_vm4 = vcmp.ge.f32.partialorder %v571_v58, 0.0  ;;  %v601_v62 = vmul.f32 0.2, %v571_v58  ;;  %v2070_v12 = vsel %vm592_vm6, %v568_v55, %v600_v63 }
 0x22d   : > { %vm591_vm5 = vcmp.ge.f32.partialorder %v563_v61, 0.0  ;;  %v599_v3 = vmul.f32 0.2, %v563_v61  ;;  %v2060_v5 = vsel %vm590_vm3, %v560_v56, %v598_v60 }
 0x22e   : > { %v2062_v6 = vsel %vm593_vm4, %v571_v58, %v601_v62  ;;  %v1409_v62 = vld [vmem:[#allocation8 + $0x8] sm:$0xff]  }
 0x22f   : > { %v2064_v7 = vsel %vm591_vm5, %v563_v61, %v599_v3  ;;  %v1237_v8 = vpop.f32.mrb[4].mxu0  ;;  %v2074_v15 = vpack.c.bf16 %v2062_v6, %v2070_v12  ;;  %v1399_v31 = vpack.i.bf16 %v2062_v6, %v2070_v12 }
 0x230   : > { %v2068_v9 = vpack.c.bf16 %v2064_v7, %v2060_v5  ;;  %v584_v10 = vadd.f32 %v1237_v8, %v485_v47  ;;  %v575_v11 = vpop.f32.mrb[5].mxu0  ;;  %v1394_v32 = vpack.i.bf16 %v2064_v7, %v2060_v5 }
 0x231   : > { %v576_v13 = vadd.f32 %v575_v11, %v475_v46  ;;  %v1238_v14 = vpop.f32.mrb[6].mxu0 }
 0x232   : > { %v604_v16 = vmul.f32 0.2, %v584_v10  ;;  %v587_v17 = vadd.f32 %v1238_v14, %v490_v48  ;;  %v578_v18 = vpop.f32.mrb[7].mxu0  ;;  %1255 = vmatprep.subr.bf16.mxu0 %v2068_v9  ;;  %vm596_vm7 = vcmp.ge.f32.partialorder %v584_v10, 0.0 }
 0x233   : > { %v602_v19 = vmul.f32 0.2, %v576_v13  ;;  %v579_v20 = vadd.f32 %v578_v18, %v480_v45  ;;  %1256 = vmatpush3.bf16.msra.mxu0 %v2068_v9  ;;  %vm594_vm8 = vcmp.ge.f32.partialorder %v576_v13, 0.0 }
 0x234   : > { %vm597_vm9 = vcmp.ge.f32.partialorder %v587_v17, 0.0  ;;  %v605_v21 = vmul.f32 0.2, %v587_v17  ;;  %1257 = vmatprep.subr.bf16.mxu0 %v2074_v15  ;;  %v612_v23 = vsel %vm596_vm7, %v584_v10, %v604_v16 }
 0x235   : > { %vm595_vm10 = vcmp.ge.f32.partialorder %v579_v20, 0.0  ;;  %v603_v22 = vmul.f32 0.2, %v579_v20  ;;  %v610_v25 = vsel %vm594_vm8, %v576_v13, %v602_v19 }
 0x236   : > { %v613_v24 = vsel %vm597_vm9, %v587_v17, %v605_v21 }
 0x237   : > { %v611_v26 = vsel %vm595_vm10, %v579_v20, %v603_v22  ;;  %1258 = vmatpush3.bf16.msra.mxu0 %v2074_v15  ;;  %v1389_v27 = vpack.i.bf16 %v613_v24, %v612_v23  ;;  %v659_v30 = vpack.c.bf16 %v613_v24, %v612_v23 }
 0x238   : > { %v658_v28 = vpack.c.bf16 %v611_v26, %v610_v25  ;;  %v1384_v29 = vpack.i.bf16 %v611_v26, %v610_v25 }
 0x239   : > { %1390 = vrot.lane.b32.xlu0 %v1389_v27, %s1690_s8 }
 0x23a   : > { %1385 = vrot.lane.b32.xlu1 %v1384_v29, %s1690_s8  ;;  %1259 = vmatprep.subr.bf16.mxu0 %v658_v28 }
 0x23b   : > { %1260 = vmatpush3.bf16.msra.mxu0 %v658_v28 }
 0x23c   : > { %1261 = vmatprep.subr.bf16.mxu0 %v659_v30 }
 0x23d   : > { %1400 = vrot.lane.b32.xlu0 %v1399_v31, %s1689_s1 }
 0x23e   : > { %1395 = vrot.lane.b32.xlu1 %v1394_v32, %s1689_s1 }
 0x23f   : > { %1262 = vmatpush3.bf16.msra.mxu0 %v659_v30 }
 0x241   : > { %677 = vperm.xlu0 %1382, %v667_v34  }
 0x242   : > { %672 = vperm.xlu1 %1383, %v666_v35  }
 0x245   : > { %687 = vperm.xlu0 %1382, %v669_v36  }
 0x246   : > { %682 = vperm.xlu1 %1383, %v668_v37  }
 0x2ab   : > { %v1391_v38 = vpop.permute.xlu0 %1390 }
 0x2ac   : > { %v1393_v39 = vunpack.i.h.bf16 %v1391_v38  ;;  %v1392_v40 = vunpack.i.l.bf16 %v1391_v38  ;;  %v1386_v41 = vpop.permute.xlu1 %1385 }
 0x2ad   : > { %v1388_v42 = vunpack.i.h.bf16 %v1386_v41  ;;  %v1387_v43 = vunpack.i.l.bf16 %v1386_v41 }
 0x2ae   : > { %v632_v47 = vsel %vm420_vm1, %v612_v23, %v1392_v40  ;;  %v633_v48 = vsel %vm420_vm1, %v613_v24, %v1393_v39 }
 0x2af   : > { %v1401_v44 = vpop.permute.xlu0 %1400  ;;  %v630_v45 = vsel %vm420_vm1, %v610_v25, %v1387_v43  ;;  %v631_v46 = vsel %vm420_vm1, %v611_v26, %v1388_v42  ;;  %v655_v55 = vpack.c.bf16 %v633_v48, %v632_v47 }
 0x2b0   : > { %v1403_v49 = vunpack.i.h.bf16 %v1401_v44  ;;  %v1402_v50 = vunpack.i.l.bf16 %v1401_v44  ;;  %v1396_v51 = vpop.permute.xlu1 %1395  ;;  %v654_v52 = vpack.c.bf16 %v631_v46, %v630_v45 }
 0x2b1   : > { %v1398_v53 = vunpack.i.h.bf16 %v1396_v51  ;;  %v1397_v54 = vunpack.i.l.bf16 %v1396_v51 }
 0x2b2   : > { %1239 = vmatprep.subr.bf16.mxu1 %v654_v52  ;;  %v652_v58 = vsel %vm425_vm2, %v1402_v50, %v2070_v12  ;;  %v653_v59 = vsel %vm425_vm2, %v1403_v49, %v2062_v6 }
 0x2b3   : > { %1240 = vmatpush3.bf16.msra.mxu1 %v654_v52  ;;  %v650_v56 = vsel %vm425_vm2, %v1397_v54, %v2060_v5  ;;  %v651_v57 = vsel %vm425_vm2, %v1398_v53, %v2064_v7  ;;  %v661_v61 = vpack.c.bf16 %v653_v59, %v652_v58 }
 0x2b4   : > { %1241 = vmatprep.subr.bf16.mxu1 %v655_v55  ;;  %v660_v60 = vpack.c.bf16 %v651_v57, %v650_v56 }
 0x2b6   : > { %1263 = vmatprep.subr.bf16.mxu0 %v660_v60 }
 0x2b7   : > { %1242 = vmatpush3.bf16.msra.mxu1 %v655_v55  ;;  %1264 = vmatpush3.bf16.msra.mxu0 %v660_v60 }
 0x2b8   : > { %1243 = vmatprep.subr.bf16.mxu1 %v2068_v9  ;;  %1265 = vmatprep.subr.bf16.mxu0 %v661_v61 }
 0x2bb   : > { %1244 = vmatpush3.bf16.msra.mxu1 %v2068_v9  ;;  %1266 = vmatpush3.bf16.msra.mxu0 %v661_v61 }
 0x2bc   : > { %1245 = vmatprep.subr.bf16.mxu1 %v2074_v15 }
 0x2be   : > { %1268 = vmatmul.mubr.msk.bf16.vlgmr.msra.gmra.mrb[8].mxu0 %vm512_vm0, %v1409_v62 }
 0x2bf   : > { %1246 = vmatpush3.bf16.msra.mxu1 %v2074_v15 }
 0x2c0   : > { %1247 = vmatprep.subr.bf16.mxu1 %v658_v28  ;;  %v678_v8 = vpop.permute.xlu0 %677 }
 0x2c1   : > { %v673_v3 = vpop.permute.xlu1 %672 }
 0x2c3   : > { %1248 = vmatpush3.bf16.msra.mxu1 %v658_v28 }
 0x2c4   : > { %1249 = vmatprep.subr.bf16.mxu1 %v659_v30  ;;  %v688_v21 = vpop.permute.xlu0 %687 }
 0x2c5   : > { %v683_v17 = vpop.permute.xlu1 %682 }
 0x2c7   : > { %1250 = vmatpush3.bf16.msra.mxu1 %v659_v30 }
 0x2ca   : > { %1252 = vmatmul.mubr.msk.bf16.vlgmr.msra.gmra.mrb[0].mxu1 %vm512_vm0, %v1409_v62 }
 0x391   : > { %v1269_v63 = vpop.f32.mrb[8].mxu0 }
 0x392   : > { %v801_v5 = vpop.f32.mrb[9].mxu0  ;;  %v810_v24 = vadd.f32 %v1269_v63, %v683_v17 }
 0x393   : > { %v802_v6 = vadd.f32 %v801_v5, %v673_v3  ;;  %v1270_v7 = vpop.f32.mrb[10].mxu0 }
 0x394   : > { %v804_v9 = vpop.f32.mrb[11].mxu0  ;;  %v813_v28 = vadd.f32 %v1270_v7, %v688_v21  ;;  %v822_v36 = vmul.f32 0.2, %v810_v24  ;;  %vm818_vm2 = vcmp.ge.f32.partialorder %v810_v24, 0.0 }
 0x395   : > { %v820_v10 = vmul.f32 0.2, %v802_v6  ;;  %v805_v11 = vadd.f32 %v804_v9, %v678_v8  ;;  %vm816_vm11 = vcmp.ge.f32.partialorder %v802_v6, 0.0 }
 0x396   : > { %v823_v38 = vmul.f32 0.2, %v813_v28  ;;  %vm819_vm3 = vcmp.ge.f32.partialorder %v813_v28, 0.0  ;;  %v826_v43 = vsel %vm818_vm2, %v810_v24, %v822_v36 }
 0x397   : > { %v821_v12 = vmul.f32 0.2, %v805_v11  ;;  %v2112_v13 = vsel %vm816_vm11, %v802_v6, %v820_v10  ;;  %vm817_vm13 = vcmp.ge.f32.partialorder %v805_v11, 0.0  ;;  %v847_v45 = vsel %vm828_vm12, %v826_v43, 0.0 }
 0x398   : > { %v841_v14 = vsel %vm828_vm12, %v2112_v13, 0.0  ;;  %v827_v44 = vsel %vm819_vm3, %v813_v28, %v823_v38 }
 0x399   : > { %842 = vadd.xlane.f32.xlu0 %v841_v14  ;;  %v2116_v15 = vsel %vm817_vm13, %v805_v11, %v821_v12  ;;  %v850_v46 = vsel %vm828_vm12, %v827_v44, 0.0 }
 0x39a   : > { %v844_v16 = vsel %vm828_vm12, %v2116_v15, 0.0 }
 0x39b   : > { %845 = vadd.xlane.f32.xlu1 %v844_v16 }
 0x39d   : > { %v1253_v18 = vpop.f32.mrb[0].mxu1 }
 0x39e   : > { %v749_v19 = vadd.f32 %v1253_v18, %v683_v17  ;;  %v740_v20 = vpop.f32.mrb[1].mxu1 }
 0x39f   : > { %v741_v22 = vadd.f32 %v740_v20, %v673_v3  ;;  %v1254_v23 = vpop.f32.mrb[2].mxu1 }
 0x3a0   : > { %v761_v25 = vmul.f32 0.2, %v749_v19  ;;  %v752_v26 = vadd.f32 %v1254_v23, %v688_v21  ;;  %v743_v27 = vpop.f32.mrb[3].mxu1  ;;  %vm757_vm14 = vcmp.ge.f32.partialorder %v749_v19, 0.0 }
 0x3a1   : > { %v759_v29 = vmul.f32 0.2, %v741_v22  ;;  %v744_v30 = vadd.f32 %v743_v27, %v678_v8  ;;  %vm755_vm15 = vcmp.ge.f32.partialorder %v741_v22, 0.0 }
 0x3a2   : > { %v762_v31 = vmul.f32 0.2, %v752_v26  ;;  %v765_v32 = vsel %vm757_vm14, %v749_v19, %v761_v25  ;;  %vm758_vm0 = vcmp.ge.f32.partialorder %v752_v26, 0.0 }
 0x3a3   : > { %v760_v33 = vmul.f32 0.2, %v744_v30  ;;  %v835_v34 = vsel %vm828_vm12, %v765_v32, 0.0  ;;  %v763_v35 = vsel %vm755_vm15, %v741_v22, %v759_v29  ;;  %vm756_vm1 = vcmp.ge.f32.partialorder %v744_v30, 0.0 }
 0x3a4   : > { %836 = vadd.xlane.f32.xlu0 %v835_v34  ;;  %v829_v37 = vsel %vm828_vm12, %v763_v35, 0.0  ;;  %v766_v40 = vsel %vm758_vm0, %v752_v26, %v762_v31 }
 0x3a5   : > { %830 = vadd.xlane.f32.xlu1 %v829_v37  ;;  %v764_v39 = vsel %vm756_vm1, %v744_v30, %v760_v33  ;;  %v838_v42 = vsel %vm828_vm12, %v766_v40, 0.0 }
 0x3a6   : > { %v832_v41 = vsel %vm828_vm12, %v764_v39, 0.0 }
 0x3a8   : > { %833 = vadd.xlane.f32.xlu0 %v832_v41 }
 0x3a9   : > { %839 = vadd.xlane.f32.xlu1 %v838_v42 }
 0x3ac   : > { %848 = vadd.xlane.f32.xlu0 %v847_v45 }
 0x3ad   : > { %851 = vadd.xlane.f32.xlu1 %v850_v46 }
 0x426   : > { %v843_v47 = vpop.xlane.xlu0 %842 }
 0x428   : > { %v846_v48 = vpop.xlane.xlu1 %845 }
 0x431   : > { %v837_v49 = vpop.xlane.xlu0 %836 }
 0x432   : > { %v831_v50 = vpop.xlane.xlu1 %830 }
 0x433   : > { %v853_v52 = vadd.f32 %v843_v47, %v831_v50 }
 0x435   : > { %v834_v51 = vpop.xlane.xlu0 %833  ;;  %v858_v56 = vmul.f32 0.03125, %v853_v52 }
 0x436   : > { %v840_v53 = vpop.xlane.xlu1 %839  ;;  %v854_v54 = vadd.f32 %v846_v48, %v834_v51 }
 0x437   : > { %v862_v63 = vsub.f32 %v763_v35, %v858_v56  ;;  %v866_v9 = vsub.f32 %v2112_v13, %v858_v56 }
 0x438   : > { %v859_v59 = vmul.f32 0.03125, %v854_v54 }
 0x439   : > { %v849_v55 = vpop.xlane.xlu0 %848  ;;  %v870_v11 = vmul.f32 %v862_v63, %v862_v63  ;;  %v886_v19 = vmul.f32 %v866_v9, %v866_v9 }
 0x43a   : > { %v855_v57 = vadd.f32 %v849_v55, %v837_v49  ;;  %v852_v58 = vpop.xlane.xlu1 %851  ;;  %v863_v5 = vsub.f32 %v764_v39, %v859_v59  ;;  %v867_v12 = vsub.f32 %v2116_v15, %v859_v59 }
 0x43b   : > { %v856_v60 = vadd.f32 %v852_v58, %v840_v53  ;;  %v874_v18 = vsel %vm828_vm12, %v870_v11, 0.0  ;;  %v890_v13 = vsel %vm828_vm12, %v886_v19, 0.0 }
 0x43c   : > { %v860_v61 = vmul.f32 0.03125, %v855_v57  ;;  %v871_v16 = vmul.f32 %v863_v5, %v863_v5  ;;  %v887_v22 = vmul.f32 %v867_v12, %v867_v12 }
 0x43d   : > { %v861_v62 = vmul.f32 0.03125, %v856_v60 }
 0x43e   : > { %v2126_v3 = vsub.f32 %v765_v32, %v860_v61  ;;  %v868_v17 = vsub.f32 %v826_v43, %v860_v61  ;;  %v877_v21 = vsel %vm828_vm12, %v871_v16, 0.0  ;;  %v893_v15 = vsel %vm828_vm12, %v887_v22, 0.0 }
 0x43f   : > { %v2128_v6 = vsub.f32 %v766_v40, %v861_v62  ;;  %v869_v20 = vsub.f32 %v827_v44, %v861_v62 }
 0x440   : > { %v872_v7 = vmul.f32 %v2126_v3, %v2126_v3  ;;  %v888_v23 = vmul.f32 %v868_v17, %v868_v17 }
 0x441   : > { %v873_v8 = vmul.f32 %v2128_v6, %v2128_v6  ;;  %v889_v24 = vmul.f32 %v869_v20, %v869_v20 }
 0x442   : > { %v880_v10 = vsel %vm828_vm12, %v872_v7, 0.0  ;;  %v896_v25 = vsel %vm828_vm12, %v888_v23, 0.0 }
 0x443   : > { %881 = vadd.xlane.f32.xlu0 %v880_v10  ;;  %v883_v14 = vsel %vm828_vm12, %v873_v8, 0.0  ;;  %v899_v26 = vsel %vm828_vm12, %v889_v24, 0.0 }
 0x444   : > { %884 = vadd.xlane.f32.xlu1 %v883_v14 }
 0x447   : > { %875 = vadd.xlane.f32.xlu0 %v874_v18 }
 0x448   : > { %878 = vadd.xlane.f32.xlu1 %v877_v21 }
 0x44b   : > { %891 = vadd.xlane.f32.xlu0 %v890_v13 }
 0x44c   : > { %894 = vadd.xlane.f32.xlu1 %v893_v15 }
 0x44f   : > { %897 = vadd.xlane.f32.xlu0 %v896_v25 }
 0x450   : > { %900 = vadd.xlane.f32.xlu1 %v899_v26 }
 0x4d0   : > { %v882_v27 = vpop.xlane.xlu0 %881 }
 0x4d1   : > { %v885_v28 = vpop.xlane.xlu1 %884 }
 0x4d4   : > { %v876_v29 = vpop.xlane.xlu0 %875 }
 0x4d5   : > { %v879_v30 = vpop.xlane.xlu1 %878 }
 0x4d8   : > { %v892_v31 = vpop.xlane.xlu0 %891 }
 0x4d9   : > { %v902_v32 = vadd.f32 %v892_v31, %v876_v29  ;;  %v895_v33 = vpop.xlane.xlu1 %894 }
 0x4da   : > { %v903_v34 = vadd.f32 %v895_v33, %v879_v30 }
 0x4db   : > { %v906_v35 = vmul.f32 0.03125, %v902_v32 }
 0x4dc   : > { %v907_v36 = vmul.f32 0.03125, %v903_v34  ;;  %v898_v37 = vpop.xlane.xlu0 %897 }
 0x4dd   : > { %v910_v38 = vadd.f32 1e-05, %v906_v35  ;;  %v904_v39 = vadd.f32 %v898_v37, %v882_v27  ;;  %v901_v40 = vpop.xlane.xlu1 %900 }
 0x4de   : > { %v911_v41 = vadd.f32 1e-05, %v907_v36  ;;  %v905_v42 = vadd.f32 %v901_v40, %v885_v28 }
 0x4df   : > { %1410 = vrsqrt.f32 %v910_v38  ;;  %v908_v43 = vmul.f32 0.03125, %v904_v39 }
 0x4e0   : > { %1412 = vrsqrt.f32 %v911_v41  ;;  %v909_v44 = vmul.f32 0.03125, %v905_v42 }
 0x4e1   : > { %v912_v45 = vadd.f32 1e-05, %v908_v43 }
 0x4e2   : > { %v913_v46 = vadd.f32 1e-05, %v909_v44 }
 0x4e3   : > { %1414 = vrsqrt.f32 %v912_v45 }
 0x4e4   : > { %1416 = vrsqrt.f32 %v913_v46 }
 0x4e9   : > { %v1411_v47 = vpop.eup %1410 }
 0x4ea   : > { %v1413_v48 = vpop.eup %1412  ;;  %v918_v49 = vmul.f32 %v1411_v47, %v862_v63  ;;  %v930_v50 = vmul.f32 %v1411_v47, %v866_v9 }
 0x4eb   : > { %v919_v51 = vmul.f32 %v1413_v48, %v863_v5  ;;  %v931_v52 = vmul.f32 %v1413_v48, %v867_v12 }
 0x4ec   : > { %v922_v53 = vadd.f32 %v918_v49, %v2024_v2  ;;  %v934_v54 = vadd.f32 %v930_v50, %v2024_v2 }
 0x4ed   : > { %v1415_v55 = vpop.eup %1414  ;;  %v923_v56 = vadd.f32 %v919_v51, %v2028_v4  ;;  %v935_v57 = vadd.f32 %v931_v52, %v2028_v4 }
 0x4ee   : > { %v1417_v58 = vpop.eup %1416  ;;  %926 = vst.msk [vmem:[%s379_s27] sm:$0xff] %vm828_vm12, %v922_v53  ;;  %938 = vst.msk [vmem:[%s386_s30] sm:$0xff] %vm828_vm12, %v934_v54  ;;  %v920_v59 = vmul.f32 %v1415_v55, %v2126_v3  ;;  %v932_v60 = vmul.f32 %v1415_v55, %v868_v17 }
 0x4ef   : > { %927 = vst.msk [vmem:[%s379_s27 + $0x8] sm:$0xff] %vm828_vm12, %v923_v56  ;;  %939 = vst.msk [vmem:[%s386_s30 + $0x8] sm:$0xff] %vm828_vm12, %v935_v57  ;;  %v921_v2 = vmul.f32 %v1417_v58, %v2128_v6  ;;  %v933_v61 = vmul.f32 %v1417_v58, %v869_v20 }
 0x4f0   : > { %v924_v4 = vadd.f32 %v920_v59, %v2020_v0  ;;  %v936_v62 = vadd.f32 %v932_v60, %v2020_v0 }
 0x4f1   : > { %v925_v63 = vadd.f32 %v921_v2, %v2022_v1  ;;  %v937_v3 = vadd.f32 %v933_v61, %v2022_v1 }
 0x4f2   : > { %928 = vst.msk [vmem:[%s379_s27 + $0x10] sm:$0xff] %vm828_vm12, %v924_v4  ;;  %940 = vst.msk [vmem:[%s386_s30 + $0x10] sm:$0xff] %vm828_vm12, %v936_v62 }
 0x4f3   : > { %929 = vst.msk [vmem:[%s379_s27 + $0x18] sm:$0xff] %vm828_vm12, %v925_v63  ;;  %941 = vst.msk [vmem:[%s386_s30 + $0x18] sm:$0xff] %vm828_vm12, %v937_v3 }
 0x4f4   : > { %1577 = shalt.err (!%p1574_p11)
}
 0x4f5   : > { %s1578_s19 = scalar_lea.hbm %s2160_s15, 512  ;;  %s1582_s1 = scalar_lea.hbm %s2256_s5, 1024 }
 0x4f6   : > { %p1579_p12 = scmp.ne.s32.totalorder %s2160_s15, %s1578_s19  ;;  %p1583_p13 = scmp.lt.u32.totalorder %s2160_s15, %s2256_s5 }
 0x4f7   : > { %p1584_p3 = scmp.lt.u32.totalorder %s1582_s1, %s1578_s19  ;;  %p1586_p0 = scmp.lt.u32.totalorder %s1578_s19, %s2160_s15 }
 0x4f8   : > { %p1580_p4 = pnand %p1579_p12, %p2310_p6 }
 0x4f9   : > { %p1585_p7 = por %p1584_p3, %p1583_p13 }
 0x4fa   : > { %p1581_p9 = pneg %p1580_p4 }
 0x4fb   : > { %p1587_p2 = por %p1586_p0, %p1585_p7 }
 0x4fd   : > { %p1588_p8 = pnand %p1587_p2, %p1581_p9 }
 0x4ff   : > { %1591 = shalt.err (!%p1588_p8)
}
 0x500   : > { %s1693_s27 = smov 128   ;;  %s1694_s30 = smov 8  }
 0x501   : > { %1285 = dma.vmem_to_hbm [thread:$0]  (%p2310_p6), %s2164_s17, 512, %s2160_s15, %s943_s7, %s1693_s27, %s1693_s27, %s1694_s30  }
 0x502   : > { %s948_s25 = scalar_lea.sflag [#allocation13], %s1987_s23  ;;  %s1592_s18 = scalar_lea.vmem %s2175_s16, 512 }
 0x503   : > { %p1593_p10 = scmp.ne.s32.totalorder %s2175_s16, %s1592_s18  ;;  %s1695_s14 = smov [#allocation12]  }
 0x504   : > { %s1596_s20 = sshll.u32 %s1695_s14, 4  ;;  %s1597_s20 = int_to_ptr.vmem [resolvable:$false] %s1596_s20 }
 0x505   : > { %p1594_p1 = pnand %p1593_p10, %p2310_p6  ;;  %s1598_s10 = scalar_lea.vmem %s1597_s20, 1024 }
 0x506   : > { %p1599_p11 = scmp.lt.s32.totalorder %s2175_s16, %s1597_s20  ;;  %p1600_p12 = scmp.lt.s32.totalorder %s1598_s10, %s1592_s18 }
 0x507   : > { %p1595_p5 = pneg %p1594_p1 }
 0x508   : > { %p1601_p4 = por %p1600_p12, %p1599_p11 }
 0x50a   : > { %p1602_p9 = pnand %p1601_p4, %p1595_p5 }
 0x50c   : > { %1605 = shalt.err (!%p1602_p9)
}
 0x50d   : > { %s1606_s17 = scalar_lea.hbm %s2173_s29, 512  ;;  %s1610_s13 = scalar_lea.hbm %s2257_s6, 1024 }
 0x50e   : > { %p1607_p13 = scmp.ne.s32.totalorder %s2173_s29, %s1606_s17  ;;  %p1611_p0 = scmp.lt.u32.totalorder %s2173_s29, %s2257_s6 }
 0x50f   : > { %p1612_p2 = scmp.lt.u32.totalorder %s1610_s13, %s1606_s17  ;;  %p1614_p10 = scmp.lt.u32.totalorder %s1606_s17, %s2173_s29 }
 0x510   : > { %p1608_p3 = pnand %p1607_p13, %p2310_p6 }
 0x511   : > { %p1613_p8 = por %p1612_p2, %p1611_p0 }
 0x512   : > { %p1609_p7 = pneg %p1608_p3 }
 0x513   : > { %p1615_p1 = por %p1614_p10, %p1613_p8 }
 0x515   : > { %p1616_p5 = pnand %p1615_p1, %p1609_p7 }
 0x517   : > { %1619 = shalt.err (!%p1616_p5)
}
 0x518   : > { %1286 = dma.vmem_to_hbm [thread:$0]  (%p2310_p6), %s2175_s16, 512, %s2173_s29, %s948_s25, %s1693_s27, %s1693_s27, %s1694_s30  }
 0x519 PF: > { %s2311_s19 = sld [smem:[#allocation24_spill]]  ;;  %s992_s26 = sand.u32 1, %s1666_s21  }
 0x51a   : > { %p2313_p12 = scmp.ge.s32.totalorder %s1678_s24, 2  ;;  %s993_s28 = scalar_lea.sflag [#allocation4], %s992_s26 }
 0x51f   : > { %p2312_p11 = scmp.ne.s32.totalorder %s2311_s19, 0 }
 0x521   : > { %p1307_p4 = pnand %p2313_p12, %p2312_p11 }
 0x523   : > { %1657 = dma.done.wait (!%p1307_p4), %s993_s28, 512  }
 0x524   : > { %1659 = vsyncadd (!%p1307_p4), %s993_s28, 4294966784  ;;  %s1002_s9 = scalar_lea.sflag [#allocation13], %s992_s26 }
 0x525   : > { %1661 = dma.done.wait (!%p1307_p4), %s1002_s9, 512  }
 0x526   : > { %1663 = vsyncadd (!%p1307_p4), %s1002_s9, 4294966784  ;;  %s2314_s24 = sld [smem:[#allocation22_spill]]  ;;  %s2315_s23 = sld [smem:[#allocation21_spill]] }
 0x527   : > { %s2316_s1 = sld [smem:[#allocation23_spill]]  ;;  %s2317_s21 = smov %s1670_s22 }
 0x52c   : > { %p27_p6 = scmp.ge.s32.totalorder %s2314_s24, 4   ;;  %s2318_s22 = smov %s2315_s23 }
 0x52d   : > { %s2319_s23 = smov %s2316_s1 }
 0x52e   :  { %29 = sbr.rel (!%p27_p6) target bundleno = 13 (0xd), region = 134 }
 0x535   :  { %1007 = vsyncpa [#allocation3], 1 }
 0x536   :  { %1009 = vsyncpa [#allocation3 + $0x1], 1 }
 0x537   :  { %1010 = vsyncpa [#allocation6], 1 }
 0x538   :  { %1011 = vsyncpa [#allocation10], 1 }
 0x539   :  { %1013 = vsyncpa [#allocation10 + $0x1], 1 }
 0x53a   :  { %1014 = vsyncpa [#allocation4], 1 }
 0x53b   :  { %1016 = vsyncpa [#allocation4 + $0x1], 1 }
 0x53c   :  { %1017 = vsyncpa [#allocation13], 1 }
 0x53d   :  { %1019 = vsyncpa [#allocation13 + $0x1], 1 }

// kernel: decoder_forward.7
= control target key start
LH: loop header
LB: loop body
LE: loop exit
PB: predicated region body
PF: predicated region fallthrough
CT: control target
= control target key end

     0   :  { %s2251_s0 = inlined_call_operand.hbm [shape: f32[2,32,8], index: 0, kind: input, shape index: {}]   ;;  %s2252_s1 = inlined_call_operand.hbm [shape: bf16[64,96], index: 1, kind: input, shape index: {}]   ;;  %s2253_s2 = inlined_call_operand.hbm [shape: f32[2,64,1], index: 2, kind: input, shape index: {}]   ;;  %s2254_s3 = inlined_call_operand.hbm [shape: bf16[32,96], index: 3, kind: input, shape index: {}]   ;;  %s2255_s4 = inlined_call_operand.hbm [shape: f32[2,32,1], index: 4, kind: input, shape index: {}]   ;;  %s2256_s5 = inlined_call_operand.hbm [shape: f32[2,32,8], index: 5, kind: output, shape index: {0}]   ;;  %s2257_s6 = inlined_call_operand.hbm [shape: f32[2,32,8], index: 6, kind: output, shape index: {1}]  }
   0x1   :  { %2277 = sst [smem:[#allocation25_spill]] %s2251_s0 }
   0x2   :  { %2278 = sst [smem:[#allocation26_spill]] %s2252_s1 }
   0x3   :  { %12 = vsyncpa [#allocation3], 0 }
   0x4   :  { %14 = vsyncpa [#allocation3 + $0x1], 0 }
   0x5   :  { %15 = vsyncpa [#allocation6], 0 }
   0x6   :  { %16 = vsyncpa [#allocation10], 0 }
   0x7   :  { %18 = vsyncpa [#allocation10 + $0x1], 0 }
   0x8   :  { %19 = vsyncpa [#allocation4], 0 }
   0x9   :  { %21 = vsyncpa [#allocation4 + $0x1], 0 }
   0xa   :  { %22 = vsyncpa [#allocation13], 0 }
   0xb   :  { %24 = vsyncpa [#allocation13 + $0x1], 0  ;;  %s1731_s21 = smov 0   ;;  %s1733_s22 = smov 0  }
   0xc   :  { %s1735_s23 = smov 0   ;;  %s1737_s24 = smov 0  }
   0xd LB: > { %2279 = sst [smem:[#allocation21_spill]] %s1674_s23  ;;  %s1752_s25 = sadd.s32 4294967295, %s1678_s24   ;;  %s1678_s24 = sphi %s1737_s24, %s2314_s24   ;;  %s1674_s23 = sphi %s1735_s23, %s2319_s23   ;;  %s1670_s22 = sphi %s1733_s22, %s2318_s22   ;;  %s1666_s21 = sphi %s1731_s21, %s2317_s21  }
   0xe   : > { %s1144_s26 = sadd.s32 4294967294, %s1678_s24   ;;  %s1756_s27 = sadd.s32 1, %s1678_s24  }
   0xf   : > { %2280 = sst [smem:[#allocation22_spill]] %s1756_s27  ;;  %s37_s28 = sadd.s32 1, %s1674_s23 }
  0x10   : > { %s34_s29 = ssub.s32 %s1678_s24, %s1756_s27  ;;  %p44_p0 = scmp.ne.s32.totalorder %s1674_s23, %s1670_s22 }
  0x11   : > { %p35_p1 = scmp.eq.s32.totalorder %s34_s29, 0  ;;  %p45_p2 = scmp.eq.s32.totalorder %s1678_s24, 0 }
  0x12   : > { %p50_p3 = scmp.ne.s32.totalorder %s1670_s22, %s1666_s21  ;;  %p2258_p4 = scmp.eq.s32.totalorder %s1752_s25, 0 }
  0x13   : > { %s1768_s30 = scalar_select %p35_p1, %s1674_s23, %s37_s28  }
  0x14   : > { %p1770_p5 = por %p45_p2, %p44_p0  ;;  %p1776_p6 = por %p2258_p4, %p50_p3 }
  0x15   : > { %2281 = sst [smem:[#allocation23_spill]] %s1768_s30  ;;  %p168_p7 = scmp.eq.s32.totalorder %s1752_s25, 1 }
  0x16   : > { %s2282_s7 = scalar_select %p1770_p5, 1, 0 }
  0x17   : > { %s2283_s8 = scalar_select %p1776_p6, 1, 0 }
  0x18   : > { %p174_p8 = scmp.eq.s32.totalorder %s1144_s26, 1  ;;  %p1145_p9 = scmp.ge.s32.totalorder %s1678_s24, 1 }
  0x19   : > { %p207_p10 = scmp.lt.s32.totalorder %s1678_s24, 3  ;;  %p1783_p11 = por %p168_p7, %p44_p0 }
  0x1a   : > { %p1787_p12 = por %p174_p8, %p50_p3  ;;  %s1680_s12 = smov [#allocation5]  }
  0x1b   : > { %s2284_s9 = scalar_select %p1783_p11, 1, 0 }
  0x1c   : > { %s2285_s10 = scalar_select %p1787_p12, 1, 0 }
  0x1d   : > { %p1791_p13 = pnand %p1145_p9, %p207_p10  ;;  %s219_s13 = sshll.u32 %s1680_s12, 4  ;;  %s220_s13 = int_to_ptr.vmem [resolvable:$true] %s219_s13 }
  0x1e   : > { %2286 = sst [smem:[#allocation24_spill]] %s2285_s10  ;;  %s246_s15 = sand.u32 1, %s1678_s24  }
  0x1f   : > { %s2287_s11 = scalar_select %p1791_p13, 1, 0 }
  0x20   : > { %p1289_p1 = pneg %p1791_p13  ;;  %s2289_s1 = sld [smem:[#allocation26_spill]] }
  0x22   : > { %p1799_p2 = pnand %p1289_p1, %p2258_p4 }
  0x24   : > { %s2288_s14 = scalar_select %p1799_p2, 1, 0 }
  0x25   : > { %p2266_p8 = pneg %p1799_p2 }
  0x26   : > { %s1418_s18 = scalar_lea.hbm %s2289_s1, 512 }
  0x27   : > { %p1419_p7 = scmp.ne.s32.totalorder %s2289_s1, %s1418_s18  ;;  %p1425_p1 = scmp.lt.u32.totalorder %s1418_s18, %s2289_s1 }
  0x29   : > { %p1421_p9 = pnand %p2266_p8, %p1419_p7 }
  0x2b   : > { %p1422_p10 = pneg %p1421_p9 }
  0x2d   : > { %p1427_p0 = pnand %p1425_p1, %p1422_p10 }
  0x2f   : > { %1430 = shalt.err (!%p1427_p0)
}
  0x30   : > { %s1431_s29 = scalar_lea.vmem %s220_s13, 512  ;;  %p1439_p11 = scmp.lt.s32.totalorder %s220_s13, %s220_s13 }
  0x31   : > { %p1432_p4 = scmp.ne.s32.totalorder %s220_s13, %s1431_s29  ;;  %p1440_p6 = scmp.lt.s32.totalorder %s1431_s29, %s1431_s29 }
  0x33   : > { %p1434_p3 = pnand %p1432_p4, %p2266_p8  ;;  %p1441_p13 = por %p1440_p6, %p1439_p11 }
  0x35   : > { %p1435_p12 = pneg %p1434_p3 }
  0x37   : > { %p1442_p5 = pnand %p1441_p13, %p1435_p12 }
  0x39   : > { %1445 = shalt.err (!%p1442_p5)
}
  0x3a   : > { %s2262_s12 = smov 64   ;;  %s2265_s16 = smov 4  }
  0x3b   : > { %1292 = dma.hbm_to_vmem [thread:$0]  (!%p1799_p2), %s2289_s1, 512, %s220_s13, [#allocation6], %s2262_s12, %s2262_s12, %s2265_s16  }
  0x3c   : > { %s1832_s19 = sand.u32 1, %s1674_s23   ;;  %s2263_s20 = sshll.u32 %s1678_s24, 9 }
  0x3d   : > { %s2264_s26 = sshll.u32 %s1832_s19, 5  ;;  %s2290_s0 = sld [smem:[#allocation25_spill]] }
  0x3e   : > { %p2291_p4 = scmp.ne.s32.totalorder %s2282_s7, 0  ;;  %p2292_p5 = scmp.lt.s32.totalorder %s1678_s24, 2 }
  0x3f   : > { %s250_s17 = scalar_lea.vmem [#allocation2], %s2264_s26  ;;  %s1855_s12 = scalar_lea.sflag [#allocation3], %s246_s15 }
  0x40   : > { %p1847_p6 = pnand %p2292_p5, %p2291_p4  ;;  %s257_s18 = sshll.u32 %s250_s17, 4  ;;  %s1853_s18 = int_to_ptr.vmem [resolvable:$true] %s257_s18 }
  0x42   : > { %s2293_s13 = scalar_select %p1847_p6, 1, 0 }
  0x43   : > { %s1841_s30 = scalar_lea.hbm %s2290_s0, %s2263_s20  ;;  %p1861_p12 = pneg %p1847_p6 }
  0x44   : > { %s1446_s28 = scalar_lea.hbm %s1841_s30, 512  ;;  %s1451_s26 = scalar_lea.hbm %s2290_s0, 1024 }
  0x45   : > { %p1447_p11 = scmp.ne.s32.totalorder %s1841_s30, %s1446_s28  ;;  %p1452_p3 = scmp.lt.u32.totalorder %s1841_s30, %s2290_s0 }
  0x46   : > { %s2294_s7 = scalar_select %p1861_p12, 1, 0 }
  0x47   : > { %p1449_p13 = pnand %p1861_p12, %p1447_p11  ;;  %p1453_p7 = scmp.lt.u32.totalorder %s1451_s26, %s1446_s28 }
  0x48   : > { %p1455_p10 = scmp.lt.u32.totalorder %s1446_s28, %s1841_s30 }
  0x49   : > { %p1450_p0 = pneg %p1449_p13  ;;  %p1454_p9 = por %p1453_p7, %p1452_p3 }
  0x4b   : > { %p1456_p1 = por %p1455_p10, %p1454_p9 }
  0x4d   : > { %p1457_p4 = pnand %p1456_p1, %p1450_p0 }
  0x4f   : > { %1460 = shalt.err (!%p1457_p4)
}
  0x50   : > { %s1461_s15 = scalar_lea.vmem %s1853_s18, 512  ;;  %s1683_s20 = smov [#allocation2]  }
  0x51   : > { %p1462_p5 = scmp.ne.s32.totalorder %s1853_s18, %s1461_s15  ;;  %s1466_s29 = sshll.u32 %s1683_s20, 4  ;;  %s1467_s29 = int_to_ptr.vmem [resolvable:$false] %s1466_s29 }
  0x52   : > { %s1468_s16 = scalar_lea.vmem %s1467_s29, 1024  ;;  %p1469_p8 = scmp.lt.s32.totalorder %s1853_s18, %s1467_s29 }
  0x53   : > { %p1464_p11 = pnand %p1462_p5, %p1861_p12  ;;  %p1470_p2 = scmp.lt.s32.totalorder %s1468_s16, %s1461_s15 }
  0x55   : > { %p1465_p13 = pneg %p1464_p11  ;;  %p1471_p3 = por %p1470_p2, %p1469_p8 }
  0x57   : > { %p1472_p7 = pnand %p1471_p3, %p1465_p13 }
  0x59   : > { %1475 = shalt.err (!%p1472_p7)
}
  0x5a   : > { %s1684_s26 = smov 128   ;;  %s1685_s28 = smov 8  }
  0x5b   : > { %1299 = dma.hbm_to_vmem [thread:$0]  (!%p1847_p6), %s1841_s30, 512, %s1853_s18, %s1855_s12, %s1684_s26, %s1684_s26, %s1685_s28  }
  0x5c   : > { %s1686_s17 = smov [#allocation8]   ;;  %s1152_s29 = sshll.u32 %s1832_s19, 6 }
  0x5d   : > { %s232_s20 = sshll.u32 %s1686_s17, 4  ;;  %s1476_s0 = scalar_lea.hbm %s2254_s3, 256  ;;  %s233_s20 = int_to_ptr.vmem [resolvable:$true] %s232_s20 }
  0x5e   : > { %p1477_p2 = scmp.ne.s32.totalorder %s2254_s3, %s1476_s0  ;;  %p2295_p8 = scmp.ne.s32.totalorder %s2288_s14, 0 }
  0x5f   : > { %p1483_p1 = scmp.lt.u32.totalorder %s1476_s0, %s2254_s3 }
  0x60   : > { %p2296_p0 = pneg %p2295_p8 }
  0x62   : > { %p1479_p9 = pnand %p1477_p2, %p2296_p0 }
  0x64   : > { %p1480_p10 = pneg %p1479_p9 }
  0x66   : > { %p1485_p4 = pnand %p1483_p1, %p1480_p10 }
  0x68   : > { %1488 = shalt.err (!%p1485_p4)
}
  0x69   : > { %s1489_s30 = scalar_lea.vmem %s233_s20, 256  ;;  %p2297_p11 = pmov %p2296_p0 }
  0x6a   : > { %p1490_p5 = scmp.ne.s32.totalorder %s233_s20, %s1489_s30  ;;  %p1497_p7 = scmp.lt.s32.totalorder %s233_s20, %s233_s20 }
  0x6b   : > { %p1498_p6 = scmp.lt.s32.totalorder %s1489_s30, %s1489_s30 }
  0x6c   : > { %p1492_p13 = pnand %p1490_p5, %p2297_p11 }
  0x6d   : > { %p1499_p12 = por %p1498_p6, %p1497_p7 }
  0x6e   : > { %p1493_p3 = pneg %p1492_p13 }
  0x70   : > { %p1500_p0 = pnand %p1499_p12, %p1493_p3 }
  0x72   : > { %1503 = shalt.err (!%p1500_p0)
}
  0x73   : > { %s2298_s1 = smov 4   ;;  %s2299_s23 = smov 64  }
  0x74   : > { %1295 = dma.hbm_to_vmem [thread:$0]  (!%p2295_p8), %s2254_s3, 256, %s233_s20, [#allocation6], %s2299_s23, %s2299_s23, %s2298_s1  }
  0x75   : > { %s1189_s10 = sshll.u32 %s1678_s24, 10  ;;  %s271_s18 = scalar_lea.vmem [#allocation7], %s1152_s29 }
  0x76   : > { %s278_s17 = sshll.u32 %s271_s18, 4  ;;  %s1916_s30 = scalar_lea.hbm %s2253_s2, %s1189_s10  ;;  %s1918_s17 = int_to_ptr.vmem [resolvable:$true] %s278_s17 }
  0x77   : > { %s1504_s14 = scalar_lea.hbm %s1916_s30, 1024  ;;  %p2300_p12 = scmp.ne.s32.totalorder %s2294_s7, 0 }
  0x78   : > { %p1505_p6 = scmp.ne.s32.totalorder %s1916_s30, %s1504_s14  ;;  %s1509_s29 = scalar_lea.hbm %s2253_s2, 2048 }
  0x79   : > { %p1510_p8 = scmp.lt.u32.totalorder %s1916_s30, %s2253_s2  ;;  %p1511_p10 = scmp.lt.u32.totalorder %s1509_s29, %s1504_s14 }
  0x7a   : > { %p1507_p2 = pnand %p1505_p6, %p2300_p12  ;;  %p1513_p4 = scmp.lt.u32.totalorder %s1504_s14, %s1916_s30 }
  0x7b   : > { %p1512_p1 = por %p1511_p10, %p1510_p8 }
  0x7c   : > { %p1508_p9 = pneg %p1507_p2 }
  0x7d   : > { %p1514_p5 = por %p1513_p4, %p1512_p1 }
  0x7f   : > { %p1515_p11 = pnand %p1514_p5, %p1508_p9 }
  0x81   : > { %1518 = shalt.err (!%p1515_p11)
}
  0x82   : > { %s1519_s27 = scalar_lea.vmem %s1918_s17, 1024  ;;  %s1687_s10 = smov [#allocation7]  }
  0x83   : > { %p1520_p13 = scmp.ne.s32.totalorder %s1918_s17, %s1519_s27  ;;  %s1524_s18 = sshll.u32 %s1687_s10, 4  ;;  %s1525_s18 = int_to_ptr.vmem [resolvable:$false] %s1524_s18 }
  0x84   : > { %s1526_s15 = scalar_lea.vmem %s1525_s18, 2048  ;;  %p1527_p0 = scmp.lt.s32.totalorder %s1918_s17, %s1525_s18 }
  0x85   : > { %p1522_p3 = pnand %p1520_p13, %p2300_p12  ;;  %p1528_p6 = scmp.lt.s32.totalorder %s1526_s15, %s1519_s27 }
  0x87   : > { %p1523_p7 = pneg %p1522_p3  ;;  %p1529_p2 = por %p1528_p6, %p1527_p0 }
  0x89   : > { %p1530_p8 = pnand %p1529_p2, %p1523_p7 }
  0x8b   : > { %1533 = shalt.err (!%p1530_p8)
}
  0x8c   : > { %p2301_p9 = scmp.ne.s32.totalorder %s2293_s13, 0  ;;  %s2302_s16 = sshll.u32 %s1678_s24, 9 }
  0x8d   : > { %s1950_s1 = scalar_lea.hbm %s2255_s4, %s2302_s16  ;;  %s2303_s29 = sshll.u32 %s1832_s19, 5 }
  0x8e   : > { %1302 = dma.hbm_to_vmem [thread:$0]  (!%p2301_p9), %s1916_s30, 1024, %s1918_s17, %s1855_s12, %s1684_s26, %s1684_s26, %s1685_s28  }
  0x8f   : > { %s292_s23 = scalar_lea.vmem [#allocation9], %s2303_s29  ;;  %s289_s27 = scalar_lea.sflag [#allocation10], %s1832_s19 }
  0x90   : > { %s299_s0 = sshll.u32 %s292_s23, 4  ;;  %s1534_s10 = scalar_lea.hbm %s1950_s1, 512  ;;  %s1954_s0 = int_to_ptr.vmem [resolvable:$true] %s299_s0 }
  0x91   : > { %p1535_p10 = scmp.ne.s32.totalorder %s1950_s1, %s1534_s10  ;;  %s1539_s30 = scalar_lea.hbm %s2255_s4, 1024 }
  0x92   : > { %p1540_p5 = scmp.lt.u32.totalorder %s1950_s1, %s2255_s4  ;;  %p1541_p11 = scmp.lt.u32.totalorder %s1539_s30, %s1534_s10 }
  0x93   : > { %p1537_p1 = pnand %p1535_p10, %p2300_p12  ;;  %p1543_p3 = scmp.lt.u32.totalorder %s1534_s10, %s1950_s1 }
  0x94   : > { %p1542_p13 = por %p1541_p11, %p1540_p5 }
  0x95   : > { %p1538_p4 = pneg %p1537_p1 }
  0x96   : > { %p1544_p7 = por %p1543_p3, %p1542_p13 }
  0x98   : > { %p1545_p0 = pnand %p1544_p7, %p1538_p4 }
  0x9a   : > { %1548 = shalt.err (!%p1545_p0)
}
  0x9b   : > { %s1549_s16 = scalar_lea.vmem %s1954_s0, 512  ;;  %s1688_s14 = smov [#allocation9]  }
  0x9c   : > { %p1550_p6 = scmp.ne.s32.totalorder %s1954_s0, %s1549_s16  ;;  %s1554_s20 = sshll.u32 %s1688_s14, 4  ;;  %s1555_s20 = int_to_ptr.vmem [resolvable:$false] %s1554_s20 }
  0x9d   : > { %s1556_s29 = scalar_lea.vmem %s1555_s20, 1024  ;;  %p1557_p10 = scmp.lt.s32.totalorder %s1954_s0, %s1555_s20 }
  0x9e   : > { %p1552_p2 = pnand %p1550_p6, %p2300_p12  ;;  %p1558_p1 = scmp.lt.s32.totalorder %s1556_s29, %s1549_s16 }
  0xa0   : > { %p1553_p8 = pneg %p1552_p2  ;;  %p1559_p5 = por %p1558_p1, %p1557_p10 }
  0xa2   : > { %p1560_p11 = pnand %p1559_p5, %p1553_p8 }
  0xa4   : > { %1563 = shalt.err (!%p1560_p11)
}
  0xa5   : > { %1305 = dma.hbm_to_vmem [thread:$0]  (!%p2301_p9), %s1950_s1, 512, %s1954_s0, %s289_s27, %s1684_s26, %s1684_s26, %s1685_s28  }
  0xa6   : > { %p2304_p12 = scmp.ne.s32.totalorder %s2287_s11, 0 }
  0xa7   : > { %s313_s7 = sand.u32 (!%p2304_p12), 1, %s1752_s25   ;;  %s1987_s23 = sand.u32 (!%p2304_p12), 1, %s1670_s22  }
  0xa8   : > { %311 = sbr.rel (%p2304_p12) target bundleno = 1305 (0x519), region = 40  ;;  %s1990_s10 = sshll.u32 (!%p2304_p12), %s1987_s23, 5 }
  0xa9   : > { %s314_s13 = scalar_lea.sflag (!%p2304_p12), [#allocation3], %s313_s7  ;;  %s317_s12 = scalar_lea.vmem (!%p2304_p12), [#allocation2], %s1990_s10 }
  0xaa   : > { %p2305_p4 = scmp.ne.s32.totalorder (!%p2304_p12), %s2283_s8, 0 }
  0xaf   : > { %1637 = dma.done.wait (%p2305_p4), %s314_s13, 512  }
  0xb0   : > { %1639 = vsyncadd (%p2305_p4), %s314_s13, 4294966784  ;;  %p2306_p9 = scmp.eq.s32.totalorder %s1752_s25, 0 }
  0xb2   : > { %1641 = dma.done.wait (%p2306_p9), [#allocation6], 512   ;;  %p2307_p13 = pmov %p2306_p9 }
  0xb3   : > { %s1161_s11 = sshll.u32 %s1987_s23, 6 }
  0xb4   : > { %1643 = vsyncadd (%p2307_p13), [#allocation6], 4294966784  ;;  %s2002_s19 = scalar_lea.vmem [#allocation7], %s1161_s11 }
  0xb5   : > { %1645 = dma.done.wait (%p2305_p4), %s314_s13, 1024  }
  0xb6   : > { %1647 = vsyncadd (%p2305_p4), %s314_s13, 4294966272  ;;  %p2308_p3 = pmov %p2306_p9 }
  0xb8   : > { %1649 = dma.done.wait (%p2308_p3), [#allocation6], 256   ;;  %p2309_p7 = pmov %p2308_p3 }
  0xb9   : > { %s340_s26 = scalar_lea.sflag [#allocation10], %s1987_s23  ;;  %s2014_s28 = scalar_lea.vmem [#allocation9], %s1990_s10 }
  0xba   : > { %1651 = vsyncadd (%p2309_p7), [#allocation6], 4294967040 }
  0xbb   : > { %1653 = dma.done.wait (%p2305_p4), %s340_s26, 512  }
  0xbc   : > { %1655 = vsyncadd (%p2305_p4), %s340_s26, 4294966784  ;;  %v2020_v0 = vld [vmem:[%s317_s12 + $0x10] sm:$0xff]  ;;  %v2022_v1 = vld [vmem:[%s317_s12 + $0x18] sm:$0xff]  ;;  %s1689_s1 = smov 127   ;;  %s1690_s8 = smov 1   ;;  %vm512_vm0 = vcmask 785408  }
  0xbd   : > { %v2024_v2 = vld [vmem:[%s317_s12] sm:$0xff]  ;;  %v1372_v3 = vpack.i.bf16 %v2022_v1, %v2020_v0  ;;  %v2028_v4 = vld [vmem:[%s317_s12 + $0x8] sm:$0xff]  ;;  %v1691_v9 = vmov 0   ;;  %v450_v10 = vld [vmem:[%s2002_s19 + $0x30] sm:$0xff]  ;;  %vm420_vm1 = vcmask 7168   ;;  %v433_v35 = vpack.c.bf16 %v2022_v1, %v2020_v0  ;;  %s1191_s0 = sshll.u32 %s1752_s25, 9 }
  0xbe   : > { %v1362_v5 = vpack.i.bf16 %v2028_v4, %v2024_v2  ;;  %v1404_v6 = vld [vmem:[#allocation5] sm:$0xff]   ;;  %v449_v7 = vld [vmem:[%s2002_s19 + $0x28] sm:$0xff]  ;;  %1383 = vset.pattern.permute.xlu1 %v1691_v9  ;;  %1382 = vset.pattern.permute.xlu0 %v1691_v9  ;;  %v451_v11 = vld [vmem:[%s2002_s19 + $0x38] sm:$0xff]  ;;  %v432_v34 = vpack.c.bf16 %v2028_v4, %v2024_v2  ;;  %vm425_vm2 = vcmask 56320   ;;  %vm828_vm12 = vcmask 64512   ;;  %s379_s27 = scalar_lea.vmem [#allocation11], %s1990_s10  ;;  %s2160_s15 = scalar_lea.hbm %s2256_s5, %s1191_s0 }
  0xbf   : > { %1373 = vrot.lane.b32.xlu1 %v1372_v3, %s1689_s1  ;;  %1231 = vmatprep.mubr.msk.bf16.mxu0 %vm512_vm0, %v1404_v6  ;;  %v448_v8 = vld [vmem:[%s2002_s19 + $0x20] sm:$0xff]  ;;  %v445_v13 = vld [vmem:[%s2002_s19 + $0x8] sm:$0xff]  ;;  %v446_v14 = vld [vmem:[%s2002_s19 + $0x10] sm:$0xff]  ;;  %s961_s17 = sshll.u32 %s379_s27, 4  ;;  %s386_s30 = scalar_lea.vmem [#allocation12], %s1990_s10  ;;  %s2164_s17 = int_to_ptr.vmem [resolvable:$true] %s961_s17 }
  0xc0   : > { %1363 = vrot.lane.b32.xlu0 %v1362_v5, %s1689_s1  ;;  %v444_v12 = vld [vmem:[%s2002_s19] sm:$0xff]  ;;  %v447_v15 = vld [vmem:[%s2002_s19 + $0x18] sm:$0xff]  ;;  %v1405_v42 = vld [vmem:[#allocation5 + $0x8] sm:$0xff]   ;;  %s977_s16 = sshll.u32 %s386_s30, 4  ;;  %s2173_s29 = scalar_lea.hbm %s2257_s6, %s1191_s0  ;;  %s2175_s16 = int_to_ptr.vmem [resolvable:$true] %s977_s16 }
  0xc1   : > { %v1406_v43 = vld [vmem:[#allocation5 + $0x10] sm:$0xff]   ;;  %v1407_v44 = vld [vmem:[#allocation5 + $0x18] sm:$0xff]   ;;  %s943_s7 = scalar_lea.sflag [#allocation4], %s1987_s23  ;;  %s1564_s10 = scalar_lea.vmem %s2164_s17, 512 }
  0xc2   : > { %p1565_p0 = scmp.ne.s32.totalorder %s2164_s17, %s1564_s10  ;;  %p2310_p6 = scmp.ne.s32.totalorder %s2284_s9, 0 }
  0xc3   : > { %1378 = vrot.lane.b32.xlu1 %v1372_v3, %s1690_s8  ;;  %s1692_s13 = smov [#allocation11]  }
  0xc4   : > { %1368 = vrot.lane.b32.xlu0 %v1362_v5, %s1690_s8  ;;  %p1566_p2 = pnand %p1565_p0, %p2310_p6  ;;  %s1568_s12 = sshll.u32 %s1692_s13, 4  ;;  %s1569_s12 = int_to_ptr.vmem [resolvable:$false] %s1568_s12 }
  0xc5   : > { %s1570_s11 = scalar_lea.vmem %s1569_s12, 1024  ;;  %p1571_p10 = scmp.lt.s32.totalorder %s2164_s17, %s1569_s12 }
  0xc6   : > { %p1567_p8 = pneg %p1566_p2  ;;  %p1572_p1 = scmp.lt.s32.totalorder %s1570_s11, %s1564_s10 }
  0xc7   : > { %479 = vperm.xlu1 %1383, %v449_v7  }
  0xc8   : > { %474 = vperm.xlu0 %1382, %v448_v8   ;;  %p1573_p5 = por %p1572_p1, %p1571_p10 }
  0xca   : > { %p1574_p11 = pnand %p1573_p5, %p1567_p8 }
  0xcb   : > { %484 = vperm.xlu1 %1383, %v450_v10  }
  0xcc   : > { %489 = vperm.xlu0 %1382, %v451_v11  }
  0xcf   : > { %454 = vperm.xlu1 %1383, %v444_v12  }
  0xd0   : > { %459 = vperm.xlu0 %1382, %v445_v13  }
  0xd3   : > { %464 = vperm.xlu1 %1383, %v446_v14  }
  0xd4   : > { %469 = vperm.xlu0 %1382, %v447_v15  }
 0x131   : > { %v1374_v16 = vpop.permute.xlu1 %1373 }
 0x132   : > { %v1364_v17 = vpop.permute.xlu0 %1363  ;;  %v1376_v18 = vunpack.i.h.bf16 %v1374_v16  ;;  %v1375_v19 = vunpack.i.l.bf16 %v1374_v16 }
 0x133   : > { %v1366_v24 = vunpack.i.h.bf16 %v1364_v17  ;;  %v1365_v25 = vunpack.i.l.bf16 %v1364_v17 }
 0x135   : > { %v1379_v20 = vpop.permute.xlu1 %1378 }
 0x136   : > { %v1381_v21 = vunpack.i.h.bf16 %v1379_v20  ;;  %v1380_v22 = vunpack.i.l.bf16 %v1379_v20  ;;  %v1369_v23 = vpop.permute.xlu0 %1368 }
 0x137   : > { %v1371_v26 = vunpack.i.h.bf16 %v1369_v23  ;;  %v1370_v27 = vunpack.i.l.bf16 %v1369_v23 }
 0x138   : > { %v423_v30 = vsel %vm420_vm1, %v1375_v19, %v1380_v22  ;;  %v424_v31 = vsel %vm420_vm1, %v1376_v18, %v1381_v21  ;;  %v428_v39 = vsel %vm425_vm2, %v1375_v19, %v1380_v22  ;;  %v429_v40 = vsel %vm425_vm2, %v1376_v18, %v1381_v21 }
 0x139   : > { %v421_v28 = vsel %vm420_vm1, %v1365_v25, %v1370_v27  ;;  %v422_v29 = vsel %vm420_vm1, %v1366_v24, %v1371_v26  ;;  %v431_v33 = vpack.c.bf16 %v424_v31, %v423_v30  ;;  %v426_v36 = vsel %vm425_vm2, %v1365_v25, %v1370_v27 }
 0x13a   : > { %v430_v32 = vpack.c.bf16 %v422_v29, %v421_v28  ;;  %v427_v37 = vsel %vm425_vm2, %v1366_v24, %v1371_v26  ;;  %v435_v41 = vpack.c.bf16 %v429_v40, %v428_v39 }
 0x13b   : > { %v434_v38 = vpack.c.bf16 %v427_v37, %v426_v36  ;;  %v669_v36 = vld [vmem:[%s2014_s28 + $0x18] sm:$0xff]  ;;  %v668_v37 = vld [vmem:[%s2014_s28 + $0x10] sm:$0xff] }
 0x13c   : > { %1219 = vmatprep.subr.bf16.mxu0 %v430_v32 }
 0x13d   : > { %1220 = vmatpush3.bf16.msra.mxu0 %v430_v32 }
 0x13e   : > { %1221 = vmatprep.subr.bf16.mxu0 %v431_v33 }
 0x141   : > { %1222 = vmatpush3.bf16.msra.mxu0 %v431_v33  ;;  %v1408_v33 = vld [vmem:[#allocation8] sm:$0xff]  }
 0x142   : > { %1223 = vmatprep.subr.bf16.mxu0 %v432_v34  ;;  %1251 = vmatprep.mubr.msk.bf16.mxu1 %vm512_vm0, %v1408_v33 }
 0x145   : > { %1224 = vmatpush3.bf16.msra.mxu0 %v432_v34  ;;  %v667_v34 = vld [vmem:[%s2014_s28 + $0x8] sm:$0xff] }
 0x146   : > { %1225 = vmatprep.subr.bf16.mxu0 %v433_v35  ;;  %v480_v45 = vpop.permute.xlu1 %479 }
 0x147   : > { %v475_v46 = vpop.permute.xlu0 %474 }
 0x149   : > { %1226 = vmatpush3.bf16.msra.mxu0 %v433_v35  ;;  %v666_v35 = vld [vmem:[%s2014_s28] sm:$0xff] }
 0x14a   : > { %1227 = vmatprep.subr.bf16.mxu0 %v434_v38  ;;  %v485_v47 = vpop.permute.xlu1 %484 }
 0x14b   : > { %v490_v48 = vpop.permute.xlu0 %489 }
 0x14d   : > { %1228 = vmatpush3.bf16.msra.mxu0 %v434_v38 }
 0x14e   : > { %1229 = vmatprep.subr.bf16.mxu0 %v435_v41  ;;  %v455_v49 = vpop.permute.xlu1 %454 }
 0x14f   : > { %v460_v50 = vpop.permute.xlu0 %459 }
 0x151   : > { %1230 = vmatpush3.bf16.msra.mxu0 %v435_v41 }
 0x152   : > { %v465_v51 = vpop.permute.xlu1 %464 }
 0x153   : > { %v470_v53 = vpop.permute.xlu0 %469 }
 0x154   : > { %1232 = vmatmul.mubr.msk.bf16.vlgmr.msra.gmra.mrb[0].mxu0 %vm512_vm0, %v1405_v42 }
 0x155   : > { %1235 = vmatprep.mubr.msk.bf16.mxu0 %vm512_vm0, %v1406_v43 }
 0x15c   : > { %1236 = vmatmul.mubr.msk.bf16.gmra.mrb[4].mxu0 %vm512_vm0, %v1407_v44 }
 0x15d   : > { %1267 = vmatprep.mubr.msk.bf16.mxu0 %vm512_vm0, %v1408_v33 }
 0x227   : > { %v1233_v52 = vpop.f32.mrb[0].mxu0 }
 0x228   : > { %v559_v54 = vpop.f32.mrb[1].mxu0  ;;  %v568_v55 = vadd.f32 %v1233_v52, %v465_v51 }
 0x229   : > { %v560_v56 = vadd.f32 %v559_v54, %v455_v49  ;;  %v1234_v57 = vpop.f32.mrb[2].mxu0 }
 0x22a   : > { %v571_v58 = vadd.f32 %v1234_v57, %v470_v53  ;;  %v562_v59 = vpop.f32.mrb[3].mxu0  ;;  %v600_v63 = vmul.f32 0.2, %v568_v55  ;;  %vm592_vm6 = vcmp.ge.f32.partialorder %v568_v55, 0.0 }
 0x22b   : > { %v598_v60 = vmul.f32 0.2, %v560_v56  ;;  %v563_v61 = vadd.f32 %v562_v59, %v460_v50  ;;  %vm590_vm3 = vcmp.ge.f32.partialorder %v560_v56, 0.0 }
 0x22c   : > { %vm593_vm4 = vcmp.ge.f32.partialorder %v571_v58, 0.0  ;;  %v601_v62 = vmul.f32 0.2, %v571_v58  ;;  %v2070_v12 = vsel %vm592_vm6, %v568_v55, %v600_v63 }
 0x22d   : > { %vm591_vm5 = vcmp.ge.f32.partialorder %v563_v61, 0.0  ;;  %v599_v3 = vmul.f32 0.2, %v563_v61  ;;  %v2060_v5 = vsel %vm590_vm3, %v560_v56, %v598_v60 }
 0x22e   : > { %v2062_v6 = vsel %vm593_vm4, %v571_v58, %v601_v62  ;;  %v1409_v62 = vld [vmem:[#allocation8 + $0x8] sm:$0xff]  }
 0x22f   : > { %v2064_v7 = vsel %vm591_vm5, %v563_v61, %v599_v3  ;;  %v1237_v8 = vpop.f32.mrb[4].mxu0  ;;  %v2074_v15 = vpack.c.bf16 %v2062_v6, %v2070_v12  ;;  %v1399_v31 = vpack.i.bf16 %v2062_v6, %v2070_v12 }
 0x230   : > { %v2068_v9 = vpack.c.bf16 %v2064_v7, %v2060_v5  ;;  %v584_v10 = vadd.f32 %v1237_v8, %v485_v47  ;;  %v575_v11 = vpop.f32.mrb[5].mxu0  ;;  %v1394_v32 = vpack.i.bf16 %v2064_v7, %v2060_v5 }
 0x231   : > { %v576_v13 = vadd.f32 %v575_v11, %v475_v46  ;;  %v1238_v14 = vpop.f32.mrb[6].mxu0 }
 0x232   : > { %v604_v16 = vmul.f32 0.2, %v584_v10  ;;  %v587_v17 = vadd.f32 %v1238_v14, %v490_v48  ;;  %v578_v18 = vpop.f32.mrb[7].mxu0  ;;  %1255 = vmatprep.subr.bf16.mxu0 %v2068_v9  ;;  %vm596_vm7 = vcmp.ge.f32.partialorder %v584_v10, 0.0 }
 0x233   : > { %v602_v19 = vmul.f32 0.2, %v576_v13  ;;  %v579_v20 = vadd.f32 %v578_v18, %v480_v45  ;;  %1256 = vmatpush3.bf16.msra.mxu0 %v2068_v9  ;;  %vm594_vm8 = vcmp.ge.f32.partialorder %v576_v13, 0.0 }
 0x234   : > { %vm597_vm9 = vcmp.ge.f32.partialorder %v587_v17, 0.0  ;;  %v605_v21 = vmul.f32 0.2, %v587_v17  ;;  %1257 = vmatprep.subr.bf16.mxu0 %v2074_v15  ;;  %v612_v23 = vsel %vm596_vm7, %v584_v10, %v604_v16 }
 0x235   : > { %vm595_vm10 = vcmp.ge.f32.partialorder %v579_v20, 0.0  ;;  %v603_v22 = vmul.f32 0.2, %v579_v20  ;;  %v610_v25 = vsel %vm594_vm8, %v576_v13, %v602_v19 }
 0x236   : > { %v613_v24 = vsel %vm597_vm9, %v587_v17, %v605_v21 }
 0x237   : > { %v611_v26 = vsel %vm595_vm10, %v579_v20, %v603_v22  ;;  %1258 = vmatpush3.bf16.msra.mxu0 %v2074_v15  ;;  %v1389_v27 = vpack.i.bf16 %v613_v24, %v612_v23  ;;  %v659_v30 = vpack.c.bf16 %v613_v24, %v612_v23 }
 0x238   : > { %v658_v28 = vpack.c.bf16 %v611_v26, %v610_v25  ;;  %v1384_v29 = vpack.i.bf16 %v611_v26, %v610_v25 }
 0x239   : > { %1390 = vrot.lane.b32.xlu0 %v1389_v27, %s1690_s8 }
 0x23a   : > { %1385 = vrot.lane.b32.xlu1 %v1384_v29, %s1690_s8  ;;  %1259 = vmatprep.subr.bf16.mxu0 %v658_v28 }
 0x23b   : > { %1260 = vmatpush3.bf16.msra.mxu0 %v658_v28 }
 0x23c   : > { %1261 = vmatprep.subr.bf16.mxu0 %v659_v30 }
 0x23d   : > { %1400 = vrot.lane.b32.xlu0 %v1399_v31, %s1689_s1 }
 0x23e   : > { %1395 = vrot.lane.b32.xlu1 %v1394_v32, %s1689_s1 }
 0x23f   : > { %1262 = vmatpush3.bf16.msra.mxu0 %v659_v30 }
 0x241   : > { %677 = vperm.xlu0 %1382, %v667_v34  }
 0x242   : > { %672 = vperm.xlu1 %1383, %v666_v35  }
 0x245   : > { %687 = vperm.xlu0 %1382, %v669_v36  }
 0x246   : > { %682 = vperm.xlu1 %1383, %v668_v37  }
 0x2ab   : > { %v1391_v38 = vpop.permute.xlu0 %1390 }
 0x2ac   : > { %v1393_v39 = vunpack.i.h.bf16 %v1391_v38  ;;  %v1392_v40 = vunpack.i.l.bf16 %v1391_v38  ;;  %v1386_v41 = vpop.permute.xlu1 %1385 }
 0x2ad   : > { %v1388_v42 = vunpack.i.h.bf16 %v1386_v41  ;;  %v1387_v43 = vunpack.i.l.bf16 %v1386_v41 }
 0x2ae   : > { %v632_v47 = vsel %vm420_vm1, %v612_v23, %v1392_v40  ;;  %v633_v48 = vsel %vm420_vm1, %v613_v24, %v1393_v39 }
 0x2af   : > { %v1401_v44 = vpop.permute.xlu0 %1400  ;;  %v630_v45 = vsel %vm420_vm1, %v610_v25, %v1387_v43  ;;  %v631_v46 = vsel %vm420_vm1, %v611_v26, %v1388_v42  ;;  %v655_v55 = vpack.c.bf16 %v633_v48, %v632_v47 }
 0x2b0   : > { %v1403_v49 = vunpack.i.h.bf16 %v1401_v44  ;;  %v1402_v50 = vunpack.i.l.bf16 %v1401_v44  ;;  %v1396_v51 = vpop.permute.xlu1 %1395  ;;  %v654_v52 = vpack.c.bf16 %v631_v46, %v630_v45 }
 0x2b1   : > { %v1398_v53 = vunpack.i.h.bf16 %v1396_v51  ;;  %v1397_v54 = vunpack.i.l.bf16 %v1396_v51 }
 0x2b2   : > { %1239 = vmatprep.subr.bf16.mxu1 %v654_v52  ;;  %v652_v58 = vsel %vm425_vm2, %v1402_v50, %v2070_v12  ;;  %v653_v59 = vsel %vm425_vm2, %v1403_v49, %v2062_v6 }
 0x2b3   : > { %1240 = vmatpush3.bf16.msra.mxu1 %v654_v52  ;;  %v650_v56 = vsel %vm425_vm2, %v1397_v54, %v2060_v5  ;;  %v651_v57 = vsel %vm425_vm2, %v1398_v53, %v2064_v7  ;;  %v661_v61 = vpack.c.bf16 %v653_v59, %v652_v58 }
 0x2b4   : > { %1241 = vmatprep.subr.bf16.mxu1 %v655_v55  ;;  %v660_v60 = vpack.c.bf16 %v651_v57, %v650_v56 }
 0x2b6   : > { %1263 = vmatprep.subr.bf16.mxu0 %v660_v60 }
 0x2b7   : > { %1242 = vmatpush3.bf16.msra.mxu1 %v655_v55  ;;  %1264 = vmatpush3.bf16.msra.mxu0 %v660_v60 }
 0x2b8   : > { %1243 = vmatprep.subr.bf16.mxu1 %v2068_v9  ;;  %1265 = vmatprep.subr.bf16.mxu0 %v661_v61 }
 0x2bb   : > { %1244 = vmatpush3.bf16.msra.mxu1 %v2068_v9  ;;  %1266 = vmatpush3.bf16.msra.mxu0 %v661_v61 }
 0x2bc   : > { %1245 = vmatprep.subr.bf16.mxu1 %v2074_v15 }
 0x2be   : > { %1268 = vmatmul.mubr.msk.bf16.vlgmr.msra.gmra.mrb[8].mxu0 %vm512_vm0, %v1409_v62 }
 0x2bf   : > { %1246 = vmatpush3.bf16.msra.mxu1 %v2074_v15 }
 0x2c0   : > { %1247 = vmatprep.subr.bf16.mxu1 %v658_v28  ;;  %v678_v8 = vpop.permute.xlu0 %677 }
 0x2c1   : > { %v673_v3 = vpop.permute.xlu1 %672 }
 0x2c3   : > { %1248 = vmatpush3.bf16.msra.mxu1 %v658_v28 }
 0x2c4   : > { %1249 = vmatprep.subr.bf16.mxu1 %v659_v30  ;;  %v688_v21 = vpop.permute.xlu0 %687 }
 0x2c5   : > { %v683_v17 = vpop.permute.xlu1 %682 }
 0x2c7   : > { %1250 = vmatpush3.bf16.msra.mxu1 %v659_v30 }
 0x2ca   : > { %1252 = vmatmul.mubr.msk.bf16.vlgmr.msra.gmra.mrb[0].mxu1 %vm512_vm0, %v1409_v62 }
 0x391   : > { %v1269_v63 = vpop.f32.mrb[8].mxu0 }
 0x392   : > { %v801_v5 = vpop.f32.mrb[9].mxu0  ;;  %v810_v24 = vadd.f32 %v1269_v63, %v683_v17 }
 0x393   : > { %v802_v6 = vadd.f32 %v801_v5, %v673_v3  ;;  %v1270_v7 = vpop.f32.mrb[10].mxu0 }
 0x394   : > { %v804_v9 = vpop.f32.mrb[11].mxu0  ;;  %v813_v28 = vadd.f32 %v1270_v7, %v688_v21  ;;  %v822_v36 = vmul.f32 0.2, %v810_v24  ;;  %vm818_vm2 = vcmp.ge.f32.partialorder %v810_v24, 0.0 }
 0x395   : > { %v820_v10 = vmul.f32 0.2, %v802_v6  ;;  %v805_v11 = vadd.f32 %v804_v9, %v678_v8  ;;  %vm816_vm11 = vcmp.ge.f32.partialorder %v802_v6, 0.0 }
 0x396   : > { %v823_v38 = vmul.f32 0.2, %v813_v28  ;;  %vm819_vm3 = vcmp.ge.f32.partialorder %v813_v28, 0.0  ;;  %v826_v43 = vsel %vm818_vm2, %v810_v24, %v822_v36 }
 0x397   : > { %v821_v12 = vmul.f32 0.2, %v805_v11  ;;  %v2112_v13 = vsel %vm816_vm11, %v802_v6, %v820_v10  ;;  %vm817_vm13 = vcmp.ge.f32.partialorder %v805_v11, 0.0  ;;  %v847_v45 = vsel %vm828_vm12, %v826_v43, 0.0 }
 0x398   : > { %v841_v14 = vsel %vm828_vm12, %v2112_v13, 0.0  ;;  %v827_v44 = vsel %vm819_vm3, %v813_v28, %v823_v38 }
 0x399   : > { %842 = vadd.xlane.f32.xlu0 %v841_v14  ;;  %v2116_v15 = vsel %vm817_vm13, %v805_v11, %v821_v12  ;;  %v850_v46 = vsel %vm828_vm12, %v827_v44, 0.0 }
 0x39a   : > { %v844_v16 = vsel %vm828_vm12, %v2116_v15, 0.0 }
 0x39b   : > { %845 = vadd.xlane.f32.xlu1 %v844_v16 }
 0x39d   : > { %v1253_v18 = vpop.f32.mrb[0].mxu1 }
 0x39e   : > { %v749_v19 = vadd.f32 %v1253_v18, %v683_v17  ;;  %v740_v20 = vpop.f32.mrb[1].mxu1 }
 0x39f   : > { %v741_v22 = vadd.f32 %v740_v20, %v673_v3  ;;  %v1254_v23 = vpop.f32.mrb[2].mxu1 }
 0x3a0   : > { %v761_v25 = vmul.f32 0.2, %v749_v19  ;;  %v752_v26 = vadd.f32 %v1254_v23, %v688_v21  ;;  %v743_v27 = vpop.f32.mrb[3].mxu1  ;;  %vm757_vm14 = vcmp.ge.f32.partialorder %v749_v19, 0.0 }
 0x3a1   : > { %v759_v29 = vmul.f32 0.2, %v741_v22  ;;  %v744_v30 = vadd.f32 %v743_v27, %v678_v8  ;;  %vm755_vm15 = vcmp.ge.f32.partialorder %v741_v22, 0.0 }
 0x3a2   : > { %v762_v31 = vmul.f32 0.2, %v752_v26  ;;  %v765_v32 = vsel %vm757_vm14, %v749_v19, %v761_v25  ;;  %vm758_vm0 = vcmp.ge.f32.partialorder %v752_v26, 0.0 }
 0x3a3   : > { %v760_v33 = vmul.f32 0.2, %v744_v30  ;;  %v835_v34 = vsel %vm828_vm12, %v765_v32, 0.0  ;;  %v763_v35 = vsel %vm755_vm15, %v741_v22, %v759_v29  ;;  %vm756_vm1 = vcmp.ge.f32.partialorder %v744_v30, 0.0 }
 0x3a4   : > { %836 = vadd.xlane.f32.xlu0 %v835_v34  ;;  %v829_v37 = vsel %vm828_vm12, %v763_v35, 0.0  ;;  %v766_v40 = vsel %vm758_vm0, %v752_v26, %v762_v31 }
 0x3a5   : > { %830 = vadd.xlane.f32.xlu1 %v829_v37  ;;  %v764_v39 = vsel %vm756_vm1, %v744_v30, %v760_v33  ;;  %v838_v42 = vsel %vm828_vm12, %v766_v40, 0.0 }
 0x3a6   : > { %v832_v41 = vsel %vm828_vm12, %v764_v39, 0.0 }
 0x3a8   : > { %833 = vadd.xlane.f32.xlu0 %v832_v41 }
 0x3a9   : > { %839 = vadd.xlane.f32.xlu1 %v838_v42 }
 0x3ac   : > { %848 = vadd.xlane.f32.xlu0 %v847_v45 }
 0x3ad   : > { %851 = vadd.xlane.f32.xlu1 %v850_v46 }
 0x426   : > { %v843_v47 = vpop.xlane.xlu0 %842 }
 0x428   : > { %v846_v48 = vpop.xlane.xlu1 %845 }
 0x431   : > { %v837_v49 = vpop.xlane.xlu0 %836 }
 0x432   : > { %v831_v50 = vpop.xlane.xlu1 %830 }
 0x433   : > { %v853_v52 = vadd.f32 %v843_v47, %v831_v50 }
 0x435   : > { %v834_v51 = vpop.xlane.xlu0 %833  ;;  %v858_v56 = vmul.f32 0.0625, %v853_v52 }
 0x436   : > { %v840_v53 = vpop.xlane.xlu1 %839  ;;  %v854_v54 = vadd.f32 %v846_v48, %v834_v51 }
 0x437   : > { %v862_v63 = vsub.f32 %v763_v35, %v858_v56  ;;  %v866_v9 = vsub.f32 %v2112_v13, %v858_v56 }
 0x438   : > { %v859_v59 = vmul.f32 0.0625, %v854_v54 }
 0x439   : > { %v849_v55 = vpop.xlane.xlu0 %848  ;;  %v870_v11 = vmul.f32 %v862_v63, %v862_v63  ;;  %v886_v19 = vmul.f32 %v866_v9, %v866_v9 }
 0x43a   : > { %v855_v57 = vadd.f32 %v849_v55, %v837_v49  ;;  %v852_v58 = vpop.xlane.xlu1 %851  ;;  %v863_v5 = vsub.f32 %v764_v39, %v859_v59  ;;  %v867_v12 = vsub.f32 %v2116_v15, %v859_v59 }
 0x43b   : > { %v856_v60 = vadd.f32 %v852_v58, %v840_v53  ;;  %v874_v18 = vsel %vm828_vm12, %v870_v11, 0.0  ;;  %v890_v13 = vsel %vm828_vm12, %v886_v19, 0.0 }
 0x43c   : > { %v860_v61 = vmul.f32 0.0625, %v855_v57  ;;  %v871_v16 = vmul.f32 %v863_v5, %v863_v5  ;;  %v887_v22 = vmul.f32 %v867_v12, %v867_v12 }
 0x43d   : > { %v861_v62 = vmul.f32 0.0625, %v856_v60 }
 0x43e   : > { %v2126_v3 = vsub.f32 %v765_v32, %v860_v61  ;;  %v868_v17 = vsub.f32 %v826_v43, %v860_v61  ;;  %v877_v21 = vsel %vm828_vm12, %v871_v16, 0.0  ;;  %v893_v15 = vsel %vm828_vm12, %v887_v22, 0.0 }
 0x43f   : > { %v2128_v6 = vsub.f32 %v766_v40, %v861_v62  ;;  %v869_v20 = vsub.f32 %v827_v44, %v861_v62 }
 0x440   : > { %v872_v7 = vmul.f32 %v2126_v3, %v2126_v3  ;;  %v888_v23 = vmul.f32 %v868_v17, %v868_v17 }
 0x441   : > { %v873_v8 = vmul.f32 %v2128_v6, %v2128_v6  ;;  %v889_v24 = vmul.f32 %v869_v20, %v869_v20 }
 0x442   : > { %v880_v10 = vsel %vm828_vm12, %v872_v7, 0.0  ;;  %v896_v25 = vsel %vm828_vm12, %v888_v23, 0.0 }
 0x443   : > { %881 = vadd.xlane.f32.xlu0 %v880_v10  ;;  %v883_v14 = vsel %vm828_vm12, %v873_v8, 0.0  ;;  %v899_v26 = vsel %vm828_vm12, %v889_v24, 0.0 }
 0x444   : > { %884 = vadd.xlane.f32.xlu1 %v883_v14 }
 0x447   : > { %875 = vadd.xlane.f32.xlu0 %v874_v18 }
 0x448   : > { %878 = vadd.xlane.f32.xlu1 %v877_v21 }
 0x44b   : > { %891 = vadd.xlane.f32.xlu0 %v890_v13 }
 0x44c   : > { %894 = vadd.xlane.f32.xlu1 %v893_v15 }
 0x44f   : > { %897 = vadd.xlane.f32.xlu0 %v896_v25 }
 0x450   : > { %900 = vadd.xlane.f32.xlu1 %v899_v26 }
 0x4d0   : > { %v882_v27 = vpop.xlane.xlu0 %881 }
 0x4d1   : > { %v885_v28 = vpop.xlane.xlu1 %884 }
 0x4d4   : > { %v876_v29 = vpop.xlane.xlu0 %875 }
 0x4d5   : > { %v879_v30 = vpop.xlane.xlu1 %878 }
 0x4d8   : > { %v892_v31 = vpop.xlane.xlu0 %891 }
 0x4d9   : > { %v902_v32 = vadd.f32 %v892_v31, %v876_v29  ;;  %v895_v33 = vpop.xlane.xlu1 %894 }
 0x4da   : > { %v903_v34 = vadd.f32 %v895_v33, %v879_v30 }
 0x4db   : > { %v906_v35 = vmul.f32 0.0625, %v902_v32 }
 0x4dc   : > { %v907_v36 = vmul.f32 0.0625, %v903_v34  ;;  %v898_v37 = vpop.xlane.xlu0 %897 }
 0x4dd   : > { %v910_v38 = vadd.f32 1e-05, %v906_v35  ;;  %v904_v39 = vadd.f32 %v898_v37, %v882_v27  ;;  %v901_v40 = vpop.xlane.xlu1 %900 }
 0x4de   : > { %v911_v41 = vadd.f32 1e-05, %v907_v36  ;;  %v905_v42 = vadd.f32 %v901_v40, %v885_v28 }
 0x4df   : > { %1410 = vrsqrt.f32 %v910_v38  ;;  %v908_v43 = vmul.f32 0.0625, %v904_v39 }
 0x4e0   : > { %1412 = vrsqrt.f32 %v911_v41  ;;  %v909_v44 = vmul.f32 0.0625, %v905_v42 }
 0x4e1   : > { %v912_v45 = vadd.f32 1e-05, %v908_v43 }
 0x4e2   : > { %v913_v46 = vadd.f32 1e-05, %v909_v44 }
 0x4e3   : > { %1414 = vrsqrt.f32 %v912_v45 }
 0x4e4   : > { %1416 = vrsqrt.f32 %v913_v46 }
 0x4e9   : > { %v1411_v47 = vpop.eup %1410 }
 0x4ea   : > { %v1413_v48 = vpop.eup %1412  ;;  %v918_v49 = vmul.f32 %v1411_v47, %v862_v63  ;;  %v930_v50 = vmul.f32 %v1411_v47, %v866_v9 }
 0x4eb   : > { %v919_v51 = vmul.f32 %v1413_v48, %v863_v5  ;;  %v931_v52 = vmul.f32 %v1413_v48, %v867_v12 }
 0x4ec   : > { %v922_v53 = vadd.f32 %v918_v49, %v2024_v2  ;;  %v934_v54 = vadd.f32 %v930_v50, %v2024_v2 }
 0x4ed   : > { %v1415_v55 = vpop.eup %1414  ;;  %v923_v56 = vadd.f32 %v919_v51, %v2028_v4  ;;  %v935_v57 = vadd.f32 %v931_v52, %v2028_v4 }
 0x4ee   : > { %v1417_v58 = vpop.eup %1416  ;;  %926 = vst.msk [vmem:[%s379_s27] sm:$0xff] %vm828_vm12, %v922_v53  ;;  %938 = vst.msk [vmem:[%s386_s30] sm:$0xff] %vm828_vm12, %v934_v54  ;;  %v920_v59 = vmul.f32 %v1415_v55, %v2126_v3  ;;  %v932_v60 = vmul.f32 %v1415_v55, %v868_v17 }
 0x4ef   : > { %927 = vst.msk [vmem:[%s379_s27 + $0x8] sm:$0xff] %vm828_vm12, %v923_v56  ;;  %939 = vst.msk [vmem:[%s386_s30 + $0x8] sm:$0xff] %vm828_vm12, %v935_v57  ;;  %v921_v2 = vmul.f32 %v1417_v58, %v2128_v6  ;;  %v933_v61 = vmul.f32 %v1417_v58, %v869_v20 }
 0x4f0   : > { %v924_v4 = vadd.f32 %v920_v59, %v2020_v0  ;;  %v936_v62 = vadd.f32 %v932_v60, %v2020_v0 }
 0x4f1   : > { %v925_v63 = vadd.f32 %v921_v2, %v2022_v1  ;;  %v937_v3 = vadd.f32 %v933_v61, %v2022_v1 }
 0x4f2   : > { %928 = vst.msk [vmem:[%s379_s27 + $0x10] sm:$0xff] %vm828_vm12, %v924_v4  ;;  %940 = vst.msk [vmem:[%s386_s30 + $0x10] sm:$0xff] %vm828_vm12, %v936_v62 }
 0x4f3   : > { %929 = vst.msk [vmem:[%s379_s27 + $0x18] sm:$0xff] %vm828_vm12, %v925_v63  ;;  %941 = vst.msk [vmem:[%s386_s30 + $0x18] sm:$0xff] %vm828_vm12, %v937_v3 }
 0x4f4   : > { %1577 = shalt.err (!%p1574_p11)
}
 0x4f5   : > { %s1578_s19 = scalar_lea.hbm %s2160_s15, 512  ;;  %s1582_s1 = scalar_lea.hbm %s2256_s5, 1024 }
 0x4f6   : > { %p1579_p12 = scmp.ne.s32.totalorder %s2160_s15, %s1578_s19  ;;  %p1583_p13 = scmp.lt.u32.totalorder %s2160_s15, %s2256_s5 }
 0x4f7   : > { %p1584_p3 = scmp.lt.u32.totalorder %s1582_s1, %s1578_s19  ;;  %p1586_p0 = scmp.lt.u32.totalorder %s1578_s19, %s2160_s15 }
 0x4f8   : > { %p1580_p4 = pnand %p1579_p12, %p2310_p6 }
 0x4f9   : > { %p1585_p7 = por %p1584_p3, %p1583_p13 }
 0x4fa   : > { %p1581_p9 = pneg %p1580_p4 }
 0x4fb   : > { %p1587_p2 = por %p1586_p0, %p1585_p7 }
 0x4fd   : > { %p1588_p8 = pnand %p1587_p2, %p1581_p9 }
 0x4ff   : > { %1591 = shalt.err (!%p1588_p8)
}
 0x500   : > { %s1693_s27 = smov 128   ;;  %s1694_s30 = smov 8  }
 0x501   : > { %1285 = dma.vmem_to_hbm [thread:$0]  (%p2310_p6), %s2164_s17, 512, %s2160_s15, %s943_s7, %s1693_s27, %s1693_s27, %s1694_s30  }
 0x502   : > { %s948_s25 = scalar_lea.sflag [#allocation13], %s1987_s23  ;;  %s1592_s18 = scalar_lea.vmem %s2175_s16, 512 }
 0x503   : > { %p1593_p10 = scmp.ne.s32.totalorder %s2175_s16, %s1592_s18  ;;  %s1695_s14 = smov [#allocation12]  }
 0x504   : > { %s1596_s20 = sshll.u32 %s1695_s14, 4  ;;  %s1597_s20 = int_to_ptr.vmem [resolvable:$false] %s1596_s20 }
 0x505   : > { %p1594_p1 = pnand %p1593_p10, %p2310_p6  ;;  %s1598_s10 = scalar_lea.vmem %s1597_s20, 1024 }
 0x506   : > { %p1599_p11 = scmp.lt.s32.totalorder %s2175_s16, %s1597_s20  ;;  %p1600_p12 = scmp.lt.s32.totalorder %s1598_s10, %s1592_s18 }
 0x507   : > { %p1595_p5 = pneg %p1594_p1 }
 0x508   : > { %p1601_p4 = por %p1600_p12, %p1599_p11 }
 0x50a   : > { %p1602_p9 = pnand %p1601_p4, %p1595_p5 }
 0x50c   : > { %1605 = shalt.err (!%p1602_p9)
}
 0x50d   : > { %s1606_s17 = scalar_lea.hbm %s2173_s29, 512  ;;  %s1610_s13 = scalar_lea.hbm %s2257_s6, 1024 }
 0x50e   : > { %p1607_p13 = scmp.ne.s32.totalorder %s2173_s29, %s1606_s17  ;;  %p1611_p0 = scmp.lt.u32.totalorder %s2173_s29, %s2257_s6 }
 0x50f   : > { %p1612_p2 = scmp.lt.u32.totalorder %s1610_s13, %s1606_s17  ;;  %p1614_p10 = scmp.lt.u32.totalorder %s1606_s17, %s2173_s29 }
 0x510   : > { %p1608_p3 = pnand %p1607_p13, %p2310_p6 }
 0x511   : > { %p1613_p8 = por %p1612_p2, %p1611_p0 }
 0x512   : > { %p1609_p7 = pneg %p1608_p3 }
 0x513   : > { %p1615_p1 = por %p1614_p10, %p1613_p8 }
 0x515   : > { %p1616_p5 = pnand %p1615_p1, %p1609_p7 }
 0x517   : > { %1619 = shalt.err (!%p1616_p5)
}
 0x518   : > { %1286 = dma.vmem_to_hbm [thread:$0]  (%p2310_p6), %s2175_s16, 512, %s2173_s29, %s948_s25, %s1693_s27, %s1693_s27, %s1694_s30  }
 0x519 PF: > { %s2311_s19 = sld [smem:[#allocation24_spill]]  ;;  %s992_s26 = sand.u32 1, %s1666_s21  }
 0x51a   : > { %p2313_p12 = scmp.ge.s32.totalorder %s1678_s24, 2  ;;  %s993_s28 = scalar_lea.sflag [#allocation4], %s992_s26 }
 0x51f   : > { %p2312_p11 = scmp.ne.s32.totalorder %s2311_s19, 0 }
 0x521   : > { %p1307_p4 = pnand %p2313_p12, %p2312_p11 }
 0x523   : > { %1657 = dma.done.wait (!%p1307_p4), %s993_s28, 512  }
 0x524   : > { %1659 = vsyncadd (!%p1307_p4), %s993_s28, 4294966784  ;;  %s1002_s9 = scalar_lea.sflag [#allocation13], %s992_s26 }
 0x525   : > { %1661 = dma.done.wait (!%p1307_p4), %s1002_s9, 512  }
 0x526   : > { %1663 = vsyncadd (!%p1307_p4), %s1002_s9, 4294966784  ;;  %s2314_s24 = sld [smem:[#allocation22_spill]]  ;;  %s2315_s23 = sld [smem:[#allocation21_spill]] }
 0x527   : > { %s2316_s1 = sld [smem:[#allocation23_spill]]  ;;  %s2317_s21 = smov %s1670_s22 }
 0x52c   : > { %p27_p6 = scmp.ge.s32.totalorder %s2314_s24, 4   ;;  %s2318_s22 = smov %s2315_s23 }
 0x52d   : > { %s2319_s23 = smov %s2316_s1 }
 0x52e   :  { %29 = sbr.rel (!%p27_p6) target bundleno = 13 (0xd), region = 134 }
 0x535   :  { %1007 = vsyncpa [#allocation3], 1 }
 0x536   :  { %1009 = vsyncpa [#allocation3 + $0x1], 1 }
 0x537   :  { %1010 = vsyncpa [#allocation6], 1 }
 0x538   :  { %1011 = vsyncpa [#allocation10], 1 }
 0x539   :  { %1013 = vsyncpa [#allocation10 + $0x1], 1 }
 0x53a   :  { %1014 = vsyncpa [#allocation4], 1 }
 0x53b   :  { %1016 = vsyncpa [#allocation4 + $0x1], 1 }
 0x53c   :  { %1017 = vsyncpa [#allocation13], 1 }
 0x53d   :  { %1019 = vsyncpa [#allocation13 + $0x1], 1 }

// kernel: decoder_forward.9
= control target key start
LH: loop header
LB: loop body
LE: loop exit
PB: predicated region body
PF: predicated region fallthrough
CT: control target
= control target key end

     0   :  { %s2251_s0 = inlined_call_operand.hbm [shape: f32[2,32,32], index: 0, kind: input, shape index: {}]   ;;  %s2252_s1 = inlined_call_operand.hbm [shape: bf16[64,96], index: 1, kind: input, shape index: {}]   ;;  %s2253_s2 = inlined_call_operand.hbm [shape: f32[2,64,1], index: 2, kind: input, shape index: {}]   ;;  %s2254_s3 = inlined_call_operand.hbm [shape: bf16[32,96], index: 3, kind: input, shape index: {}]   ;;  %s2255_s4 = inlined_call_operand.hbm [shape: f32[2,32,1], index: 4, kind: input, shape index: {}]   ;;  %s2256_s5 = inlined_call_operand.hbm [shape: f32[2,32,32], index: 5, kind: output, shape index: {0}]   ;;  %s2257_s6 = inlined_call_operand.hbm [shape: f32[2,32,32], index: 6, kind: output, shape index: {1}]  }
   0x1   :  { %2277 = sst [smem:[#allocation25_spill]] %s2251_s0 }
   0x2   :  { %2278 = sst [smem:[#allocation26_spill]] %s2252_s1 }
   0x3   :  { %12 = vsyncpa [#allocation3], 0 }
   0x4   :  { %14 = vsyncpa [#allocation3 + $0x1], 0 }
   0x5   :  { %15 = vsyncpa [#allocation6], 0 }
   0x6   :  { %16 = vsyncpa [#allocation10], 0 }
   0x7   :  { %18 = vsyncpa [#allocation10 + $0x1], 0 }
   0x8   :  { %19 = vsyncpa [#allocation4], 0 }
   0x9   :  { %21 = vsyncpa [#allocation4 + $0x1], 0 }
   0xa   :  { %22 = vsyncpa [#allocation13], 0 }
   0xb   :  { %24 = vsyncpa [#allocation13 + $0x1], 0  ;;  %s1731_s21 = smov 0   ;;  %s1733_s22 = smov 0  }
   0xc   :  { %s1735_s23 = smov 0   ;;  %s1737_s24 = smov 0  }
   0xd LB: > { %2279 = sst [smem:[#allocation21_spill]] %s1674_s23  ;;  %s1752_s25 = sadd.s32 4294967295, %s1678_s24   ;;  %s1678_s24 = sphi %s1737_s24, %s2314_s24   ;;  %s1674_s23 = sphi %s1735_s23, %s2319_s23   ;;  %s1670_s22 = sphi %s1733_s22, %s2318_s22   ;;  %s1666_s21 = sphi %s1731_s21, %s2317_s21  }
   0xe   : > { %s1144_s26 = sadd.s32 4294967294, %s1678_s24   ;;  %s1756_s27 = sadd.s32 1, %s1678_s24  }
   0xf   : > { %2280 = sst [smem:[#allocation22_spill]] %s1756_s27  ;;  %s37_s28 = sadd.s32 1, %s1674_s23 }
  0x10   : > { %s34_s29 = ssub.s32 %s1678_s24, %s1756_s27  ;;  %p44_p0 = scmp.ne.s32.totalorder %s1674_s23, %s1670_s22 }
  0x11   : > { %p35_p1 = scmp.eq.s32.totalorder %s34_s29, 0  ;;  %p45_p2 = scmp.eq.s32.totalorder %s1678_s24, 0 }
  0x12   : > { %p50_p3 = scmp.ne.s32.totalorder %s1670_s22, %s1666_s21  ;;  %p2258_p4 = scmp.eq.s32.totalorder %s1752_s25, 0 }
  0x13   : > { %s1768_s30 = scalar_select %p35_p1, %s1674_s23, %s37_s28  }
  0x14   : > { %p1770_p5 = por %p45_p2, %p44_p0  ;;  %p1776_p6 = por %p2258_p4, %p50_p3 }
  0x15   : > { %2281 = sst [smem:[#allocation23_spill]] %s1768_s30  ;;  %p168_p7 = scmp.eq.s32.totalorder %s1752_s25, 1 }
  0x16   : > { %s2282_s7 = scalar_select %p1770_p5, 1, 0 }
  0x17   : > { %s2283_s8 = scalar_select %p1776_p6, 1, 0 }
  0x18   : > { %p174_p8 = scmp.eq.s32.totalorder %s1144_s26, 1  ;;  %p1145_p9 = scmp.ge.s32.totalorder %s1678_s24, 1 }
  0x19   : > { %p207_p10 = scmp.lt.s32.totalorder %s1678_s24, 3  ;;  %p1783_p11 = por %p168_p7, %p44_p0 }
  0x1a   : > { %p1787_p12 = por %p174_p8, %p50_p3  ;;  %s1680_s12 = smov [#allocation5]  }
  0x1b   : > { %s2284_s9 = scalar_select %p1783_p11, 1, 0 }
  0x1c   : > { %s2285_s10 = scalar_select %p1787_p12, 1, 0 }
  0x1d   : > { %p1791_p13 = pnand %p1145_p9, %p207_p10  ;;  %s219_s13 = sshll.u32 %s1680_s12, 4  ;;  %s220_s13 = int_to_ptr.vmem [resolvable:$true] %s219_s13 }
  0x1e   : > { %2286 = sst [smem:[#allocation24_spill]] %s2285_s10  ;;  %s246_s15 = sand.u32 1, %s1678_s24  }
  0x1f   : > { %s2287_s11 = scalar_select %p1791_p13, 1, 0 }
  0x20   : > { %p1289_p1 = pneg %p1791_p13  ;;  %s2289_s1 = sld [smem:[#allocation26_spill]] }
  0x22   : > { %p1799_p2 = pnand %p1289_p1, %p2258_p4 }
  0x24   : > { %s2288_s14 = scalar_select %p1799_p2, 1, 0 }
  0x25   : > { %p2266_p8 = pneg %p1799_p2 }
  0x26   : > { %s1418_s18 = scalar_lea.hbm %s2289_s1, 512 }
  0x27   : > { %p1419_p7 = scmp.ne.s32.totalorder %s2289_s1, %s1418_s18  ;;  %p1425_p1 = scmp.lt.u32.totalorder %s1418_s18, %s2289_s1 }
  0x29   : > { %p1421_p9 = pnand %p2266_p8, %p1419_p7 }
  0x2b   : > { %p1422_p10 = pneg %p1421_p9 }
  0x2d   : > { %p1427_p0 = pnand %p1425_p1, %p1422_p10 }
  0x2f   : > { %1430 = shalt.err (!%p1427_p0)
}
  0x30   : > { %s1431_s29 = scalar_lea.vmem %s220_s13, 512  ;;  %p1439_p11 = scmp.lt.s32.totalorder %s220_s13, %s220_s13 }
  0x31   : > { %p1432_p4 = scmp.ne.s32.totalorder %s220_s13, %s1431_s29  ;;  %p1440_p6 = scmp.lt.s32.totalorder %s1431_s29, %s1431_s29 }
  0x33   : > { %p1434_p3 = pnand %p1432_p4, %p2266_p8  ;;  %p1441_p13 = por %p1440_p6, %p1439_p11 }
  0x35   : > { %p1435_p12 = pneg %p1434_p3 }
  0x37   : > { %p1442_p5 = pnand %p1441_p13, %p1435_p12 }
  0x39   : > { %1445 = shalt.err (!%p1442_p5)
}
  0x3a   : > { %s2262_s12 = smov 64   ;;  %s2265_s16 = smov 4  }
  0x3b   : > { %1292 = dma.hbm_to_vmem [thread:$0]  (!%p1799_p2), %s2289_s1, 512, %s220_s13, [#allocation6], %s2262_s12, %s2262_s12, %s2265_s16  }
  0x3c   : > { %s1832_s19 = sand.u32 1, %s1674_s23   ;;  %s2263_s20 = sshll.u32 %s1678_s24, 9 }
  0x3d   : > { %s2264_s26 = sshll.u32 %s1832_s19, 5  ;;  %s2290_s0 = sld [smem:[#allocation25_spill]] }
  0x3e   : > { %p2291_p4 = scmp.ne.s32.totalorder %s2282_s7, 0  ;;  %p2292_p5 = scmp.lt.s32.totalorder %s1678_s24, 2 }
  0x3f   : > { %s250_s17 = scalar_lea.vmem [#allocation2], %s2264_s26  ;;  %s1855_s12 = scalar_lea.sflag [#allocation3], %s246_s15 }
  0x40   : > { %p1847_p6 = pnand %p2292_p5, %p2291_p4  ;;  %s257_s18 = sshll.u32 %s250_s17, 4  ;;  %s1853_s18 = int_to_ptr.vmem [resolvable:$true] %s257_s18 }
  0x42   : > { %s2293_s13 = scalar_select %p1847_p6, 1, 0 }
  0x43   : > { %s1841_s30 = scalar_lea.hbm %s2290_s0, %s2263_s20  ;;  %p1861_p12 = pneg %p1847_p6 }
  0x44   : > { %s1446_s28 = scalar_lea.hbm %s1841_s30, 512  ;;  %s1451_s26 = scalar_lea.hbm %s2290_s0, 1024 }
  0x45   : > { %p1447_p11 = scmp.ne.s32.totalorder %s1841_s30, %s1446_s28  ;;  %p1452_p3 = scmp.lt.u32.totalorder %s1841_s30, %s2290_s0 }
  0x46   : > { %s2294_s7 = scalar_select %p1861_p12, 1, 0 }
  0x47   : > { %p1449_p13 = pnand %p1861_p12, %p1447_p11  ;;  %p1453_p7 = scmp.lt.u32.totalorder %s1451_s26, %s1446_s28 }
  0x48   : > { %p1455_p10 = scmp.lt.u32.totalorder %s1446_s28, %s1841_s30 }
  0x49   : > { %p1450_p0 = pneg %p1449_p13  ;;  %p1454_p9 = por %p1453_p7, %p1452_p3 }
  0x4b   : > { %p1456_p1 = por %p1455_p10, %p1454_p9 }
  0x4d   : > { %p1457_p4 = pnand %p1456_p1, %p1450_p0 }
  0x4f   : > { %1460 = shalt.err (!%p1457_p4)
}
  0x50   : > { %s1461_s15 = scalar_lea.vmem %s1853_s18, 512  ;;  %s1683_s20 = smov [#allocation2]  }
  0x51   : > { %p1462_p5 = scmp.ne.s32.totalorder %s1853_s18, %s1461_s15  ;;  %s1466_s29 = sshll.u32 %s1683_s20, 4  ;;  %s1467_s29 = int_to_ptr.vmem [resolvable:$false] %s1466_s29 }
  0x52   : > { %s1468_s16 = scalar_lea.vmem %s1467_s29, 1024  ;;  %p1469_p8 = scmp.lt.s32.totalorder %s1853_s18, %s1467_s29 }
  0x53   : > { %p1464_p11 = pnand %p1462_p5, %p1861_p12  ;;  %p1470_p2 = scmp.lt.s32.totalorder %s1468_s16, %s1461_s15 }
  0x55   : > { %p1465_p13 = pneg %p1464_p11  ;;  %p1471_p3 = por %p1470_p2, %p1469_p8 }
  0x57   : > { %p1472_p7 = pnand %p1471_p3, %p1465_p13 }
  0x59   : > { %1475 = shalt.err (!%p1472_p7)
}
  0x5a   : > { %s1684_s26 = smov 128   ;;  %s1685_s28 = smov 8  }
  0x5b   : > { %1299 = dma.hbm_to_vmem [thread:$0]  (!%p1847_p6), %s1841_s30, 512, %s1853_s18, %s1855_s12, %s1684_s26, %s1684_s26, %s1685_s28  }
  0x5c   : > { %s1686_s17 = smov [#allocation8]   ;;  %s1152_s29 = sshll.u32 %s1832_s19, 6 }
  0x5d   : > { %s232_s20 = sshll.u32 %s1686_s17, 4  ;;  %s1476_s0 = scalar_lea.hbm %s2254_s3, 256  ;;  %s233_s20 = int_to_ptr.vmem [resolvable:$true] %s232_s20 }
  0x5e   : > { %p1477_p2 = scmp.ne.s32.totalorder %s2254_s3, %s1476_s0  ;;  %p2295_p8 = scmp.ne.s32.totalorder %s2288_s14, 0 }
  0x5f   : > { %p1483_p1 = scmp.lt.u32.totalorder %s1476_s0, %s2254_s3 }
  0x60   : > { %p2296_p0 = pneg %p2295_p8 }
  0x62   : > { %p1479_p9 = pnand %p1477_p2, %p2296_p0 }
  0x64   : > { %p1480_p10 = pneg %p1479_p9 }
  0x66   : > { %p1485_p4 = pnand %p1483_p1, %p1480_p10 }
  0x68   : > { %1488 = shalt.err (!%p1485_p4)
}
  0x69   : > { %s1489_s30 = scalar_lea.vmem %s233_s20, 256  ;;  %p2297_p11 = pmov %p2296_p0 }
  0x6a   : > { %p1490_p5 = scmp.ne.s32.totalorder %s233_s20, %s1489_s30  ;;  %p1497_p7 = scmp.lt.s32.totalorder %s233_s20, %s233_s20 }
  0x6b   : > { %p1498_p6 = scmp.lt.s32.totalorder %s1489_s30, %s1489_s30 }
  0x6c   : > { %p1492_p13 = pnand %p1490_p5, %p2297_p11 }
  0x6d   : > { %p1499_p12 = por %p1498_p6, %p1497_p7 }
  0x6e   : > { %p1493_p3 = pneg %p1492_p13 }
  0x70   : > { %p1500_p0 = pnand %p1499_p12, %p1493_p3 }
  0x72   : > { %1503 = shalt.err (!%p1500_p0)
}
  0x73   : > { %s2298_s1 = smov 4   ;;  %s2299_s23 = smov 64  }
  0x74   : > { %1295 = dma.hbm_to_vmem [thread:$0]  (!%p2295_p8), %s2254_s3, 256, %s233_s20, [#allocation6], %s2299_s23, %s2299_s23, %s2298_s1  }
  0x75   : > { %s1189_s10 = sshll.u32 %s1678_s24, 10  ;;  %s271_s18 = scalar_lea.vmem [#allocation7], %s1152_s29 }
  0x76   : > { %s278_s17 = sshll.u32 %s271_s18, 4  ;;  %s1916_s30 = scalar_lea.hbm %s2253_s2, %s1189_s10  ;;  %s1918_s17 = int_to_ptr.vmem [resolvable:$true] %s278_s17 }
  0x77   : > { %s1504_s14 = scalar_lea.hbm %s1916_s30, 1024  ;;  %p2300_p12 = scmp.ne.s32.totalorder %s2294_s7, 0 }
  0x78   : > { %p1505_p6 = scmp.ne.s32.totalorder %s1916_s30, %s1504_s14  ;;  %s1509_s29 = scalar_lea.hbm %s2253_s2, 2048 }
  0x79   : > { %p1510_p8 = scmp.lt.u32.totalorder %s1916_s30, %s2253_s2  ;;  %p1511_p10 = scmp.lt.u32.totalorder %s1509_s29, %s1504_s14 }
  0x7a   : > { %p1507_p2 = pnand %p1505_p6, %p2300_p12  ;;  %p1513_p4 = scmp.lt.u32.totalorder %s1504_s14, %s1916_s30 }
  0x7b   : > { %p1512_p1 = por %p1511_p10, %p1510_p8 }
  0x7c   : > { %p1508_p9 = pneg %p1507_p2 }
  0x7d   : > { %p1514_p5 = por %p1513_p4, %p1512_p1 }
  0x7f   : > { %p1515_p11 = pnand %p1514_p5, %p1508_p9 }
  0x81   : > { %1518 = shalt.err (!%p1515_p11)
}
  0x82   : > { %s1519_s27 = scalar_lea.vmem %s1918_s17, 1024  ;;  %s1687_s10 = smov [#allocation7]  }
  0x83   : > { %p1520_p13 = scmp.ne.s32.totalorder %s1918_s17, %s1519_s27  ;;  %s1524_s18 = sshll.u32 %s1687_s10, 4  ;;  %s1525_s18 = int_to_ptr.vmem [resolvable:$false] %s1524_s18 }
  0x84   : > { %s1526_s15 = scalar_lea.vmem %s1525_s18, 2048  ;;  %p1527_p0 = scmp.lt.s32.totalorder %s1918_s17, %s1525_s18 }
  0x85   : > { %p1522_p3 = pnand %p1520_p13, %p2300_p12  ;;  %p1528_p6 = scmp.lt.s32.totalorder %s1526_s15, %s1519_s27 }
  0x87   : > { %p1523_p7 = pneg %p1522_p3  ;;  %p1529_p2 = por %p1528_p6, %p1527_p0 }
  0x89   : > { %p1530_p8 = pnand %p1529_p2, %p1523_p7 }
  0x8b   : > { %1533 = shalt.err (!%p1530_p8)
}
  0x8c   : > { %p2301_p9 = scmp.ne.s32.totalorder %s2293_s13, 0  ;;  %s2302_s16 = sshll.u32 %s1678_s24, 9 }
  0x8d   : > { %s1950_s1 = scalar_lea.hbm %s2255_s4, %s2302_s16  ;;  %s2303_s29 = sshll.u32 %s1832_s19, 5 }
  0x8e   : > { %1302 = dma.hbm_to_vmem [thread:$0]  (!%p2301_p9), %s1916_s30, 1024, %s1918_s17, %s1855_s12, %s1684_s26, %s1684_s26, %s1685_s28  }
  0x8f   : > { %s292_s23 = scalar_lea.vmem [#allocation9], %s2303_s29  ;;  %s289_s27 = scalar_lea.sflag [#allocation10], %s1832_s19 }
  0x90   : > { %s299_s0 = sshll.u32 %s292_s23, 4  ;;  %s1534_s10 = scalar_lea.hbm %s1950_s1, 512  ;;  %s1954_s0 = int_to_ptr.vmem [resolvable:$true] %s299_s0 }
  0x91   : > { %p1535_p10 = scmp.ne.s32.totalorder %s1950_s1, %s1534_s10  ;;  %s1539_s30 = scalar_lea.hbm %s2255_s4, 1024 }
  0x92   : > { %p1540_p5 = scmp.lt.u32.totalorder %s1950_s1, %s2255_s4  ;;  %p1541_p11 = scmp.lt.u32.totalorder %s1539_s30, %s1534_s10 }
  0x93   : > { %p1537_p1 = pnand %p1535_p10, %p2300_p12  ;;  %p1543_p3 = scmp.lt.u32.totalorder %s1534_s10, %s1950_s1 }
  0x94   : > { %p1542_p13 = por %p1541_p11, %p1540_p5 }
  0x95   : > { %p1538_p4 = pneg %p1537_p1 }
  0x96   : > { %p1544_p7 = por %p1543_p3, %p1542_p13 }
  0x98   : > { %p1545_p0 = pnand %p1544_p7, %p1538_p4 }
  0x9a   : > { %1548 = shalt.err (!%p1545_p0)
}
  0x9b   : > { %s1549_s16 = scalar_lea.vmem %s1954_s0, 512  ;;  %s1688_s14 = smov [#allocation9]  }
  0x9c   : > { %p1550_p6 = scmp.ne.s32.totalorder %s1954_s0, %s1549_s16  ;;  %s1554_s20 = sshll.u32 %s1688_s14, 4  ;;  %s1555_s20 = int_to_ptr.vmem [resolvable:$false] %s1554_s20 }
  0x9d   : > { %s1556_s29 = scalar_lea.vmem %s1555_s20, 1024  ;;  %p1557_p10 = scmp.lt.s32.totalorder %s1954_s0, %s1555_s20 }
  0x9e   : > { %p1552_p2 = pnand %p1550_p6, %p2300_p12  ;;  %p1558_p1 = scmp.lt.s32.totalorder %s1556_s29, %s1549_s16 }
  0xa0   : > { %p1553_p8 = pneg %p1552_p2  ;;  %p1559_p5 = por %p1558_p1, %p1557_p10 }
  0xa2   : > { %p1560_p11 = pnand %p1559_p5, %p1553_p8 }
  0xa4   : > { %1563 = shalt.err (!%p1560_p11)
}
  0xa5   : > { %1305 = dma.hbm_to_vmem [thread:$0]  (!%p2301_p9), %s1950_s1, 512, %s1954_s0, %s289_s27, %s1684_s26, %s1684_s26, %s1685_s28  }
  0xa6   : > { %p2304_p12 = scmp.ne.s32.totalorder %s2287_s11, 0 }
  0xa7   : > { %s313_s7 = sand.u32 (!%p2304_p12), 1, %s1752_s25   ;;  %s1987_s23 = sand.u32 (!%p2304_p12), 1, %s1670_s22  }
  0xa8   : > { %311 = sbr.rel (%p2304_p12) target bundleno = 1305 (0x519), region = 40  ;;  %s1990_s10 = sshll.u32 (!%p2304_p12), %s1987_s23, 5 }
  0xa9   : > { %s314_s13 = scalar_lea.sflag (!%p2304_p12), [#allocation3], %s313_s7  ;;  %s317_s12 = scalar_lea.vmem (!%p2304_p12), [#allocation2], %s1990_s10 }
  0xaa   : > { %p2305_p4 = scmp.ne.s32.totalorder (!%p2304_p12), %s2283_s8, 0 }
  0xaf   : > { %1637 = dma.done.wait (%p2305_p4), %s314_s13, 512  }
  0xb0   : > { %1639 = vsyncadd (%p2305_p4), %s314_s13, 4294966784  ;;  %p2306_p9 = scmp.eq.s32.totalorder %s1752_s25, 0 }
  0xb2   : > { %1641 = dma.done.wait (%p2306_p9), [#allocation6], 512   ;;  %p2307_p13 = pmov %p2306_p9 }
  0xb3   : > { %s1161_s11 = sshll.u32 %s1987_s23, 6 }
  0xb4   : > { %1643 = vsyncadd (%p2307_p13), [#allocation6], 4294966784  ;;  %s2002_s19 = scalar_lea.vmem [#allocation7], %s1161_s11 }
  0xb5   : > { %1645 = dma.done.wait (%p2305_p4), %s314_s13, 1024  }
  0xb6   : > { %1647 = vsyncadd (%p2305_p4), %s314_s13, 4294966272  ;;  %p2308_p3 = pmov %p2306_p9 }
  0xb8   : > { %1649 = dma.done.wait (%p2308_p3), [#allocation6], 256   ;;  %p2309_p7 = pmov %p2308_p3 }
  0xb9   : > { %s340_s26 = scalar_lea.sflag [#allocation10], %s1987_s23  ;;  %s2014_s28 = scalar_lea.vmem [#allocation9], %s1990_s10 }
  0xba   : > { %1651 = vsyncadd (%p2309_p7), [#allocation6], 4294967040 }
  0xbb   : > { %1653 = dma.done.wait (%p2305_p4), %s340_s26, 512  }
  0xbc   : > { %1655 = vsyncadd (%p2305_p4), %s340_s26, 4294966784  ;;  %v2020_v0 = vld [vmem:[%s317_s12 + $0x10] sm:$0xff]  ;;  %v2022_v1 = vld [vmem:[%s317_s12 + $0x18] sm:$0xff]  ;;  %s1689_s1 = smov 127   ;;  %s1690_s8 = smov 1   ;;  %vm512_vm0 = vcmask 785408  }
  0xbd   : > { %v2024_v2 = vld [vmem:[%s317_s12] sm:$0xff]  ;;  %v1372_v3 = vpack.i.bf16 %v2022_v1, %v2020_v0  ;;  %v2028_v4 = vld [vmem:[%s317_s12 + $0x8] sm:$0xff]  ;;  %v1691_v9 = vmov 0   ;;  %v450_v10 = vld [vmem:[%s2002_s19 + $0x30] sm:$0xff]  ;;  %vm420_vm1 = vcmask 7168   ;;  %v433_v35 = vpack.c.bf16 %v2022_v1, %v2020_v0  ;;  %s1191_s0 = sshll.u32 %s1752_s25, 9 }
  0xbe   : > { %v1362_v5 = vpack.i.bf16 %v2028_v4, %v2024_v2  ;;  %v1404_v6 = vld [vmem:[#allocation5] sm:$0xff]   ;;  %v449_v7 = vld [vmem:[%s2002_s19 + $0x28] sm:$0xff]  ;;  %1383 = vset.pattern.permute.xlu1 %v1691_v9  ;;  %1382 = vset.pattern.permute.xlu0 %v1691_v9  ;;  %v451_v11 = vld [vmem:[%s2002_s19 + $0x38] sm:$0xff]  ;;  %v432_v34 = vpack.c.bf16 %v2028_v4, %v2024_v2  ;;  %vm425_vm2 = vcmask 252928   ;;  %vm828_vm12 = vcmask 261120   ;;  %s379_s27 = scalar_lea.vmem [#allocation11], %s1990_s10  ;;  %s2160_s15 = scalar_lea.hbm %s2256_s5, %s1191_s0 }
  0xbf   : > { %1373 = vrot.lane.b32.xlu1 %v1372_v3, %s1689_s1  ;;  %1231 = vmatprep.mubr.msk.bf16.mxu0 %vm512_vm0, %v1404_v6  ;;  %v448_v8 = vld [vmem:[%s2002_s19 + $0x20] sm:$0xff]  ;;  %v445_v13 = vld [vmem:[%s2002_s19 + $0x8] sm:$0xff]  ;;  %v446_v14 = vld [vmem:[%s2002_s19 + $0x10] sm:$0xff]  ;;  %s961_s17 = sshll.u32 %s379_s27, 4  ;;  %s386_s30 = scalar_lea.vmem [#allocation12], %s1990_s10  ;;  %s2164_s17 = int_to_ptr.vmem [resolvable:$true] %s961_s17 }
  0xc0   : > { %1363 = vrot.lane.b32.xlu0 %v1362_v5, %s1689_s1  ;;  %v444_v12 = vld [vmem:[%s2002_s19] sm:$0xff]  ;;  %v447_v15 = vld [vmem:[%s2002_s19 + $0x18] sm:$0xff]  ;;  %v1405_v42 = vld [vmem:[#allocation5 + $0x8] sm:$0xff]   ;;  %s977_s16 = sshll.u32 %s386_s30, 4  ;;  %s2173_s29 = scalar_lea.hbm %s2257_s6, %s1191_s0  ;;  %s2175_s16 = int_to_ptr.vmem [resolvable:$true] %s977_s16 }
  0xc1   : > { %v1406_v43 = vld [vmem:[#allocation5 + $0x10] sm:$0xff]   ;;  %v1407_v44 = vld [vmem:[#allocation5 + $0x18] sm:$0xff]   ;;  %s943_s7 = scalar_lea.sflag [#allocation4], %s1987_s23  ;;  %s1564_s10 = scalar_lea.vmem %s2164_s17, 512 }
  0xc2   : > { %p1565_p0 = scmp.ne.s32.totalorder %s2164_s17, %s1564_s10  ;;  %p2310_p6 = scmp.ne.s32.totalorder %s2284_s9, 0 }
  0xc3   : > { %1378 = vrot.lane.b32.xlu1 %v1372_v3, %s1690_s8  ;;  %s1692_s13 = smov [#allocation11]  }
  0xc4   : > { %1368 = vrot.lane.b32.xlu0 %v1362_v5, %s1690_s8  ;;  %p1566_p2 = pnand %p1565_p0, %p2310_p6  ;;  %s1568_s12 = sshll.u32 %s1692_s13, 4  ;;  %s1569_s12 = int_to_ptr.vmem [resolvable:$false] %s1568_s12 }
  0xc5   : > { %s1570_s11 = scalar_lea.vmem %s1569_s12, 1024  ;;  %p1571_p10 = scmp.lt.s32.totalorder %s2164_s17, %s1569_s12 }
  0xc6   : > { %p1567_p8 = pneg %p1566_p2  ;;  %p1572_p1 = scmp.lt.s32.totalorder %s1570_s11, %s1564_s10 }
  0xc7   : > { %479 = vperm.xlu1 %1383, %v449_v7  }
  0xc8   : > { %474 = vperm.xlu0 %1382, %v448_v8   ;;  %p1573_p5 = por %p1572_p1, %p1571_p10 }
  0xca   : > { %p1574_p11 = pnand %p1573_p5, %p1567_p8 }
  0xcb   : > { %484 = vperm.xlu1 %1383, %v450_v10  }
  0xcc   : > { %489 = vperm.xlu0 %1382, %v451_v11  }
  0xcf   : > { %454 = vperm.xlu1 %1383, %v444_v12  }
  0xd0   : > { %459 = vperm.xlu0 %1382, %v445_v13  }
  0xd3   : > { %464 = vperm.xlu1 %1383, %v446_v14  }
  0xd4   : > { %469 = vperm.xlu0 %1382, %v447_v15  }
 0x131   : > { %v1374_v16 = vpop.permute.xlu1 %1373 }
 0x132   : > { %v1364_v17 = vpop.permute.xlu0 %1363  ;;  %v1376_v18 = vunpack.i.h.bf16 %v1374_v16  ;;  %v1375_v19 = vunpack.i.l.bf16 %v1374_v16 }
 0x133   : > { %v1366_v24 = vunpack.i.h.bf16 %v1364_v17  ;;  %v1365_v25 = vunpack.i.l.bf16 %v1364_v17 }
 0x135   : > { %v1379_v20 = vpop.permute.xlu1 %1378 }
 0x136   : > { %v1381_v21 = vunpack.i.h.bf16 %v1379_v20  ;;  %v1380_v22 = vunpack.i.l.bf16 %v1379_v20  ;;  %v1369_v23 = vpop.permute.xlu0 %1368 }
 0x137   : > { %v1371_v26 = vunpack.i.h.bf16 %v1369_v23  ;;  %v1370_v27 = vunpack.i.l.bf16 %v1369_v23 }
 0x138   : > { %v423_v30 = vsel %vm420_vm1, %v1375_v19, %v1380_v22  ;;  %v424_v31 = vsel %vm420_vm1, %v1376_v18, %v1381_v21  ;;  %v428_v39 = vsel %vm425_vm2, %v1375_v19, %v1380_v22  ;;  %v429_v40 = vsel %vm425_vm2, %v1376_v18, %v1381_v21 }
 0x139   : > { %v421_v28 = vsel %vm420_vm1, %v1365_v25, %v1370_v27  ;;  %v422_v29 = vsel %vm420_vm1, %v1366_v24, %v1371_v26  ;;  %v431_v33 = vpack.c.bf16 %v424_v31, %v423_v30  ;;  %v426_v36 = vsel %vm425_vm2, %v1365_v25, %v1370_v27 }
 0x13a   : > { %v430_v32 = vpack.c.bf16 %v422_v29, %v421_v28  ;;  %v427_v37 = vsel %vm425_vm2, %v1366_v24, %v1371_v26  ;;  %v435_v41 = vpack.c.bf16 %v429_v40, %v428_v39 }
 0x13b   : > { %v434_v38 = vpack.c.bf16 %v427_v37, %v426_v36  ;;  %v669_v36 = vld [vmem:[%s2014_s28 + $0x18] sm:$0xff]  ;;  %v668_v37 = vld [vmem:[%s2014_s28 + $0x10] sm:$0xff] }
 0x13c   : > { %1219 = vmatprep.subr.bf16.mxu0 %v430_v32 }
 0x13d   : > { %1220 = vmatpush3.bf16.msra.mxu0 %v430_v32 }
 0x13e   : > { %1221 = vmatprep.subr.bf16.mxu0 %v431_v33 }
 0x141   : > { %1222 = vmatpush3.bf16.msra.mxu0 %v431_v33  ;;  %v1408_v33 = vld [vmem:[#allocation8] sm:$0xff]  }
 0x142   : > { %1223 = vmatprep.subr.bf16.mxu0 %v432_v34  ;;  %1251 = vmatprep.mubr.msk.bf16.mxu1 %vm512_vm0, %v1408_v33 }
 0x145   : > { %1224 = vmatpush3.bf16.msra.mxu0 %v432_v34  ;;  %v667_v34 = vld [vmem:[%s2014_s28 + $0x8] sm:$0xff] }
 0x146   : > { %1225 = vmatprep.subr.bf16.mxu0 %v433_v35  ;;  %v480_v45 = vpop.permute.xlu1 %479 }
 0x147   : > { %v475_v46 = vpop.permute.xlu0 %474 }
 0x149   : > { %1226 = vmatpush3.bf16.msra.mxu0 %v433_v35  ;;  %v666_v35 = vld [vmem:[%s2014_s28] sm:$0xff] }
 0x14a   : > { %1227 = vmatprep.subr.bf16.mxu0 %v434_v38  ;;  %v485_v47 = vpop.permute.xlu1 %484 }
 0x14b   : > { %v490_v48 = vpop.permute.xlu0 %489 }
 0x14d   : > { %1228 = vmatpush3.bf16.msra.mxu0 %v434_v38 }
 0x14e   : > { %1229 = vmatprep.subr.bf16.mxu0 %v435_v41  ;;  %v455_v49 = vpop.permute.xlu1 %454 }
 0x14f   : > { %v460_v50 = vpop.permute.xlu0 %459 }
 0x151   : > { %1230 = vmatpush3.bf16.msra.mxu0 %v435_v41 }
 0x152   : > { %v465_v51 = vpop.permute.xlu1 %464 }
 0x153   : > { %v470_v53 = vpop.permute.xlu0 %469 }
 0x154   : > { %1232 = vmatmul.mubr.msk.bf16.vlgmr.msra.gmra.mrb[0].mxu0 %vm512_vm0, %v1405_v42 }
 0x155   : > { %1235 = vmatprep.mubr.msk.bf16.mxu0 %vm512_vm0, %v1406_v43 }
 0x15c   : > { %1236 = vmatmul.mubr.msk.bf16.gmra.mrb[4].mxu0 %vm512_vm0, %v1407_v44 }
 0x15d   : > { %1267 = vmatprep.mubr.msk.bf16.mxu0 %vm512_vm0, %v1408_v33 }
 0x227   : > { %v1233_v52 = vpop.f32.mrb[0].mxu0 }
 0x228   : > { %v559_v54 = vpop.f32.mrb[1].mxu0  ;;  %v568_v55 = vadd.f32 %v1233_v52, %v465_v51 }
 0x229   : > { %v560_v56 = vadd.f32 %v559_v54, %v455_v49  ;;  %v1234_v57 = vpop.f32.mrb[2].mxu0 }
 0x22a   : > { %v571_v58 = vadd.f32 %v1234_v57, %v470_v53  ;;  %v562_v59 = vpop.f32.mrb[3].mxu0  ;;  %v600_v63 = vmul.f32 0.2, %v568_v55  ;;  %vm592_vm6 = vcmp.ge.f32.partialorder %v568_v55, 0.0 }
 0x22b   : > { %v598_v60 = vmul.f32 0.2, %v560_v56  ;;  %v563_v61 = vadd.f32 %v562_v59, %v460_v50  ;;  %vm590_vm3 = vcmp.ge.f32.partialorder %v560_v56, 0.0 }
 0x22c   : > { %vm593_vm4 = vcmp.ge.f32.partialorder %v571_v58, 0.0  ;;  %v601_v62 = vmul.f32 0.2, %v571_v58  ;;  %v2070_v12 = vsel %vm592_vm6, %v568_v55, %v600_v63 }
 0x22d   : > { %vm591_vm5 = vcmp.ge.f32.partialorder %v563_v61, 0.0  ;;  %v599_v3 = vmul.f32 0.2, %v563_v61  ;;  %v2060_v5 = vsel %vm590_vm3, %v560_v56, %v598_v60 }
 0x22e   : > { %v2062_v6 = vsel %vm593_vm4, %v571_v58, %v601_v62  ;;  %v1409_v62 = vld [vmem:[#allocation8 + $0x8] sm:$0xff]  }
 0x22f   : > { %v2064_v7 = vsel %vm591_vm5, %v563_v61, %v599_v3  ;;  %v1237_v8 = vpop.f32.mrb[4].mxu0  ;;  %v2074_v15 = vpack.c.bf16 %v2062_v6, %v2070_v12  ;;  %v1399_v31 = vpack.i.bf16 %v2062_v6, %v2070_v12 }
 0x230   : > { %v2068_v9 = vpack.c.bf16 %v2064_v7, %v2060_v5  ;;  %v584_v10 = vadd.f32 %v1237_v8, %v485_v47  ;;  %v575_v11 = vpop.f32.mrb[5].mxu0  ;;  %v1394_v32 = vpack.i.bf16 %v2064_v7, %v2060_v5 }
 0x231   : > { %v576_v13 = vadd.f32 %v575_v11, %v475_v46  ;;  %v1238_v14 = vpop.f32.mrb[6].mxu0 }
 0x232   : > { %v604_v16 = vmul.f32 0.2, %v584_v10  ;;  %v587_v17 = vadd.f32 %v1238_v14, %v490_v48  ;;  %v578_v18 = vpop.f32.mrb[7].mxu0  ;;  %1255 = vmatprep.subr.bf16.mxu0 %v2068_v9  ;;  %vm596_vm7 = vcmp.ge.f32.partialorder %v584_v10, 0.0 }
 0x233   : > { %v602_v19 = vmul.f32 0.2, %v576_v13  ;;  %v579_v20 = vadd.f32 %v578_v18, %v480_v45  ;;  %1256 = vmatpush3.bf16.msra.mxu0 %v2068_v9  ;;  %vm594_vm8 = vcmp.ge.f32.partialorder %v576_v13, 0.0 }
 0x234   : > { %vm597_vm9 = vcmp.ge.f32.partialorder %v587_v17, 0.0  ;;  %v605_v21 = vmul.f32 0.2, %v587_v17  ;;  %1257 = vmatprep.subr.bf16.mxu0 %v2074_v15  ;;  %v612_v23 = vsel %vm596_vm7, %v584_v10, %v604_v16 }
 0x235   : > { %vm595_vm10 = vcmp.ge.f32.partialorder %v579_v20, 0.0  ;;  %v603_v22 = vmul.f32 0.2, %v579_v20  ;;  %v610_v25 = vsel %vm594_vm8, %v576_v13, %v602_v19 }
 0x236   : > { %v613_v24 = vsel %vm597_vm9, %v587_v17, %v605_v21 }
 0x237   : > { %v611_v26 = vsel %vm595_vm10, %v579_v20, %v603_v22  ;;  %1258 = vmatpush3.bf16.msra.mxu0 %v2074_v15  ;;  %v1389_v27 = vpack.i.bf16 %v613_v24, %v612_v23  ;;  %v659_v30 = vpack.c.bf16 %v613_v24, %v612_v23 }
 0x238   : > { %v658_v28 = vpack.c.bf16 %v611_v26, %v610_v25  ;;  %v1384_v29 = vpack.i.bf16 %v611_v26, %v610_v25 }
 0x239   : > { %1390 = vrot.lane.b32.xlu0 %v1389_v27, %s1690_s8 }
 0x23a   : > { %1385 = vrot.lane.b32.xlu1 %v1384_v29, %s1690_s8  ;;  %1259 = vmatprep.subr.bf16.mxu0 %v658_v28 }
 0x23b   : > { %1260 = vmatpush3.bf16.msra.mxu0 %v658_v28 }
 0x23c   : > { %1261 = vmatprep.subr.bf16.mxu0 %v659_v30 }
 0x23d   : > { %1400 = vrot.lane.b32.xlu0 %v1399_v31, %s1689_s1 }
 0x23e   : > { %1395 = vrot.lane.b32.xlu1 %v1394_v32, %s1689_s1 }
 0x23f   : > { %1262 = vmatpush3.bf16.msra.mxu0 %v659_v30 }
 0x241   : > { %677 = vperm.xlu0 %1382, %v667_v34  }
 0x242   : > { %672 = vperm.xlu1 %1383, %v666_v35  }
 0x245   : > { %687 = vperm.xlu0 %1382, %v669_v36  }
 0x246   : > { %682 = vperm.xlu1 %1383, %v668_v37  }
 0x2ab   : > { %v1391_v38 = vpop.permute.xlu0 %1390 }
 0x2ac   : > { %v1393_v39 = vunpack.i.h.bf16 %v1391_v38  ;;  %v1392_v40 = vunpack.i.l.bf16 %v1391_v38  ;;  %v1386_v41 = vpop.permute.xlu1 %1385 }
 0x2ad   : > { %v1388_v42 = vunpack.i.h.bf16 %v1386_v41  ;;  %v1387_v43 = vunpack.i.l.bf16 %v1386_v41 }
 0x2ae   : > { %v632_v47 = vsel %vm420_vm1, %v612_v23, %v1392_v40  ;;  %v633_v48 = vsel %vm420_vm1, %v613_v24, %v1393_v39 }
 0x2af   : > { %v1401_v44 = vpop.permute.xlu0 %1400  ;;  %v630_v45 = vsel %vm420_vm1, %v610_v25, %v1387_v43  ;;  %v631_v46 = vsel %vm420_vm1, %v611_v26, %v1388_v42  ;;  %v655_v55 = vpack.c.bf16 %v633_v48, %v632_v47 }
 0x2b0   : > { %v1403_v49 = vunpack.i.h.bf16 %v1401_v44  ;;  %v1402_v50 = vunpack.i.l.bf16 %v1401_v44  ;;  %v1396_v51 = vpop.permute.xlu1 %1395  ;;  %v654_v52 = vpack.c.bf16 %v631_v46, %v630_v45 }
 0x2b1   : > { %v1398_v53 = vunpack.i.h.bf16 %v1396_v51  ;;  %v1397_v54 = vunpack.i.l.bf16 %v1396_v51 }
 0x2b2   : > { %1239 = vmatprep.subr.bf16.mxu1 %v654_v52  ;;  %v652_v58 = vsel %vm425_vm2, %v1402_v50, %v2070_v12  ;;  %v653_v59 = vsel %vm425_vm2, %v1403_v49, %v2062_v6 }
 0x2b3   : > { %1240 = vmatpush3.bf16.msra.mxu1 %v654_v52  ;;  %v650_v56 = vsel %vm425_vm2, %v1397_v54, %v2060_v5  ;;  %v651_v57 = vsel %vm425_vm2, %v1398_v53, %v2064_v7  ;;  %v661_v61 = vpack.c.bf16 %v653_v59, %v652_v58 }
 0x2b4   : > { %1241 = vmatprep.subr.bf16.mxu1 %v655_v55  ;;  %v660_v60 = vpack.c.bf16 %v651_v57, %v650_v56 }
 0x2b6   : > { %1263 = vmatprep.subr.bf16.mxu0 %v660_v60 }
 0x2b7   : > { %1242 = vmatpush3.bf16.msra.mxu1 %v655_v55  ;;  %1264 = vmatpush3.bf16.msra.mxu0 %v660_v60 }
 0x2b8   : > { %1243 = vmatprep.subr.bf16.mxu1 %v2068_v9  ;;  %1265 = vmatprep.subr.bf16.mxu0 %v661_v61 }
 0x2bb   : > { %1244 = vmatpush3.bf16.msra.mxu1 %v2068_v9  ;;  %1266 = vmatpush3.bf16.msra.mxu0 %v661_v61 }
 0x2bc   : > { %1245 = vmatprep.subr.bf16.mxu1 %v2074_v15 }
 0x2be   : > { %1268 = vmatmul.mubr.msk.bf16.vlgmr.msra.gmra.mrb[8].mxu0 %vm512_vm0, %v1409_v62 }
 0x2bf   : > { %1246 = vmatpush3.bf16.msra.mxu1 %v2074_v15 }
 0x2c0   : > { %1247 = vmatprep.subr.bf16.mxu1 %v658_v28  ;;  %v678_v8 = vpop.permute.xlu0 %677 }
 0x2c1   : > { %v673_v3 = vpop.permute.xlu1 %672 }
 0x2c3   : > { %1248 = vmatpush3.bf16.msra.mxu1 %v658_v28 }
 0x2c4   : > { %1249 = vmatprep.subr.bf16.mxu1 %v659_v30  ;;  %v688_v21 = vpop.permute.xlu0 %687 }
 0x2c5   : > { %v683_v17 = vpop.permute.xlu1 %682 }
 0x2c7   : > { %1250 = vmatpush3.bf16.msra.mxu1 %v659_v30 }
 0x2ca   : > { %1252 = vmatmul.mubr.msk.bf16.vlgmr.msra.gmra.mrb[0].mxu1 %vm512_vm0, %v1409_v62 }
 0x391   : > { %v1269_v63 = vpop.f32.mrb[8].mxu0 }
 0x392   : > { %v801_v5 = vpop.f32.mrb[9].mxu0  ;;  %v810_v24 = vadd.f32 %v1269_v63, %v683_v17 }
 0x393   : > { %v802_v6 = vadd.f32 %v801_v5, %v673_v3  ;;  %v1270_v7 = vpop.f32.mrb[10].mxu0 }
 0x394   : > { %v804_v9 = vpop.f32.mrb[11].mxu0  ;;  %v813_v28 = vadd.f32 %v1270_v7, %v688_v21  ;;  %v822_v36 = vmul.f32 0.2, %v810_v24  ;;  %vm818_vm2 = vcmp.ge.f32.partialorder %v810_v24, 0.0 }
 0x395   : > { %v820_v10 = vmul.f32 0.2, %v802_v6  ;;  %v805_v11 = vadd.f32 %v804_v9, %v678_v8  ;;  %vm816_vm11 = vcmp.ge.f32.partialorder %v802_v6, 0.0 }
 0x396   : > { %v823_v38 = vmul.f32 0.2, %v813_v28  ;;  %vm819_vm3 = vcmp.ge.f32.partialorder %v813_v28, 0.0  ;;  %v826_v43 = vsel %vm818_vm2, %v810_v24, %v822_v36 }
 0x397   : > { %v821_v12 = vmul.f32 0.2, %v805_v11  ;;  %v2112_v13 = vsel %vm816_vm11, %v802_v6, %v820_v10  ;;  %vm817_vm13 = vcmp.ge.f32.partialorder %v805_v11, 0.0  ;;  %v847_v45 = vsel %vm828_vm12, %v826_v43, 0.0 }
 0x398   : > { %v841_v14 = vsel %vm828_vm12, %v2112_v13, 0.0  ;;  %v827_v44 = vsel %vm819_vm3, %v813_v28, %v823_v38 }
 0x399   : > { %842 = vadd.xlane.f32.xlu0 %v841_v14  ;;  %v2116_v15 = vsel %vm817_vm13, %v805_v11, %v821_v12  ;;  %v850_v46 = vsel %vm828_vm12, %v827_v44, 0.0 }
 0x39a   : > { %v844_v16 = vsel %vm828_vm12, %v2116_v15, 0.0 }
 0x39b   : > { %845 = vadd.xlane.f32.xlu1 %v844_v16 }
 0x39d   : > { %v1253_v18 = vpop.f32.mrb[0].mxu1 }
 0x39e   : > { %v749_v19 = vadd.f32 %v1253_v18, %v683_v17  ;;  %v740_v20 = vpop.f32.mrb[1].mxu1 }
 0x39f   : > { %v741_v22 = vadd.f32 %v740_v20, %v673_v3  ;;  %v1254_v23 = vpop.f32.mrb[2].mxu1 }
 0x3a0   : > { %v761_v25 = vmul.f32 0.2, %v749_v19  ;;  %v752_v26 = vadd.f32 %v1254_v23, %v688_v21  ;;  %v743_v27 = vpop.f32.mrb[3].mxu1  ;;  %vm757_vm14 = vcmp.ge.f32.partialorder %v749_v19, 0.0 }
 0x3a1   : > { %v759_v29 = vmul.f32 0.2, %v741_v22  ;;  %v744_v30 = vadd.f32 %v743_v27, %v678_v8  ;;  %vm755_vm15 = vcmp.ge.f32.partialorder %v741_v22, 0.0 }
 0x3a2   : > { %v762_v31 = vmul.f32 0.2, %v752_v26  ;;  %v765_v32 = vsel %vm757_vm14, %v749_v19, %v761_v25  ;;  %vm758_vm0 = vcmp.ge.f32.partialorder %v752_v26, 0.0 }
 0x3a3   : > { %v760_v33 = vmul.f32 0.2, %v744_v30  ;;  %v835_v34 = vsel %vm828_vm12, %v765_v32, 0.0  ;;  %v763_v35 = vsel %vm755_vm15, %v741_v22, %v759_v29  ;;  %vm756_vm1 = vcmp.ge.f32.partialorder %v744_v30, 0.0 }
 0x3a4   : > { %836 = vadd.xlane.f32.xlu0 %v835_v34  ;;  %v829_v37 = vsel %vm828_vm12, %v763_v35, 0.0  ;;  %v766_v40 = vsel %vm758_vm0, %v752_v26, %v762_v31 }
 0x3a5   : > { %830 = vadd.xlane.f32.xlu1 %v829_v37  ;;  %v764_v39 = vsel %vm756_vm1, %v744_v30, %v760_v33  ;;  %v838_v42 = vsel %vm828_vm12, %v766_v40, 0.0 }
 0x3a6   : > { %v832_v41 = vsel %vm828_vm12, %v764_v39, 0.0 }
 0x3a8   : > { %833 = vadd.xlane.f32.xlu0 %v832_v41 }
 0x3a9   : > { %839 = vadd.xlane.f32.xlu1 %v838_v42 }
 0x3ac   : > { %848 = vadd.xlane.f32.xlu0 %v847_v45 }
 0x3ad   : > { %851 = vadd.xlane.f32.xlu1 %v850_v46 }
 0x426   : > { %v843_v47 = vpop.xlane.xlu0 %842 }
 0x428   : > { %v846_v48 = vpop.xlane.xlu1 %845 }
 0x431   : > { %v837_v49 = vpop.xlane.xlu0 %836 }
 0x432   : > { %v831_v50 = vpop.xlane.xlu1 %830 }
 0x433   : > { %v853_v52 = vadd.f32 %v843_v47, %v831_v50 }
 0x435   : > { %v834_v51 = vpop.xlane.xlu0 %833  ;;  %v858_v56 = vmul.f32 0.015625, %v853_v52 }
 0x436   : > { %v840_v53 = vpop.xlane.xlu1 %839  ;;  %v854_v54 = vadd.f32 %v846_v48, %v834_v51 }
 0x437   : > { %v862_v63 = vsub.f32 %v763_v35, %v858_v56  ;;  %v866_v9 = vsub.f32 %v2112_v13, %v858_v56 }
 0x438   : > { %v859_v59 = vmul.f32 0.015625, %v854_v54 }
 0x439   : > { %v849_v55 = vpop.xlane.xlu0 %848  ;;  %v870_v11 = vmul.f32 %v862_v63, %v862_v63  ;;  %v886_v19 = vmul.f32 %v866_v9, %v866_v9 }
 0x43a   : > { %v855_v57 = vadd.f32 %v849_v55, %v837_v49  ;;  %v852_v58 = vpop.xlane.xlu1 %851  ;;  %v863_v5 = vsub.f32 %v764_v39, %v859_v59  ;;  %v867_v12 = vsub.f32 %v2116_v15, %v859_v59 }
 0x43b   : > { %v856_v60 = vadd.f32 %v852_v58, %v840_v53  ;;  %v874_v18 = vsel %vm828_vm12, %v870_v11, 0.0  ;;  %v890_v13 = vsel %vm828_vm12, %v886_v19, 0.0 }
 0x43c   : > { %v860_v61 = vmul.f32 0.015625, %v855_v57  ;;  %v871_v16 = vmul.f32 %v863_v5, %v863_v5  ;;  %v887_v22 = vmul.f32 %v867_v12, %v867_v12 }
 0x43d   : > { %v861_v62 = vmul.f32 0.015625, %v856_v60 }
 0x43e   : > { %v2126_v3 = vsub.f32 %v765_v32, %v860_v61  ;;  %v868_v17 = vsub.f32 %v826_v43, %v860_v61  ;;  %v877_v21 = vsel %vm828_vm12, %v871_v16, 0.0  ;;  %v893_v15 = vsel %vm828_vm12, %v887_v22, 0.0 }
 0x43f   : > { %v2128_v6 = vsub.f32 %v766_v40, %v861_v62  ;;  %v869_v20 = vsub.f32 %v827_v44, %v861_v62 }
 0x440   : > { %v872_v7 = vmul.f32 %v2126_v3, %v2126_v3  ;;  %v888_v23 = vmul.f32 %v868_v17, %v868_v17 }
 0x441   : > { %v873_v8 = vmul.f32 %v2128_v6, %v2128_v6  ;;  %v889_v24 = vmul.f32 %v869_v20, %v869_v20 }
 0x442   : > { %v880_v10 = vsel %vm828_vm12, %v872_v7, 0.0  ;;  %v896_v25 = vsel %vm828_vm12, %v888_v23, 0.0 }
 0x443   : > { %881 = vadd.xlane.f32.xlu0 %v880_v10  ;;  %v883_v14 = vsel %vm828_vm12, %v873_v8, 0.0  ;;  %v899_v26 = vsel %vm828_vm12, %v889_v24, 0.0 }
 0x444   : > { %884 = vadd.xlane.f32.xlu1 %v883_v14 }
 0x447   : > { %875 = vadd.xlane.f32.xlu0 %v874_v18 }
 0x448   : > { %878 = vadd.xlane.f32.xlu1 %v877_v21 }
 0x44b   : > { %891 = vadd.xlane.f32.xlu0 %v890_v13 }
 0x44c   : > { %894 = vadd.xlane.f32.xlu1 %v893_v15 }
 0x44f   : > { %897 = vadd.xlane.f32.xlu0 %v896_v25 }
 0x450   : > { %900 = vadd.xlane.f32.xlu1 %v899_v26 }
 0x4d0   : > { %v882_v27 = vpop.xlane.xlu0 %881 }
 0x4d1   : > { %v885_v28 = vpop.xlane.xlu1 %884 }
 0x4d4   : > { %v876_v29 = vpop.xlane.xlu0 %875 }
 0x4d5   : > { %v879_v30 = vpop.xlane.xlu1 %878 }
 0x4d8   : > { %v892_v31 = vpop.xlane.xlu0 %891 }
 0x4d9   : > { %v902_v32 = vadd.f32 %v892_v31, %v876_v29  ;;  %v895_v33 = vpop.xlane.xlu1 %894 }
 0x4da   : > { %v903_v34 = vadd.f32 %v895_v33, %v879_v30 }
 0x4db   : > { %v906_v35 = vmul.f32 0.015625, %v902_v32 }
 0x4dc   : > { %v907_v36 = vmul.f32 0.015625, %v903_v34  ;;  %v898_v37 = vpop.xlane.xlu0 %897 }
 0x4dd   : > { %v910_v38 = vadd.f32 1e-05, %v906_v35  ;;  %v904_v39 = vadd.f32 %v898_v37, %v882_v27  ;;  %v901_v40 = vpop.xlane.xlu1 %900 }
 0x4de   : > { %v911_v41 = vadd.f32 1e-05, %v907_v36  ;;  %v905_v42 = vadd.f32 %v901_v40, %v885_v28 }
 0x4df   : > { %1410 = vrsqrt.f32 %v910_v38  ;;  %v908_v43 = vmul.f32 0.015625, %v904_v39 }
 0x4e0   : > { %1412 = vrsqrt.f32 %v911_v41  ;;  %v909_v44 = vmul.f32 0.015625, %v905_v42 }
 0x4e1   : > { %v912_v45 = vadd.f32 1e-05, %v908_v43 }
 0x4e2   : > { %v913_v46 = vadd.f32 1e-05, %v909_v44 }
 0x4e3   : > { %1414 = vrsqrt.f32 %v912_v45 }
 0x4e4   : > { %1416 = vrsqrt.f32 %v913_v46 }
 0x4e9   : > { %v1411_v47 = vpop.eup %1410 }
 0x4ea   : > { %v1413_v48 = vpop.eup %1412  ;;  %v918_v49 = vmul.f32 %v1411_v47, %v862_v63  ;;  %v930_v50 = vmul.f32 %v1411_v47, %v866_v9 }
 0x4eb   : > { %v919_v51 = vmul.f32 %v1413_v48, %v863_v5  ;;  %v931_v52 = vmul.f32 %v1413_v48, %v867_v12 }
 0x4ec   : > { %v922_v53 = vadd.f32 %v918_v49, %v2024_v2  ;;  %v934_v54 = vadd.f32 %v930_v50, %v2024_v2 }
 0x4ed   : > { %v1415_v55 = vpop.eup %1414  ;;  %v923_v56 = vadd.f32 %v919_v51, %v2028_v4  ;;  %v935_v57 = vadd.f32 %v931_v52, %v2028_v4 }
 0x4ee   : > { %v1417_v58 = vpop.eup %1416  ;;  %926 = vst.msk [vmem:[%s379_s27] sm:$0xff] %vm828_vm12, %v922_v53  ;;  %938 = vst.msk [vmem:[%s386_s30] sm:$0xff] %vm828_vm12, %v934_v54  ;;  %v920_v59 = vmul.f32 %v1415_v55, %v2126_v3  ;;  %v932_v60 = vmul.f32 %v1415_v55, %v868_v17 }
 0x4ef   : > { %927 = vst.msk [vmem:[%s379_s27 + $0x8] sm:$0xff] %vm828_vm12, %v923_v56  ;;  %939 = vst.msk [vmem:[%s386_s30 + $0x8] sm:$0xff] %vm828_vm12, %v935_v57  ;;  %v921_v2 = vmul.f32 %v1417_v58, %v2128_v6  ;;  %v933_v61 = vmul.f32 %v1417_v58, %v869_v20 }
 0x4f0   : > { %v924_v4 = vadd.f32 %v920_v59, %v2020_v0  ;;  %v936_v62 = vadd.f32 %v932_v60, %v2020_v0 }
 0x4f1   : > { %v925_v63 = vadd.f32 %v921_v2, %v2022_v1  ;;  %v937_v3 = vadd.f32 %v933_v61, %v2022_v1 }
 0x4f2   : > { %928 = vst.msk [vmem:[%s379_s27 + $0x10] sm:$0xff] %vm828_vm12, %v924_v4  ;;  %940 = vst.msk [vmem:[%s386_s30 + $0x10] sm:$0xff] %vm828_vm12, %v936_v62 }
 0x4f3   : > { %929 = vst.msk [vmem:[%s379_s27 + $0x18] sm:$0xff] %vm828_vm12, %v925_v63  ;;  %941 = vst.msk [vmem:[%s386_s30 + $0x18] sm:$0xff] %vm828_vm12, %v937_v3 }
 0x4f4   : > { %1577 = shalt.err (!%p1574_p11)
}
 0x4f5   : > { %s1578_s19 = scalar_lea.hbm %s2160_s15, 512  ;;  %s1582_s1 = scalar_lea.hbm %s2256_s5, 1024 }
 0x4f6   : > { %p1579_p12 = scmp.ne.s32.totalorder %s2160_s15, %s1578_s19  ;;  %p1583_p13 = scmp.lt.u32.totalorder %s2160_s15, %s2256_s5 }
 0x4f7   : > { %p1584_p3 = scmp.lt.u32.totalorder %s1582_s1, %s1578_s19  ;;  %p1586_p0 = scmp.lt.u32.totalorder %s1578_s19, %s2160_s15 }
 0x4f8   : > { %p1580_p4 = pnand %p1579_p12, %p2310_p6 }
 0x4f9   : > { %p1585_p7 = por %p1584_p3, %p1583_p13 }
 0x4fa   : > { %p1581_p9 = pneg %p1580_p4 }
 0x4fb   : > { %p1587_p2 = por %p1586_p0, %p1585_p7 }
 0x4fd   : > { %p1588_p8 = pnand %p1587_p2, %p1581_p9 }
 0x4ff   : > { %1591 = shalt.err (!%p1588_p8)
}
 0x500   : > { %s1693_s27 = smov 128   ;;  %s1694_s30 = smov 8  }
 0x501   : > { %1285 = dma.vmem_to_hbm [thread:$0]  (%p2310_p6), %s2164_s17, 512, %s2160_s15, %s943_s7, %s1693_s27, %s1693_s27, %s1694_s30  }
 0x502   : > { %s948_s25 = scalar_lea.sflag [#allocation13], %s1987_s23  ;;  %s1592_s18 = scalar_lea.vmem %s2175_s16, 512 }
 0x503   : > { %p1593_p10 = scmp.ne.s32.totalorder %s2175_s16, %s1592_s18  ;;  %s1695_s14 = smov [#allocation12]  }
 0x504   : > { %s1596_s20 = sshll.u32 %s1695_s14, 4  ;;  %s1597_s20 = int_to_ptr.vmem [resolvable:$false] %s1596_s20 }
 0x505   : > { %p1594_p1 = pnand %p1593_p10, %p2310_p6  ;;  %s1598_s10 = scalar_lea.vmem %s1597_s20, 1024 }
 0x506   : > { %p1599_p11 = scmp.lt.s32.totalorder %s2175_s16, %s1597_s20  ;;  %p1600_p12 = scmp.lt.s32.totalorder %s1598_s10, %s1592_s18 }
 0x507   : > { %p1595_p5 = pneg %p1594_p1 }
 0x508   : > { %p1601_p4 = por %p1600_p12, %p1599_p11 }
 0x50a   : > { %p1602_p9 = pnand %p1601_p4, %p1595_p5 }
 0x50c   : > { %1605 = shalt.err (!%p1602_p9)
}
 0x50d   : > { %s1606_s17 = scalar_lea.hbm %s2173_s29, 512  ;;  %s1610_s13 = scalar_lea.hbm %s2257_s6, 1024 }
 0x50e   : > { %p1607_p13 = scmp.ne.s32.totalorder %s2173_s29, %s1606_s17  ;;  %p1611_p0 = scmp.lt.u32.totalorder %s2173_s29, %s2257_s6 }
 0x50f   : > { %p1612_p2 = scmp.lt.u32.totalorder %s1610_s13, %s1606_s17  ;;  %p1614_p10 = scmp.lt.u32.totalorder %s1606_s17, %s2173_s29 }
 0x510   : > { %p1608_p3 = pnand %p1607_p13, %p2310_p6 }
 0x511   : > { %p1613_p8 = por %p1612_p2, %p1611_p0 }
 0x512   : > { %p1609_p7 = pneg %p1608_p3 }
 0x513   : > { %p1615_p1 = por %p1614_p10, %p1613_p8 }
 0x515   : > { %p1616_p5 = pnand %p1615_p1, %p1609_p7 }
 0x517   : > { %1619 = shalt.err (!%p1616_p5)
}
 0x518   : > { %1286 = dma.vmem_to_hbm [thread:$0]  (%p2310_p6), %s2175_s16, 512, %s2173_s29, %s948_s25, %s1693_s27, %s1693_s27, %s1694_s30  }
 0x519 PF: > { %s2311_s19 = sld [smem:[#allocation24_spill]]  ;;  %s992_s26 = sand.u32 1, %s1666_s21  }
 0x51a   : > { %p2313_p12 = scmp.ge.s32.totalorder %s1678_s24, 2  ;;  %s993_s28 = scalar_lea.sflag [#allocation4], %s992_s26 }
 0x51f   : > { %p2312_p11 = scmp.ne.s32.totalorder %s2311_s19, 0 }
 0x521   : > { %p1307_p4 = pnand %p2313_p12, %p2312_p11 }
 0x523   : > { %1657 = dma.done.wait (!%p1307_p4), %s993_s28, 512  }
 0x524   : > { %1659 = vsyncadd (!%p1307_p4), %s993_s28, 4294966784  ;;  %s1002_s9 = scalar_lea.sflag [#allocation13], %s992_s26 }
 0x525   : > { %1661 = dma.done.wait (!%p1307_p4), %s1002_s9, 512  }
 0x526   : > { %1663 = vsyncadd (!%p1307_p4), %s1002_s9, 4294966784  ;;  %s2314_s24 = sld [smem:[#allocation22_spill]]  ;;  %s2315_s23 = sld [smem:[#allocation21_spill]] }
 0x527   : > { %s2316_s1 = sld [smem:[#allocation23_spill]]  ;;  %s2317_s21 = smov %s1670_s22 }
 0x52c   : > { %p27_p6 = scmp.ge.s32.totalorder %s2314_s24, 4   ;;  %s2318_s22 = smov %s2315_s23 }
 0x52d   : > { %s2319_s23 = smov %s2316_s1 }
 0x52e   :  { %29 = sbr.rel (!%p27_p6) target bundleno = 13 (0xd), region = 134 }
 0x535   :  { %1007 = vsyncpa [#allocation3], 1 }
 0x536   :  { %1009 = vsyncpa [#allocation3 + $0x1], 1 }
 0x537   :  { %1010 = vsyncpa [#allocation6], 1 }
 0x538   :  { %1011 = vsyncpa [#allocation10], 1 }
 0x539   :  { %1013 = vsyncpa [#allocation10 + $0x1], 1 }
 0x53a   :  { %1014 = vsyncpa [#allocation4], 1 }
 0x53b   :  { %1016 = vsyncpa [#allocation4 + $0x1], 1 }
 0x53c   :  { %1017 = vsyncpa [#allocation13], 1 }
 0x53d   :  { %1019 = vsyncpa [#allocation13 + $0x1], 1 }

// kernel: decoder_forward.10
= control target key start
LH: loop header
LB: loop body
LE: loop exit
PB: predicated region body
PF: predicated region fallthrough
CT: control target
= control target key end

     0   :  { %s1588_s0 = inlined_call_operand.hbm [shape: f32[2,32,64], index: 0, kind: input, shape index: {}]   ;;  %s1589_s1 = inlined_call_operand.hbm [shape: bf16[32,32], index: 1, kind: input, shape index: {}]   ;;  %s1590_s2 = inlined_call_operand.hbm [shape: f32[2,32,1], index: 2, kind: input, shape index: {}]   ;;  %s1591_s3 = inlined_call_operand.hbm [shape: bf16[32,32], index: 3, kind: input, shape index: {}]   ;;  %s1592_s4 = inlined_call_operand.hbm [shape: f32[2,32,1], index: 4, kind: input, shape index: {}]   ;;  %s1593_s5 = inlined_call_operand.hbm [shape: f32[2,32,64], index: 5, kind: output, shape index: {}]  }
   0x1   :  { %1612 = sst [smem:[#allocation22_spill]] %s1588_s0 }
   0x2   :  { %1613 = sst [smem:[#allocation23_spill]] %s1589_s1 }
   0x3   :  { %10 = vsyncpa [#allocation3], 0 }
   0x4   :  { %12 = vsyncpa [#allocation3 + $0x1], 0 }
   0x5   :  { %13 = vsyncpa [#allocation6], 0 }
   0x6   :  { %14 = vsyncpa [#allocation10], 0 }
   0x7   :  { %16 = vsyncpa [#allocation10 + $0x1], 0 }
   0x8   :  { %17 = vsyncpa [#allocation4], 0 }
   0x9   :  { %19 = vsyncpa [#allocation4 + $0x1], 0  ;;  %s1213_s18 = smov 0   ;;  %s1215_s19 = smov 0  }
   0xa   :  { %s1217_s20 = smov 0   ;;  %s1219_s21 = smov 0  }
   0xb LB: > { %1614 = sst [smem:[#allocation18_spill]] %s1168_s21  ;;  %s1234_s22 = sadd.s32 4294967295, %s1168_s21   ;;  %s1168_s21 = sphi %s1219_s21, %s1649_s21   ;;  %s1164_s20 = sphi %s1217_s20, %s1653_s20   ;;  %s1160_s19 = sphi %s1215_s19, %s1652_s19   ;;  %s1156_s18 = sphi %s1213_s18, %s1651_s18  }
   0xc   : > { %s780_s23 = sadd.s32 4294967294, %s1168_s21   ;;  %s1238_s24 = sadd.s32 1, %s1168_s21  }
   0xd   : > { %1615 = sst [smem:[#allocation19_spill]] %s1238_s24  ;;  %s32_s25 = sadd.s32 1, %s1164_s20 }
   0xe   : > { %s29_s26 = ssub.s32 %s1168_s21, %s1238_s24  ;;  %p39_p0 = scmp.ne.s32.totalorder %s1164_s20, %s1160_s19 }
   0xf   : > { %p30_p1 = scmp.eq.s32.totalorder %s29_s26, 0  ;;  %p40_p2 = scmp.eq.s32.totalorder %s1168_s21, 0 }
  0x10   : > { %p45_p3 = scmp.ne.s32.totalorder %s1160_s19, %s1156_s18  ;;  %p1594_p4 = scmp.eq.s32.totalorder %s1234_s22, 0 }
  0x11   : > { %s1250_s27 = scalar_select %p30_p1, %s1164_s20, %s32_s25  }
  0x12   : > { %p1252_p5 = por %p40_p2, %p39_p0  ;;  %p1258_p6 = por %p1594_p4, %p45_p3 }
  0x13   : > { %1616 = sst [smem:[#allocation20_spill]] %s1250_s27  ;;  %p163_p7 = scmp.eq.s32.totalorder %s1234_s22, 1 }
  0x14   : > { %s1617_s28 = scalar_select %p1252_p5, 1, 0 }
  0x15   : > { %s1618_s29 = scalar_select %p1258_p6, 1, 0 }
  0x16   : > { %p169_p8 = scmp.eq.s32.totalorder %s780_s23, 1  ;;  %p781_p9 = scmp.ge.s32.totalorder %s1168_s21, 1 }
  0x17   : > { %p176_p10 = scmp.lt.s32.totalorder %s1168_s21, 3  ;;  %p1265_p11 = por %p163_p7, %p39_p0 }
  0x18   : > { %p1269_p12 = por %p169_p8, %p45_p3  ;;  %s1170_s8 = smov [#allocation5]  }
  0x19   : > { %s1619_s30 = scalar_select %p1265_p11, 1, 0 }
  0x1a   : > { %s1620_s6 = scalar_select %p1269_p12, 1, 0 }
  0x1b   : > { %p1273_p13 = pnand %p781_p9, %p176_p10  ;;  %s188_s9 = sshll.u32 %s1170_s8, 4  ;;  %s189_s9 = int_to_ptr.vmem [resolvable:$true] %s188_s9 }
  0x1c   : > { %1621 = sst [smem:[#allocation21_spill]] %s1620_s6  ;;  %s215_s11 = sand.u32 1, %s1168_s21  }
  0x1d   : > { %s1622_s7 = scalar_select %p1273_p13, 1, 0 }
  0x1e   : > { %p858_p1 = pneg %p1273_p13  ;;  %s1624_s1 = sld [smem:[#allocation23_spill]] }
  0x20   : > { %p1281_p2 = pnand %p858_p1, %p1594_p4 }
  0x22   : > { %s1623_s10 = scalar_select %p1281_p2, 1, 0 }
  0x23   : > { %p1601_p8 = pneg %p1281_p2 }
  0x24   : > { %s940_s14 = scalar_lea.hbm %s1624_s1, 256 }
  0x25   : > { %p941_p7 = scmp.ne.s32.totalorder %s1624_s1, %s940_s14  ;;  %p947_p1 = scmp.lt.u32.totalorder %s940_s14, %s1624_s1 }
  0x27   : > { %p943_p9 = pnand %p1601_p8, %p941_p7 }
  0x29   : > { %p944_p10 = pneg %p943_p9 }
  0x2b   : > { %p949_p0 = pnand %p947_p1, %p944_p10 }
  0x2d   : > { %952 = shalt.err (!%p949_p0)
}
  0x2e   : > { %s953_s25 = scalar_lea.vmem %s189_s9, 256  ;;  %p961_p11 = scmp.lt.s32.totalorder %s189_s9, %s189_s9 }
  0x2f   : > { %p954_p4 = scmp.ne.s32.totalorder %s189_s9, %s953_s25  ;;  %p962_p6 = scmp.lt.s32.totalorder %s953_s25, %s953_s25 }
  0x31   : > { %p956_p3 = pnand %p954_p4, %p1601_p8  ;;  %p963_p13 = por %p962_p6, %p961_p11 }
  0x33   : > { %p957_p12 = pneg %p956_p3 }
  0x35   : > { %p964_p5 = pnand %p963_p13, %p957_p12 }
  0x37   : > { %967 = shalt.err (!%p964_p5)
}
  0x38   : > { %s1599_s26 = smov 64   ;;  %s1600_s8 = smov 4  }
  0x39   : > { %861 = dma.hbm_to_vmem [thread:$0]  (!%p1281_p2), %s1624_s1, 256, %s189_s9, [#allocation6], %s1599_s26, %s1599_s26, %s1600_s8  }
  0x3a   : > { %s1598_s14 = sand.u32 1, %s1164_s20   ;;  %s1315_s15 = sshll.u32 %s1168_s21, 9 }
  0x3b   : > { %s1319_s16 = sshll.u32 %s1598_s14, 5  ;;  %s1625_s0 = sld [smem:[#allocation22_spill]] }
  0x3c   : > { %p1626_p4 = scmp.ne.s32.totalorder %s1617_s28, 0  ;;  %p1627_p5 = scmp.lt.s32.totalorder %s1168_s21, 2 }
  0x3d   : > { %s219_s12 = scalar_lea.vmem [#allocation2], %s1319_s16  ;;  %s1338_s14 = scalar_lea.sflag [#allocation3], %s215_s11 }
  0x3e   : > { %p1331_p6 = pnand %p1627_p5, %p1626_p4  ;;  %s226_s13 = sshll.u32 %s219_s12, 4  ;;  %s1336_s13 = int_to_ptr.vmem [resolvable:$true] %s226_s13 }
  0x40   : > { %s1628_s9 = scalar_select %p1331_p6, 1, 0 }
  0x41   : > { %s1325_s25 = scalar_lea.hbm %s1625_s0, %s1315_s15  ;;  %p1344_p12 = pneg %p1331_p6 }
  0x42   : > { %s968_s17 = scalar_lea.hbm %s1325_s25, 512  ;;  %s973_s8 = scalar_lea.hbm %s1625_s0, 1024 }
  0x43   : > { %p969_p11 = scmp.ne.s32.totalorder %s1325_s25, %s968_s17  ;;  %p974_p3 = scmp.lt.u32.totalorder %s1325_s25, %s1625_s0 }
  0x44   : > { %s1629_s28 = scalar_select %p1344_p12, 1, 0 }
  0x45   : > { %p971_p13 = pnand %p1344_p12, %p969_p11  ;;  %p975_p7 = scmp.lt.u32.totalorder %s973_s8, %s968_s17 }
  0x46   : > { %p977_p10 = scmp.lt.u32.totalorder %s968_s17, %s1325_s25 }
  0x47   : > { %p972_p0 = pneg %p971_p13  ;;  %p976_p9 = por %p975_p7, %p974_p3 }
  0x49   : > { %p978_p1 = por %p977_p10, %p976_p9 }
  0x4b   : > { %p979_p4 = pnand %p978_p1, %p972_p0 }
  0x4d   : > { %982 = shalt.err (!%p979_p4)
}
  0x4e   : > { %s983_s11 = scalar_lea.vmem %s1336_s13, 512  ;;  %s1173_s26 = smov [#allocation2]  }
  0x4f   : > { %p984_p5 = scmp.ne.s32.totalorder %s1336_s13, %s983_s11  ;;  %s988_s23 = sshll.u32 %s1173_s26, 4  ;;  %s989_s23 = int_to_ptr.vmem [resolvable:$false] %s988_s23 }
  0x50   : > { %s990_s1 = scalar_lea.vmem %s989_s23, 1024  ;;  %p991_p8 = scmp.lt.s32.totalorder %s1336_s13, %s989_s23 }
  0x51   : > { %p986_p11 = pnand %p984_p5, %p1344_p12  ;;  %p992_p2 = scmp.lt.s32.totalorder %s990_s1, %s983_s11 }
  0x53   : > { %p987_p13 = pneg %p986_p11  ;;  %p993_p3 = por %p992_p2, %p991_p8 }
  0x55   : > { %p994_p7 = pnand %p993_p3, %p987_p13 }
  0x57   : > { %997 = shalt.err (!%p994_p7)
}
  0x58   : > { %s1174_s8 = smov 128   ;;  %s1175_s17 = smov 8  }
  0x59   : > { %868 = dma.hbm_to_vmem [thread:$0]  (!%p1331_p6), %s1325_s25, 512, %s1336_s13, %s1338_s14, %s1174_s8, %s1174_s8, %s1175_s17  }
  0x5a   : > { %s1176_s12 = smov [#allocation8]   ;;  %s1375_s1 = scalar_lea.hbm %s1590_s2, %s1315_s15 }
  0x5b   : > { %s201_s26 = sshll.u32 %s1176_s12, 4  ;;  %s998_s24 = scalar_lea.hbm %s1591_s3, 256  ;;  %s202_s26 = int_to_ptr.vmem [resolvable:$true] %s201_s26 }
  0x5c   : > { %p999_p2 = scmp.ne.s32.totalorder %s1591_s3, %s998_s24  ;;  %p1630_p8 = scmp.ne.s32.totalorder %s1623_s10, 0 }
  0x5d   : > { %p1005_p1 = scmp.lt.u32.totalorder %s998_s24, %s1591_s3 }
  0x5e   : > { %p1631_p0 = pneg %p1630_p8 }
  0x60   : > { %p1001_p9 = pnand %p999_p2, %p1631_p0 }
  0x62   : > { %p1002_p10 = pneg %p1001_p9 }
  0x64   : > { %p1007_p4 = pnand %p1005_p1, %p1002_p10 }
  0x66   : > { %1010 = shalt.err (!%p1007_p4)
}
  0x67   : > { %s1011_s12 = scalar_lea.vmem %s202_s26, 256  ;;  %p1632_p11 = pmov %p1631_p0 }
  0x68   : > { %p1012_p5 = scmp.ne.s32.totalorder %s202_s26, %s1011_s12  ;;  %p1019_p7 = scmp.lt.s32.totalorder %s202_s26, %s202_s26 }
  0x69   : > { %p1020_p6 = scmp.lt.s32.totalorder %s1011_s12, %s1011_s12 }
  0x6a   : > { %p1014_p13 = pnand %p1012_p5, %p1632_p11 }
  0x6b   : > { %p1021_p12 = por %p1020_p6, %p1019_p7 }
  0x6c   : > { %p1015_p3 = pneg %p1014_p13 }
  0x6e   : > { %p1022_p0 = pnand %p1021_p12, %p1015_p3 }
  0x70   : > { %1025 = shalt.err (!%p1022_p0)
}
  0x71   : > { %s1633_s0 = smov 4   ;;  %s1634_s21 = smov 64  }
  0x72   : > { %864 = dma.hbm_to_vmem [thread:$0]  (!%p1630_p8), %s1591_s3, 256, %s202_s26, [#allocation6], %s1634_s21, %s1634_s21, %s1633_s0  }
  0x73   : > { %s240_s6 = scalar_lea.vmem [#allocation7], %s1319_s16  ;;  %s1026_s23 = scalar_lea.hbm %s1375_s1, 512 }
  0x74   : > { %s247_s11 = sshll.u32 %s240_s6, 4  ;;  %p1027_p6 = scmp.ne.s32.totalorder %s1375_s1, %s1026_s23  ;;  %s1401_s11 = int_to_ptr.vmem [resolvable:$true] %s247_s11 }
  0x75   : > { %p1635_p12 = scmp.ne.s32.totalorder %s1629_s28, 0  ;;  %s1031_s13 = scalar_lea.hbm %s1590_s2, 1024 }
  0x76   : > { %p1032_p10 = scmp.lt.u32.totalorder %s1375_s1, %s1590_s2  ;;  %p1033_p1 = scmp.lt.u32.totalorder %s1031_s13, %s1026_s23 }
  0x77   : > { %p1029_p2 = pnand %p1027_p6, %p1635_p12  ;;  %p1035_p8 = scmp.lt.u32.totalorder %s1026_s23, %s1375_s1 }
  0x78   : > { %p1034_p4 = por %p1033_p1, %p1032_p10 }
  0x79   : > { %p1030_p9 = pneg %p1029_p2 }
  0x7a   : > { %p1036_p5 = por %p1035_p8, %p1034_p4 }
  0x7c   : > { %p1037_p11 = pnand %p1036_p5, %p1030_p9 }
  0x7e   : > { %1040 = shalt.err (!%p1037_p11)
}
  0x7f   : > { %s1041_s26 = scalar_lea.vmem %s1401_s11, 512  ;;  %s1177_s0 = smov [#allocation7]  }
  0x80   : > { %p1042_p13 = scmp.ne.s32.totalorder %s1401_s11, %s1041_s26  ;;  %s1046_s21 = sshll.u32 %s1177_s0, 4  ;;  %s1047_s21 = int_to_ptr.vmem [resolvable:$false] %s1046_s21 }
  0x81   : > { %s1048_s27 = scalar_lea.vmem %s1047_s21, 1024  ;;  %p1049_p0 = scmp.lt.s32.totalorder %s1401_s11, %s1047_s21 }
  0x82   : > { %p1044_p3 = pnand %p1042_p13, %p1635_p12  ;;  %p1050_p6 = scmp.lt.s32.totalorder %s1048_s27, %s1041_s26 }
  0x84   : > { %p1045_p7 = pneg %p1044_p3  ;;  %p1051_p2 = por %p1050_p6, %p1049_p0 }
  0x86   : > { %p1052_p10 = pnand %p1051_p2, %p1045_p7 }
  0x88   : > { %1055 = shalt.err (!%p1052_p10)
}
  0x89   : > { %p1636_p9 = scmp.ne.s32.totalorder %s1628_s9, 0  ;;  %s1432_s10 = scalar_lea.hbm %s1592_s4, %s1315_s15 }
  0x8a   : > { %s261_s25 = scalar_lea.vmem [#allocation9], %s1319_s16  ;;  %s1637_s12 = sand.u32 1, %s1164_s20  }
  0x8b   : > { %871 = dma.hbm_to_vmem [thread:$0]  (!%p1636_p9), %s1375_s1, 512, %s1401_s11, %s1338_s14, %s1174_s8, %s1174_s8, %s1175_s17  }
  0x8c   : > { %s268_s13 = sshll.u32 %s261_s25, 4  ;;  %s1439_s24 = scalar_lea.sflag [#allocation10], %s1637_s12  ;;  %s1435_s13 = int_to_ptr.vmem [resolvable:$true] %s268_s13 }
  0x8d   : > { %s1056_s26 = scalar_lea.hbm %s1432_s10, 512  ;;  %s1061_s15 = scalar_lea.hbm %s1592_s4, 1024 }
  0x8e   : > { %p1057_p1 = scmp.ne.s32.totalorder %s1432_s10, %s1056_s26  ;;  %p1062_p5 = scmp.lt.u32.totalorder %s1432_s10, %s1592_s4 }
  0x8f   : > { %p1063_p11 = scmp.lt.u32.totalorder %s1061_s15, %s1056_s26  ;;  %p1065_p3 = scmp.lt.u32.totalorder %s1056_s26, %s1432_s10 }
  0x90   : > { %p1059_p4 = pnand %p1057_p1, %p1635_p12 }
  0x91   : > { %p1064_p13 = por %p1063_p11, %p1062_p5 }
  0x92   : > { %p1060_p8 = pneg %p1059_p4 }
  0x93   : > { %p1066_p7 = por %p1065_p3, %p1064_p13 }
  0x95   : > { %p1067_p0 = pnand %p1066_p7, %p1060_p8 }
  0x97   : > { %1070 = shalt.err (!%p1067_p0)
}
  0x98   : > { %s1071_s16 = scalar_lea.vmem %s1435_s13, 512  ;;  %s1178_s21 = smov [#allocation9]  }
  0x99   : > { %p1072_p6 = scmp.ne.s32.totalorder %s1435_s13, %s1071_s16  ;;  %s1076_s27 = sshll.u32 %s1178_s21, 4  ;;  %s1077_s27 = int_to_ptr.vmem [resolvable:$false] %s1076_s27 }
  0x9a   : > { %s1078_s6 = scalar_lea.vmem %s1077_s27, 1024  ;;  %p1079_p1 = scmp.lt.s32.totalorder %s1435_s13, %s1077_s27 }
  0x9b   : > { %p1074_p2 = pnand %p1072_p6, %p1635_p12  ;;  %p1080_p4 = scmp.lt.s32.totalorder %s1078_s6, %s1071_s16 }
  0x9d   : > { %p1075_p10 = pneg %p1074_p2  ;;  %p1081_p5 = por %p1080_p4, %p1079_p1 }
  0x9f   : > { %p1082_p11 = pnand %p1081_p5, %p1075_p10 }
  0xa1   : > { %1085 = shalt.err (!%p1082_p11)
}
  0xa2   : > { %874 = dma.hbm_to_vmem [thread:$0]  (!%p1636_p9), %s1432_s10, 512, %s1435_s13, %s1439_s24, %s1174_s8, %s1174_s8, %s1175_s17  }
  0xa3   : > { %p1638_p12 = scmp.ne.s32.totalorder %s1622_s7, 0 }
  0xa4   : > { %s282_s28 = sand.u32 (!%p1638_p12), 1, %s1234_s22   ;;  %s1470_s23 = sand.u32 (!%p1638_p12), 1, %s1160_s19  }
  0xa5   : > { %280 = sbr.rel (%p1638_p12) target bundleno = 978 (0x3d2), region = 40  ;;  %s1473_s25 = sshll.u32 (!%p1638_p12), %s1470_s23, 5 }
  0xa6   : > { %s283_s9 = scalar_lea.sflag (!%p1638_p12), [#allocation3], %s282_s28  ;;  %s286_s12 = scalar_lea.vmem (!%p1638_p12), [#allocation2], %s1473_s25 }
  0xa7   : > { %p1639_p8 = scmp.ne.s32.totalorder (!%p1638_p12), %s1618_s29, 0 }
  0xac   : > { %1131 = dma.done.wait (%p1639_p8), %s283_s9, 512  }
  0xad   : > { %1133 = vsyncadd (%p1639_p8), %s283_s9, 4294966784  ;;  %p1640_p9 = scmp.eq.s32.totalorder %s1234_s22, 0 }
  0xaf   : > { %1135 = dma.done.wait (%p1640_p9), [#allocation6], 256   ;;  %p1641_p13 = pmov %p1640_p9 }
  0xb0   : > { %s299_s7 = scalar_lea.vmem [#allocation7], %s1473_s25 }
  0xb1   : > { %1137 = vsyncadd (%p1641_p13), [#allocation6], 4294967040 }
  0xb2   : > { %1139 = dma.done.wait (%p1639_p8), %s283_s9, 512  }
  0xb3   : > { %1141 = vsyncadd (%p1639_p8), %s283_s9, 4294966784  ;;  %p1642_p3 = pmov %p1640_p9 }
  0xb5   : > { %1143 = dma.done.wait (%p1642_p3), [#allocation6], 256   ;;  %p1643_p7 = pmov %p1642_p3 }
  0xb6   : > { %s309_s8 = scalar_lea.sflag [#allocation10], %s1470_s23  ;;  %s1495_s17 = scalar_lea.vmem [#allocation9], %s1473_s25 }
  0xb7   : > { %1145 = vsyncadd (%p1643_p7), [#allocation6], 4294967040 }
  0xb8   : > { %1147 = dma.done.wait (%p1639_p8), %s309_s8, 512  }
  0xb9   : > { %1149 = vsyncadd (%p1639_p8), %s309_s8, 4294966784  ;;  %v1179_v0 = vmov 0   ;;  %v1501_v1 = vld [vmem:[%s286_s12] sm:$0xff]  ;;  %v1503_v2 = vld [vmem:[%s286_s12 + $0x8] sm:$0xff]  ;;  %vm394_vm0 = vcmask 261120   ;;  %vm569_vm5 = vcmask 523264  }
  0xba   : > { %926 = vset.pattern.permute.xlu0 %v1179_v0  ;;  %927 = vset.pattern.permute.xlu1 %v1179_v0  ;;  %v1505_v3 = vld [vmem:[%s286_s12 + $0x10] sm:$0xff]  ;;  %v358_v4 = vpack.c.bf16 %v1503_v2, %v1501_v1  ;;  %v1509_v5 = vld [vmem:[%s286_s12 + $0x18] sm:$0xff]  ;;  %v928_v7 = vld [vmem:[#allocation5] sm:$0xff]   ;;  %s348_s29 = scalar_lea.vmem [#allocation11], %s1473_s25  ;;  %s817_s10 = sshll.u32 %s1234_s22, 9 }
  0xbb   : > { %v359_v6 = vpack.c.bf16 %v1509_v5, %v1505_v3  ;;  %v360_v8 = vld [vmem:[%s299_s7] sm:$0xff]  ;;  %v362_v9 = vld [vmem:[%s299_s7 + $0x10] sm:$0xff]  ;;  %830 = vmatprep.mubr.msk.bf16.mxu0 %vm394_vm0, %v928_v7  ;;  %v361_v10 = vld [vmem:[%s299_s7 + $0x8] sm:$0xff]  ;;  %s645_s13 = sshll.u32 %s348_s29, 4  ;;  %s1540_s14 = scalar_lea.hbm %s1593_s5, %s817_s10  ;;  %s1542_s13 = int_to_ptr.vmem [resolvable:$true] %s645_s13 }
  0xbc   : > { %826 = vmatprep.subr.bf16.mxu0 %v358_v4  ;;  %366 = vperm.xlu0 %926, %v360_v8   ;;  %v929_v11 = vld [vmem:[#allocation5 + $0x8] sm:$0xff]   ;;  %v468_v13 = vld [vmem:[%s1495_s17] sm:$0xff]  ;;  %v470_v15 = vld [vmem:[%s1495_s17 + $0x10] sm:$0xff]  ;;  %s632_s22 = scalar_lea.sflag [#allocation4], %s1470_s23  ;;  %s1086_s1 = scalar_lea.vmem %s1542_s13, 512 }
  0xbd   : > { %827 = vmatpush3.bf16.msra.mxu0 %v358_v4  ;;  %376 = vperm.xlu1 %927, %v362_v9   ;;  %v363_v12 = vld [vmem:[%s299_s7 + $0x18] sm:$0xff]  ;;  %v471_v16 = vld [vmem:[%s1495_s17 + $0x18] sm:$0xff]  ;;  %v930_v17 = vld [vmem:[#allocation8] sm:$0xff]   ;;  %p1087_p0 = scmp.ne.s32.totalorder %s1542_s13, %s1086_s1  ;;  %p1644_p6 = scmp.ne.s32.totalorder %s1619_s30, 0 }
  0xbe   : > { %828 = vmatprep.subr.bf16.mxu0 %v359_v6  ;;  %v469_v14 = vld [vmem:[%s1495_s17 + $0x8] sm:$0xff]  ;;  %838 = vmatprep.mubr.msk.bf16.mxu1 %vm394_vm0, %v930_v17  ;;  %v931_v40 = vld [vmem:[#allocation8 + $0x8] sm:$0xff]   ;;  %s1180_s15 = smov [#allocation11]  }
  0xbf   : > { %p1088_p2 = pnand %p1087_p0, %p1644_p6  ;;  %s1090_s11 = sshll.u32 %s1180_s15, 4  ;;  %s1091_s11 = int_to_ptr.vmem [resolvable:$false] %s1090_s11 }
  0xc0   : > { %371 = vperm.xlu0 %926, %v361_v10   ;;  %s1092_s0 = scalar_lea.vmem %s1091_s11, 1024  ;;  %p1093_p1 = scmp.lt.s32.totalorder %s1542_s13, %s1091_s11 }
  0xc1   : > { %829 = vmatpush3.bf16.msra.mxu0 %v359_v6  ;;  %381 = vperm.xlu1 %927, %v363_v12   ;;  %p1089_p10 = pneg %p1088_p2  ;;  %p1094_p4 = scmp.lt.s32.totalorder %s1092_s0, %s1086_s1 }
  0xc3   : > { %p1095_p5 = por %p1094_p4, %p1093_p1 }
  0xc4   : > { %831 = vmatmul.mubr.msk.bf16.vlgmr.msra.gmra.mrb[0].mxu0 %vm394_vm0, %v929_v11  ;;  %474 = vperm.xlu0 %926, %v468_v13  }
  0xc5   : > { %479 = vperm.xlu1 %927, %v469_v14   ;;  %p1096_p11 = pnand %p1095_p5, %p1089_p10 }
  0xc8   : > { %484 = vperm.xlu0 %926, %v470_v15  }
  0xc9   : > { %489 = vperm.xlu1 %927, %v471_v16  }
 0x13b   : > { %v367_v19 = vpop.permute.xlu0 %366 }
 0x13c   : > { %v377_v18 = vpop.permute.xlu1 %376 }
 0x13f   : > { %v372_v26 = vpop.permute.xlu0 %371 }
 0x140   : > { %v382_v23 = vpop.permute.xlu1 %381 }
 0x143   : > { %v475_v41 = vpop.permute.xlu0 %474 }
 0x144   : > { %v480_v42 = vpop.permute.xlu1 %479 }
 0x147   : > { %v485_v43 = vpop.permute.xlu0 %484 }
 0x148   : > { %v490_v49 = vpop.permute.xlu1 %489 }
 0x197   : > { %v832_v20 = vpop.f32.mrb[0].mxu0 }
 0x198   : > { %v444_v21 = vadd.f32 %v832_v20, %v377_v18  ;;  %v435_v22 = vpop.f32.mrb[1].mxu0 }
 0x199   : > { %v436_v24 = vadd.f32 %v435_v22, %v367_v19  ;;  %v833_v25 = vpop.f32.mrb[2].mxu0 }
 0x19a   : > { %v456_v27 = vmul.f32 0.2, %v444_v21  ;;  %v447_v28 = vadd.f32 %v833_v25, %v382_v23  ;;  %v438_v29 = vpop.f32.mrb[3].mxu0  ;;  %vm452_vm1 = vcmp.ge.f32.partialorder %v444_v21, 0.0 }
 0x19b   : > { %v454_v30 = vmul.f32 0.2, %v436_v24  ;;  %v439_v31 = vadd.f32 %v438_v29, %v372_v26  ;;  %vm450_vm3 = vcmp.ge.f32.partialorder %v436_v24, 0.0 }
 0x19c   : > { %vm453_vm2 = vcmp.ge.f32.partialorder %v447_v28, 0.0  ;;  %v457_v32 = vmul.f32 0.2, %v447_v28  ;;  %v460_v34 = vsel %vm452_vm1, %v444_v21, %v456_v27 }
 0x19d   : > { %v455_v33 = vmul.f32 0.2, %v439_v31  ;;  %vm451_vm4 = vcmp.ge.f32.partialorder %v439_v31, 0.0  ;;  %v458_v36 = vsel %vm450_vm3, %v436_v24, %v454_v30 }
 0x19e   : > { %v461_v35 = vsel %vm453_vm2, %v447_v28, %v457_v32 }
 0x19f   : > { %v459_v37 = vsel %vm451_vm4, %v439_v31, %v455_v33  ;;  %v467_v38 = vpack.c.bf16 %v461_v35, %v460_v34 }
 0x1a0   : > { %v466_v39 = vpack.c.bf16 %v459_v37, %v458_v36 }
 0x1a2   : > { %834 = vmatprep.subr.bf16.mxu1 %v466_v39 }
 0x1a3   : > { %835 = vmatpush3.bf16.msra.mxu1 %v466_v39 }
 0x1a4   : > { %836 = vmatprep.subr.bf16.mxu1 %v467_v38 }
 0x1a7   : > { %837 = vmatpush3.bf16.msra.mxu1 %v467_v38 }
 0x1aa   : > { %839 = vmatmul.mubr.msk.bf16.vlgmr.msra.gmra.mrb[0].mxu1 %vm394_vm0, %v931_v40 }
 0x27d   : > { %v840_v44 = vpop.f32.mrb[0].mxu1 }
 0x27e   : > { %v551_v45 = vadd.f32 %v840_v44, %v485_v43  ;;  %v542_v46 = vpop.f32.mrb[1].mxu1 }
 0x27f   : > { %v543_v47 = vadd.f32 %v542_v46, %v475_v41  ;;  %v841_v48 = vpop.f32.mrb[2].mxu1 }
 0x280   : > { %v563_v50 = vmul.f32 0.2, %v551_v45  ;;  %v545_v51 = vpop.f32.mrb[3].mxu1  ;;  %v554_v53 = vadd.f32 %v841_v48, %v490_v49  ;;  %vm559_vm7 = vcmp.ge.f32.partialorder %v551_v45, 0.0 }
 0x281   : > { %v561_v52 = vmul.f32 0.2, %v543_v47  ;;  %v546_v54 = vadd.f32 %v545_v51, %v480_v42  ;;  %vm557_vm6 = vcmp.ge.f32.partialorder %v543_v47, 0.0 }
 0x282   : > { %v564_v58 = vmul.f32 0.2, %v554_v53  ;;  %v567_v60 = vsel %vm559_vm7, %v551_v45, %v563_v50  ;;  %vm560_vm9 = vcmp.ge.f32.partialorder %v554_v53, 0.0 }
 0x283   : > { %v562_v55 = vmul.f32 0.2, %v546_v54  ;;  %v565_v56 = vsel %vm557_vm6, %v543_v47, %v561_v52  ;;  %vm558_vm8 = vcmp.ge.f32.partialorder %v546_v54, 0.0  ;;  %v576_v62 = vsel %vm569_vm5, %v567_v60, 0.0 }
 0x284   : > { %v570_v57 = vsel %vm569_vm5, %v565_v56, 0.0  ;;  %v568_v63 = vsel %vm560_vm9, %v554_v53, %v564_v58 }
 0x285   : > { %571 = vadd.xlane.f32.xlu0 %v570_v57  ;;  %v566_v59 = vsel %vm558_vm8, %v546_v54, %v562_v55  ;;  %v579_v0 = vsel %vm569_vm5, %v568_v63, 0.0 }
 0x286   : > { %v573_v61 = vsel %vm569_vm5, %v566_v59, 0.0 }
 0x287   : > { %574 = vadd.xlane.f32.xlu1 %v573_v61 }
 0x289   : > { %577 = vadd.xlane.f32.xlu0 %v576_v62 }
 0x28d   : > { %580 = vadd.xlane.f32.xlu0 %v579_v0 }
 0x312   : > { %v572_v4 = vpop.xlane.xlu0 %571 }
 0x313   : > { %v583_v6 = vmul.f32 0.015625, %v572_v4 }
 0x314   : > { %v575_v7 = vpop.xlane.xlu1 %574 }
 0x315   : > { %v587_v8 = vsub.f32 %v565_v56, %v583_v6  ;;  %v584_v9 = vmul.f32 0.015625, %v575_v7 }
 0x316   : > { %v578_v10 = vpop.xlane.xlu0 %577 }
 0x317   : > { %v588_v11 = vsub.f32 %v566_v59, %v584_v9  ;;  %v585_v12 = vmul.f32 0.015625, %v578_v10  ;;  %v591_v13 = vmul.f32 %v587_v8, %v587_v8 }
 0x319   : > { %v589_v14 = vsub.f32 %v567_v60, %v585_v12  ;;  %v595_v15 = vsel %vm569_vm5, %v591_v13, 0.0  ;;  %v592_v16 = vmul.f32 %v588_v11, %v588_v11 }
 0x31a   : > { %596 = vadd.xlane.f32.xlu1 %v595_v15  ;;  %v581_v17 = vpop.xlane.xlu0 %580 }
 0x31b   : > { %v586_v18 = vmul.f32 0.015625, %v581_v17  ;;  %v598_v19 = vsel %vm569_vm5, %v592_v16, 0.0  ;;  %v593_v20 = vmul.f32 %v589_v14, %v589_v14 }
 0x31c   : > { %599 = vadd.xlane.f32.xlu0 %v598_v19 }
 0x31d   : > { %v590_v21 = vsub.f32 %v568_v63, %v586_v18  ;;  %v601_v22 = vsel %vm569_vm5, %v593_v20, 0.0 }
 0x31e   : > { %602 = vadd.xlane.f32.xlu1 %v601_v22 }
 0x31f   : > { %v594_v23 = vmul.f32 %v590_v21, %v590_v21 }
 0x321   : > { %v604_v24 = vsel %vm569_vm5, %v594_v23, 0.0 }
 0x322   : > { %605 = vadd.xlane.f32.xlu0 %v604_v24 }
 0x3a7   : > { %v597_v25 = vpop.xlane.xlu1 %596 }
 0x3a8   : > { %v607_v26 = vmul.f32 0.015625, %v597_v25 }
 0x3a9   : > { %v600_v27 = vpop.xlane.xlu0 %599 }
 0x3aa   : > { %v611_v28 = vadd.f32 1e-05, %v607_v26  ;;  %v608_v29 = vmul.f32 0.015625, %v600_v27 }
 0x3ab   : > { %v603_v30 = vpop.xlane.xlu1 %602 }
 0x3ac   : > { %932 = vrsqrt.f32 %v611_v28  ;;  %v612_v31 = vadd.f32 1e-05, %v608_v29  ;;  %v609_v32 = vmul.f32 0.015625, %v603_v30 }
 0x3ae   : > { %934 = vrsqrt.f32 %v612_v31  ;;  %v613_v33 = vadd.f32 1e-05, %v609_v32 }
 0x3af   : > { %v606_v34 = vpop.xlane.xlu0 %605 }
 0x3b0   : > { %936 = vrsqrt.f32 %v613_v33  ;;  %v610_v35 = vmul.f32 0.015625, %v606_v34 }
 0x3b2   : > { %v614_v36 = vadd.f32 1e-05, %v610_v35 }
 0x3b4   : > { %938 = vrsqrt.f32 %v614_v36 }
 0x3b6   : > { %v933_v37 = vpop.eup %932 }
 0x3b7   : > { %v619_v38 = vmul.f32 %v933_v37, %v587_v8 }
 0x3b8   : > { %v935_v39 = vpop.eup %934 }
 0x3b9   : > { %v623_v40 = vadd.f32 %v619_v38, %v1501_v1  ;;  %v620_v41 = vmul.f32 %v935_v39, %v588_v11 }
 0x3ba   : > { %v937_v42 = vpop.eup %936 }
 0x3bb   : > { %627 = vst.msk [vmem:[%s348_s29] sm:$0xff] %vm569_vm5, %v623_v40  ;;  %v624_v43 = vadd.f32 %v620_v41, %v1503_v2  ;;  %v621_v44 = vmul.f32 %v937_v42, %v589_v14 }
 0x3bd   : > { %628 = vst.msk [vmem:[%s348_s29 + $0x8] sm:$0xff] %vm569_vm5, %v624_v43  ;;  %v625_v45 = vadd.f32 %v621_v44, %v1505_v3 }
 0x3be   : > { %v939_v46 = vpop.eup %938 }
 0x3bf   : > { %629 = vst.msk [vmem:[%s348_s29 + $0x10] sm:$0xff] %vm569_vm5, %v625_v45  ;;  %v622_v1 = vmul.f32 %v939_v46, %v590_v21 }
 0x3c1   : > { %v626_v2 = vadd.f32 %v622_v1, %v1509_v5 }
 0x3c3   : > { %630 = vst.msk [vmem:[%s348_s29 + $0x18] sm:$0xff] %vm569_vm5, %v626_v2 }
 0x3c4   : > { %1099 = shalt.err (!%p1096_p11)
}
 0x3c5   : > { %s1100_s16 = scalar_lea.hbm %s1540_s14, 512  ;;  %s1104_s6 = scalar_lea.hbm %s1593_s5, 1024 }
 0x3c6   : > { %p1101_p12 = scmp.ne.s32.totalorder %s1540_s14, %s1100_s16  ;;  %p1105_p13 = scmp.lt.u32.totalorder %s1540_s14, %s1593_s5 }
 0x3c7   : > { %p1106_p3 = scmp.lt.u32.totalorder %s1104_s6, %s1100_s16  ;;  %p1108_p0 = scmp.lt.u32.totalorder %s1100_s16, %s1540_s14 }
 0x3c8   : > { %p1102_p8 = pnand %p1101_p12, %p1644_p6 }
 0x3c9   : > { %p1107_p7 = por %p1106_p3, %p1105_p13 }
 0x3ca   : > { %p1103_p9 = pneg %p1102_p8 }
 0x3cb   : > { %p1109_p2 = por %p1108_p0, %p1107_p7 }
 0x3cd   : > { %p1110_p10 = pnand %p1109_p2, %p1103_p9 }
 0x3cf   : > { %1113 = shalt.err (!%p1110_p10)
}
 0x3d0   : > { %s1181_s9 = smov 128   ;;  %s1182_s12 = smov 8  }
 0x3d1   : > { %856 = dma.vmem_to_hbm [thread:$0]  (%p1644_p6), %s1542_s13, 512, %s1540_s14, %s632_s22, %s1181_s9, %s1181_s9, %s1182_s12  }
 0x3d2 PF: > { %s1645_s7 = sld [smem:[#allocation21_spill]]  ;;  %s1646_s8 = sld [smem:[#allocation18_spill]] }
 0x3d3   : > { %s660_s17 = sand.u32 1, %s1156_s18  }
 0x3d4   : > { %s661_s29 = scalar_lea.sflag [#allocation4], %s660_s17 }
 0x3d8   : > { %p1647_p1 = scmp.ne.s32.totalorder %s1645_s7, 0  ;;  %p1648_p4 = scmp.ge.s32.totalorder %s1646_s8, 2 }
 0x3da   : > { %p876_p5 = pnand %p1648_p4, %p1647_p1 }
 0x3dc   : > { %1151 = dma.done.wait (!%p876_p5), %s661_s29, 512  }
 0x3dd   : > { %1153 = vsyncadd (!%p876_p5), %s661_s29, 4294966784  ;;  %s1649_s21 = sld [smem:[#allocation19_spill]]  ;;  %s1650_s10 = sld [smem:[#allocation20_spill]] }
 0x3de   : > { %s1651_s18 = smov %s1160_s19  ;;  %s1652_s19 = smov %s1164_s20 }
 0x3e3   : > { %p22_p11 = scmp.ge.s32.totalorder %s1649_s21, 4   ;;  %s1653_s20 = smov %s1650_s10 }
 0x3e5   :  { %24 = sbr.rel (!%p22_p11) target bundleno = 11 (0xb), region = 117 }
 0x3ec   :  { %666 = vsyncpa [#allocation3], 1 }
 0x3ed   :  { %668 = vsyncpa [#allocation3 + $0x1], 1 }
 0x3ee   :  { %669 = vsyncpa [#allocation6], 1 }
 0x3ef   :  { %670 = vsyncpa [#allocation10], 1 }
 0x3f0   :  { %672 = vsyncpa [#allocation10 + $0x1], 1 }
 0x3f1   :  { %673 = vsyncpa [#allocation4], 1 }
 0x3f2   :  { %675 = vsyncpa [#allocation4 + $0x1], 1 }

// kernel: decoder_forward.12
= control target key start
LH: loop header
LB: loop body
LE: loop exit
PB: predicated region body
PF: predicated region fallthrough
CT: control target
= control target key end

     0   :  { %s1099_s0 = inlined_call_operand.hbm [shape: f32[2,64,2,48], index: 0, kind: input, shape index: {}]   ;;  %s1100_s1 = inlined_call_operand.hbm [shape: bf16[2,16,48], index: 1, kind: input, shape index: {}]   ;;  %s1101_s2 = inlined_call_operand.hbm [shape: f32[2,1,48], index: 2, kind: input, shape index: {}]   ;;  %s1102_s3 = inlined_call_operand.hbm [shape: f32[2,64,2,16], index: 3, kind: output, shape index: {}]  }
   0x1   :  { %1110 = sst [smem:[#allocation16_spill]] %s1099_s0 }
   0x2   :  { %1111 = sst [smem:[#allocation17_spill]] %s1100_s1 }
   0x3   :  { %8 = vsyncpa [#allocation4], 0 }
   0x4   :  { %10 = vsyncpa [#allocation4 + $0x1], 0 }
   0x5   :  { %11 = vsyncpa [#allocation7], 0 }
   0x6   :  { %13 = vsyncpa [#allocation7 + $0x1], 0 }
   0x7   :  { %14 = vsyncpa [#allocation5], 0 }
   0x8   :  { %16 = vsyncpa [#allocation5 + $0x1], 0  ;;  %s834_s12 = smov 0   ;;  %s836_s13 = smov 0  }
   0x9   :  { %s838_s14 = smov 0   ;;  %s840_s15 = smov 0  }
   0xa LB: > { %1112 = sst [smem:[#allocation13_spill]] %s787_s14  ;;  %s855_s16 = sadd.s32 4294967295, %s791_s15   ;;  %s791_s15 = sphi %s840_s15, %s1131_s15   ;;  %s787_s14 = sphi %s838_s14, %s1133_s14   ;;  %s783_s13 = sphi %s836_s13, %s1135_s13   ;;  %s779_s12 = sphi %s834_s12, %s1134_s12  }
   0xb   : > { %s509_s17 = sadd.s32 4294967294, %s791_s15   ;;  %s859_s18 = sadd.s32 1, %s791_s15  }
   0xc   : > { %1113 = sst [smem:[#allocation14_spill]] %s859_s18  ;;  %s29_s19 = sadd.s32 1, %s787_s14 }
   0xd   : > { %s26_s20 = ssub.s32 %s791_s15, %s859_s18  ;;  %p36_p0 = scmp.ne.s32.totalorder %s787_s14, %s783_s13 }
   0xe   : > { %p27_p1 = scmp.eq.s32.totalorder %s26_s20, 0  ;;  %p37_p2 = scmp.eq.s32.totalorder %s791_s15, 0 }
   0xf   : > { %p42_p3 = scmp.ne.s32.totalorder %s783_s13, %s779_s12  ;;  %p1103_p4 = scmp.eq.s32.totalorder %s855_s16, 0 }
  0x10   : > { %s871_s21 = scalar_select %p27_p1, %s787_s14, %s29_s19  }
  0x11   : > { %p38_p5 = por %p37_p2, %p36_p0  ;;  %p875_p6 = por %p1103_p4, %p42_p3 }
  0x12   : > { %1114 = sst [smem:[#allocation15_spill]] %s871_s21  ;;  %p118_p7 = scmp.eq.s32.totalorder %s855_s16, 1 }
  0x13   : > { %s1115_s22 = scalar_select %p875_p6, 1, 0 }
  0x14   : > { %p124_p8 = scmp.eq.s32.totalorder %s509_s17, 1  ;;  %p566_p10 = scmp.lt.s32.totalorder %s791_s15, 2 }
  0x15   : > { %p882_p11 = por %p118_p7, %p36_p0  ;;  %s891_s25 = sand.u32 1, %s787_s14  }
  0x16   : > { %p886_p12 = por %p124_p8, %p42_p3  ;;  %p893_p13 = pnand %p566_p10, %p38_p5 }
  0x17   : > { %s1116_s23 = scalar_select %p882_p11, 1, 0 }
  0x18   : > { %s1117_s24 = scalar_select %p886_p12, 1, 0 }
  0x19   : > { %s1118_s26 = scalar_select %p893_p13, 1, 0 }
  0x1a   : > { %s165_s27 = sand.u32 1, %s791_s15   ;;  %s515_s28 = sshll.u32 %s891_s25, 3 }
  0x1b   : > { %s534_s29 = sshll.u32 %s791_s15, 7  ;;  %s1119_s1 = sld [smem:[#allocation17_spill]] }
  0x1c   : > { %s169_s6 = scalar_lea.vmem [#allocation6], %s515_s28  ;;  %s908_s8 = scalar_lea.sflag [#allocation7], %s165_s27 }
  0x1d   : > { %s176_s7 = sshll.u32 %s169_s6, 4  ;;  %p914_p2 = pneg %p893_p13  ;;  %s905_s7 = int_to_ptr.vmem [resolvable:$true] %s176_s7 }
  0x21   : > { %s903_s5 = scalar_lea.hbm %s1119_s1, %s534_s29  ;;  %s632_s19 = scalar_lea.hbm %s1119_s1, 256 }
  0x22   : > { %s627_s9 = scalar_lea.hbm %s903_s5, 128  ;;  %p633_p7 = scmp.lt.u32.totalorder %s903_s5, %s1119_s1 }
  0x23   : > { %p628_p1 = scmp.ne.s32.totalorder %s903_s5, %s627_s9  ;;  %p634_p8 = scmp.lt.u32.totalorder %s632_s19, %s627_s9 }
  0x24   : > { %p636_p9 = scmp.lt.u32.totalorder %s627_s9, %s903_s5 }
  0x25   : > { %p630_p3 = pnand %p914_p2, %p628_p1  ;;  %p635_p10 = por %p634_p8, %p633_p7 }
  0x27   : > { %p631_p5 = pneg %p630_p3  ;;  %p637_p4 = por %p636_p9, %p635_p10 }
  0x29   : > { %p638_p0 = pnand %p637_p4, %p631_p5 }
  0x2b   : > { %641 = shalt.err (!%p638_p0)
}
  0x2c   : > { %s642_s27 = scalar_lea.vmem %s905_s7, 128  ;;  %s797_s29 = smov [#allocation6]  }
  0x2d   : > { %p643_p1 = scmp.ne.s32.totalorder %s905_s7, %s642_s27  ;;  %s647_s30 = sshll.u32 %s797_s29, 4  ;;  %s648_s30 = int_to_ptr.vmem [resolvable:$false] %s647_s30 }
  0x2e   : > { %s649_s4 = scalar_lea.vmem %s648_s30, 256  ;;  %p650_p11 = scmp.lt.s32.totalorder %s905_s7, %s648_s30 }
  0x2f   : > { %p645_p3 = pnand %p643_p1, %p914_p2  ;;  %p651_p6 = scmp.lt.s32.totalorder %s649_s4, %s642_s27 }
  0x31   : > { %p646_p12 = pneg %p645_p3  ;;  %p652_p7 = por %p651_p6, %p650_p11 }
  0x33   : > { %p653_p8 = pnand %p652_p7, %p646_p12 }
  0x35   : > { %656 = shalt.err (!%p653_p8)
}
  0x36   : > { %s798_s6 = smov 64   ;;  %s799_s9 = smov 4  }
  0x37   : > { %558 = dma.hbm_to_vmem [thread:$0]  (!%p893_p13), %s903_s5, 128, %s905_s7, %s908_s8, %s798_s6, %s798_s6, %s799_s9  }
  0x38   : > { %p201_p4 = scmp.lt.s32.totalorder %s791_s15, 3  ;;  %s512_s11 = sshll.u32 %s891_s25, 7 }
  0x39   : > { %s533_s17 = sshll.u32 %s791_s15, 11  ;;  %p1121_p6 = scmp.ge.s32.totalorder %s791_s15, 1 }
  0x3a   : > { %s1123_s0 = sld [smem:[#allocation16_spill]]  ;;  %s148_s29 = scalar_lea.vmem [#allocation3], %s512_s11 }
  0x3b   : > { %p943_p9 = pnand %p1121_p6, %p201_p4  ;;  %s155_s30 = sshll.u32 %s148_s29, 4  ;;  %s952_s30 = int_to_ptr.vmem [resolvable:$true] %s155_s30 }
  0x3c   : > { %s145_s5 = scalar_lea.sflag [#allocation4], %s891_s25 }
  0x3d   : > { %s1122_s19 = scalar_select %p943_p9, 1, 0 }
  0x40   : > { %s950_s27 = scalar_lea.hbm %s1123_s0, %s533_s17  ;;  %s662_s9 = scalar_lea.hbm %s1123_s0, 4096 }
  0x41   : > { %s657_s7 = scalar_lea.hbm %s950_s27, 2048  ;;  %p663_p5 = scmp.lt.u32.totalorder %s950_s27, %s1123_s0 }
  0x42   : > { %p658_p11 = scmp.ne.s32.totalorder %s950_s27, %s657_s7  ;;  %p664_p10 = scmp.lt.u32.totalorder %s662_s9, %s657_s7 }
  0x43   : > { %p666_p3 = scmp.lt.u32.totalorder %s657_s7, %s950_s27 }
  0x44   : > { %p660_p12 = pnand %p658_p11, %p914_p2  ;;  %p665_p1 = por %p664_p10, %p663_p5 }
  0x46   : > { %p661_p0 = pneg %p660_p12  ;;  %p667_p7 = por %p666_p3, %p665_p1 }
  0x48   : > { %p668_p8 = pnand %p667_p7, %p661_p0 }
  0x4a   : > { %671 = shalt.err (!%p668_p8)
}
  0x4b   : > { %s672_s11 = scalar_lea.vmem %s952_s30, 2048  ;;  %s800_s28 = smov [#allocation3]  }
  0x4c   : > { %p673_p4 = scmp.ne.s32.totalorder %s952_s30, %s672_s11  ;;  %s677_s29 = sshll.u32 %s800_s28, 4  ;;  %s678_s29 = int_to_ptr.vmem [resolvable:$false] %s677_s29 }
  0x4d   : > { %s679_s4 = scalar_lea.vmem %s678_s29, 4096  ;;  %p680_p12 = scmp.lt.s32.totalorder %s952_s30, %s678_s29 }
  0x4e   : > { %p675_p6 = pnand %p673_p4, %p914_p2  ;;  %p681_p9 = scmp.lt.s32.totalorder %s679_s4, %s672_s11 }
  0x50   : > { %p676_p11 = pneg %p675_p6  ;;  %p682_p5 = por %p681_p9, %p680_p12 }
  0x52   : > { %p683_p10 = pnand %p682_p5, %p676_p11 }
  0x54   : > { %686 = shalt.err (!%p683_p10)
}
  0x55   : > { %s801_s7 = smov 32   ;;  %s802_s6 = smov 2  }
  0x56   : > { %555 = dma.hbm_to_vmem [thread:$0]  (!%p893_p13), %s950_s27, 2048, %s952_s30, %s145_s5, %s801_s7, %s801_s7, %s802_s6  }
  0x57   : > { %s518_s9 = sshll.u32 %s791_s15, 4  ;;  %s189_s17 = scalar_lea.vmem [#allocation8], %s891_s25 }
  0x58   : > { %s196_s20 = sshll.u32 %s189_s17, 4  ;;  %s194_s29 = scalar_lea.hbm %s1101_s2, %s518_s9  ;;  %s197_s20 = int_to_ptr.vmem [resolvable:$true] %s196_s20 }
  0x59   : > { %s687_s4 = scalar_lea.hbm %s194_s29, 16  ;;  %s692_s21 = scalar_lea.hbm %s1101_s2, 32 }
  0x5a   : > { %p688_p9 = scmp.ne.s32.totalorder %s194_s29, %s687_s4  ;;  %p693_p3 = scmp.lt.u32.totalorder %s194_s29, %s1101_s2 }
  0x5b   : > { %p694_p7 = scmp.lt.u32.totalorder %s692_s21, %s687_s4  ;;  %p696_p4 = scmp.lt.u32.totalorder %s687_s4, %s194_s29 }
  0x5c   : > { %p690_p0 = pnand %p688_p9, %p914_p2 }
  0x5d   : > { %p695_p8 = por %p694_p7, %p693_p3 }
  0x5e   : > { %p691_p1 = pneg %p690_p0 }
  0x5f   : > { %p697_p6 = por %p696_p4, %p695_p8 }
  0x61   : > { %p698_p11 = pnand %p697_p6, %p691_p1 }
  0x63   : > { %701 = shalt.err (!%p698_p11)
}
  0x64   : > { %s702_s25 = scalar_lea.vmem %s197_s20, 16  ;;  %s803_s27 = smov [#allocation8]  }
  0x65   : > { %p703_p12 = scmp.ne.s32.totalorder %s197_s20, %s702_s25  ;;  %s707_s30 = sshll.u32 %s803_s27, 4  ;;  %s708_s30 = int_to_ptr.vmem [resolvable:$false] %s707_s30 }
  0x66   : > { %s709_s0 = scalar_lea.vmem %s708_s30, 32  ;;  %p710_p9 = scmp.lt.s32.totalorder %s197_s20, %s708_s30 }
  0x67   : > { %p705_p5 = pnand %p703_p12, %p914_p2  ;;  %p711_p0 = scmp.lt.s32.totalorder %s709_s0, %s702_s25 }
  0x69   : > { %p706_p10 = pneg %p705_p5  ;;  %p712_p13 = por %p711_p0, %p710_p9 }
  0x6b   : > { %p713_p3 = pnand %p712_p13, %p706_p10 }
  0x6d   : > { %716 = shalt.err (!%p713_p3)
}
  0x6e   : > { %p1124_p7 = scmp.ne.s32.totalorder %s1118_s26, 0  ;;  %p1125_p1 = scmp.ne.s32.totalorder %s1122_s19, 0 }
  0x6f   : > { %s999_s1 = sand.u32 (!%p1125_p1), 1, %s783_s13   ;;  %p1126_p2 = scmp.ne.s32.totalorder (!%p1125_p1), %s1115_s22, 0 }
  0x70   : > { %561 = dma.hbm_to_vmem [thread:$0]  (!%p1124_p7), %s194_s29, 16, %s197_s20, %s908_s8  }
  0x71   : > { %205 = sbr.rel (%p1125_p1) target bundleno = 847 (0x34f), region = 32  ;;  %s520_s14 = sshll.u32 (!%p1125_p1), %s999_s1, 7 }
  0x72   : > { %s208_s18 = scalar_lea.sflag (!%p1125_p1), [#allocation4], %s999_s1  ;;  %s1003_s21 = scalar_lea.vmem (!%p1125_p1), [#allocation3], %s520_s14 }
  0x78   : > { %766 = dma.done.wait (%p1126_p2), %s208_s18, 2048  }
  0x79   : > { %768 = vsyncadd (%p1126_p2), %s208_s18, 4294965248  ;;  %s216_s26 = sand.u32 1, %s855_s16   ;;  %s521_s8 = sshll.u32 %s999_s1, 3 }
  0x7a   : > { %s217_s10 = scalar_lea.sflag [#allocation7], %s216_s26  ;;  %s220_s19 = scalar_lea.vmem [#allocation6], %s521_s8 }
  0x7b   : > { %770 = dma.done.wait (%p1126_p2), %s217_s10, 144  }
  0x7c   : > { %772 = vsyncadd (%p1126_p2), %s217_s10, 4294967152  ;;  %vm261_vm0 = vcmask 123904   ;;  %v804_v0 = vmov 0.0   ;;  %v1016_v1 = vld [vmem:[%s220_s19] sm:$0xf]  ;;  %s228_s5 = scalar_lea.vmem [#allocation8], %s999_s1 }
  0x7d   : > { %262 = vst.msk [vmem:[#allocation2] sm:$0x3] %vm261_vm0, %v804_v0  ;;  %v1018_v2 = vld [vmem:[%s220_s19 + $0x4] sm:$0xf]  ;;  %v524_v3 = vld [vmem:[%s228_s5] ss:$0 sm:$0xff] }
  0x7e   : > { %s1021_s7 = scalar_lea.vmem [#allocation9], %s520_s14  ;;  %s1023_s6 = smov 0  }
  0x7f LB: >> { %v525_v4 = vcombine.low %v1016_v1, %v1018_v2  ;;  %v805_v6 = vmov 0.0   ;;  %vm806_vm1 = vmmov 0   ;;  %vm292_vm2 = vcmask 130048   ;;  %s807_s22 = smov 96   ;;  %s273_s9 = ssub.s32 63, %s795_s6  ;;  %s795_s6 = sphi %s1023_s6, %s271_s6  }
  0x80   : >> { %538 = vmatprep.subr.bf16.mxu0 %v805_v6  ;;  %540 = vmatprep.mubr.msk.bf16.mxu0 %vm806_vm1, %v805_v6  ;;  %p1127_p13 = scmp.eq.s32.totalorder %s855_s16, 0  ;;  %s808_s11 = smov 32  }
  0x81   : >> { %539 = vmatpush3.bf16.msra.mxu0 %v525_v4  ;;  %s809_s29 = smov 112   ;;  %s810_s4 = smov 16  }
  0x82   : >> { %s1034_s17 = scalar_select %p1127_p13, %s795_s6, %s273_s9 }
  0x83   : >> { %s271_s6 = sadd.s32 1, %s795_s6  }
  0x84   : >> { %v278_v5 = vld [vmem:[#allocation2] sm:$0x3]  ;;  %s523_s20 = sshll.u32 %s1034_s17, 1  ;;  %p268_p8 = scmp.ge.s32.totalorder %s271_s6, 64  }
  0x85   : >> { %v279_v7 = vpack.c.bf16 %v278_v5, %v278_v5  ;;  %s276_s28 = scalar_lea.vmem %s1003_s21, %s523_s20 [#allocation3]  ;;  %s371_s25 = scalar_lea.vmem %s1021_s7, %s523_s20 [#allocation9] }
  0x86   : >> { %v277_v13 = vld [vmem:[%s276_s28] sm:$0x3]  ;;  %s535_s27 = sshll.u32 (%p268_p8), %s855_s16, 11  ;;  %s387_s18 = sshll.u32 (%p268_p8), %s1021_s7, 4  ;;  %s1055_s18 = int_to_ptr.vmem [resolvable:$true] %s387_s18 }
  0x87   : >> { %541 = vmatmul.mubr.msk.bf16.vlgmr.msra.gmra.mrb[0].mxu0 %vm292_vm2, %v279_v7  ;;  %s1052_s14 = scalar_lea.hbm (%p268_p8), %s1102_s3, %s535_s27  ;;  %s374_s26 = scalar_lea.sflag (%p268_p8), [#allocation5], %s999_s1 }
  0x88   : > { %s717_s8 = scalar_lea.vmem (%p268_p8), %s1055_s18, 2048  ;;  %p1128_p6 = scmp.ne.s32.totalorder (%p268_p8), %s1116_s23, 0 }
  0x89   : > { %p718_p4 = scmp.ne.s32.totalorder (%p268_p8), %s1055_s18, %s717_s8  ;;  %s811_s21 = smov (%p268_p8), [#allocation9]  }
  0x8a   : > { %s721_s10 = sshll.u32 (%p268_p8), %s811_s21, 4  ;;  %s722_s10 = int_to_ptr.vmem [resolvable:$false] %s721_s10 }
  0x8b   : > { %p719_p11 = pnand (%p268_p8), %p718_p4, %p1128_p6  ;;  %s723_s16 = scalar_lea.vmem (%p268_p8), %s722_s10, 4096 }
  0x8c   : > { %p724_p5 = scmp.lt.s32.totalorder (%p268_p8), %s1055_s18, %s722_s10  ;;  %p725_p10 = scmp.lt.s32.totalorder (%p268_p8), %s723_s16, %s717_s8 }
  0x8d   : > { %p720_p12 = pneg (%p268_p8), %p719_p11 }
  0x8e   : > { %p726_p9 = por (%p268_p8), %p725_p10, %p724_p5 }
  0x90   : > { %p727_p0 = pnand (%p268_p8), %p726_p9, %p720_p12 }
 0x15a   : >> { %v330_v8 = vpop.f32.mrb[0].mxu0 }
 0x15b   : >> { %v331_v9 = vadd.f32 %v524_v3, %v330_v8  ;;  %v542_v10 = vpop.f32.mrb[1].mxu0 }
 0x15c   : >> { %v333_v11 = vpop.f32.mrb[2].mxu0 }
 0x15d   : >> { %344 = vrot.lane.b32.xlu0 %v331_v9, %s807_s22  ;;  %v543_v12 = vpop.f32.mrb[3].mxu0  ;;  %v336_v14 = vadd.f32 %v331_v9, %v277_v13 }
 0x15f   : >> { %v527_v15 = vmul.f32 -1.442695, %v336_v14 }
 0x161   : >> { %621 = vpow2.f32 %v527_v15 }
 0x16b   : >> { %v622_v16 = vpop.eup %621 }
 0x16c   : >> { %v340_v17 = vadd.f32 1.0, %v622_v16 }
 0x16e   : >> { %623 = vrcp.f32 %v340_v17 }
 0x178   : >> { %v624_v18 = vpop.eup %623 }
 0x179   : >> { %v354_v25 = vsub.f32 1.0, %v624_v18 }
 0x1cf   : >> { %v345_v19 = vpop.permute.xlu0 %344 }
 0x1d0   : >> { %v347_v20 = vmul.f32 %v624_v18, %v345_v19 }
 0x1d2   : >> { %349 = vrot.lane.b32.xlu0 %v347_v20, %s808_s11 }
 0x244   : >> { %v350_v21 = vpop.permute.xlu0 %349 }
 0x245   : >> { %v352_v22 = vadd.f32 %v350_v21, %v277_v13 }
 0x247   : >> { %625 = vtanh.f32 %v352_v22 }
 0x251   : >> { %v626_v23 = vpop.eup %625 }
 0x252   : >> { %356 = vrot.lane.b32.xlu1 %v626_v23, %s809_s29 }
 0x256   : >> { %361 = vrot.lane.b32.xlu1 %v278_v5, %s810_s4 }
 0x2c4   : >> { %v357_v24 = vpop.permute.xlu1 %356 }
 0x2c5   : >> { %v359_v27 = vmul.f32 %v357_v24, %v354_v25 }
 0x2c8   : >> { %v362_v26 = vpop.permute.xlu1 %361 }
 0x2c9   : >> { %v364_v28 = vmul.f32 %v624_v18, %v362_v26 }
 0x2cb   : >> { %v365_v29 = vadd.f32 %v364_v28, %v359_v27 }
 0x2cd   : >> { %367 = vrot.lane.b32.xlu0 %v365_v29, %s809_s29 }
 0x33a   : > { %270 = sbr.rel (!%p268_p8) target bundleno = 127 (0x7f), region = 110 }
 0x33f   : >> { %v368_v30 = vpop.permute.xlu0 %367 }
 0x340   : >> { %370 = vst.msk [vmem:[#allocation2] sm:$0x3] %vm261_vm0, %v368_v30  ;;  %372 = vst.msk [vmem:[%s371_s25] sm:$0x3] %vm261_vm0, %v368_v30 }
 0x341   : > { %730 = shalt.err (!%p727_p0)
}
 0x342   : > { %s731_s19 = scalar_lea.hbm %s1052_s14, 2048  ;;  %s735_s6 = scalar_lea.hbm %s1102_s3, 4096 }
 0x343   : > { %p732_p3 = scmp.ne.s32.totalorder %s1052_s14, %s731_s19  ;;  %p736_p2 = scmp.lt.u32.totalorder %s1052_s14, %s1102_s3 }
 0x344   : > { %p737_p13 = scmp.lt.u32.totalorder %s735_s6, %s731_s19  ;;  %p739_p4 = scmp.lt.u32.totalorder %s731_s19, %s1052_s14 }
 0x345   : > { %p733_p7 = pnand %p732_p3, %p1128_p6 }
 0x346   : > { %p738_p8 = por %p737_p13, %p736_p2 }
 0x347   : > { %p734_p1 = pneg %p733_p7 }
 0x348   : > { %p740_p11 = por %p739_p4, %p738_p8 }
 0x34a   : > { %p741_p12 = pnand %p740_p11, %p734_p1 }
 0x34c   : > { %744 = shalt.err (!%p741_p12)
}
 0x34d   : > { %s812_s17 = smov 32   ;;  %s813_s20 = smov 2  }
 0x34e   : > { %550 = dma.vmem_to_hbm [thread:$0]  (%p1128_p6), %s1055_s18, 2048, %s1052_s14, %s374_s26, %s812_s17, %s812_s17, %s813_s20  }
 0x34f PF: > { %s402_s28 = sand.u32 1, %s779_s12   ;;  %p1129_p5 = scmp.ne.s32.totalorder %s1117_s24, 0 }
 0x350   : > { %p1130_p10 = scmp.ge.s32.totalorder %s791_s15, 2  ;;  %s403_s11 = scalar_lea.sflag [#allocation5], %s402_s28 }
 0x352   : > { %p563_p9 = pnand %p1130_p10, %p1129_p5 }
 0x354   : > { %774 = dma.done.wait (!%p563_p9), %s403_s11, 2048  }
 0x355   : > { %776 = vsyncadd (!%p563_p9), %s403_s11, 4294965248  ;;  %s1131_s15 = sld [smem:[#allocation14_spill]]  ;;  %s1132_s29 = sld [smem:[#allocation13_spill]] }
 0x356   : > { %s1133_s14 = sld [smem:[#allocation15_spill]]  ;;  %s1134_s12 = smov %s783_s13 }
 0x35b   : > { %p19_p0 = scmp.ge.s32.totalorder %s1131_s15, 4   ;;  %s1135_s13 = smov %s1132_s29 }
 0x35d   :  { %21 = sbr.rel (!%p19_p0) target bundleno = 10 (0xa), region = 121 }
 0x364   :  { %408 = vsyncpa [#allocation4], 1 }
 0x365   :  { %410 = vsyncpa [#allocation4 + $0x1], 1 }
 0x366   :  { %411 = vsyncpa [#allocation7], 1 }
 0x367   :  { %413 = vsyncpa [#allocation7 + $0x1], 1 }
 0x368   :  { %414 = vsyncpa [#allocation5], 1 }
 0x369   :  { %416 = vsyncpa [#allocation5 + $0x1], 1 }

// kernel: decoder_forward.13
= control target key start
LH: loop header
LB: loop body
LE: loop exit
PB: predicated region body
PF: predicated region fallthrough
CT: control target
= control target key end

     0   :  { %s1890_s0 = inlined_call_operand.hbm [shape: f32[2,32,64], index: 0, kind: input, shape index: {}]   ;;  %s1891_s1 = inlined_call_operand.hbm [shape: f32[2,32,64], index: 1, kind: input, shape index: {}]   ;;  %s1892_s2 = inlined_call_operand.hbm [shape: f32[2,32,1], index: 2, kind: input, shape index: {}]   ;;  %s1893_s3 = inlined_call_operand.hbm [shape: bf16[32,32], index: 3, kind: input, shape index: {}]   ;;  %s1894_s4 = inlined_call_operand.hbm [shape: bf16[32,32], index: 4, kind: input, shape index: {}]   ;;  %s1895_s5 = inlined_call_operand.hbm [shape: bf16[33,32], index: 5, kind: input, shape index: {}]   ;;  %s1896_s6 = inlined_call_operand.hbm [shape: f32[33,1], index: 6, kind: input, shape index: {}]   ;;  %s1897_s7 = inlined_call_operand.hbm [shape: f32[2,33,64], index: 7, kind: output, shape index: {}]  }
   0x1   :  { %1923 = sst [smem:[#allocation25_spill]] %s1891_s1 }
   0x2   :  { %1924 = sst [smem:[#allocation26_spill]] %s1893_s3 }
   0x3   :  { %1925 = sst [smem:[#allocation27_spill]] %s1895_s5 }
   0x4   :  { %1926 = sst [smem:[#allocation28_spill]] %s1897_s7 }
   0x5   :  { %12 = vsyncpa [#allocation3], 0 }
   0x6   :  { %14 = vsyncpa [#allocation3 + $0x1], 0 }
   0x7   :  { %15 = vsyncpa [#allocation6], 0 }
   0x8   :  { %17 = vsyncpa [#allocation6 + $0x1], 0 }
   0x9   :  { %18 = vsyncpa [#allocation9], 0 }
   0xa   :  { %19 = vsyncpa [#allocation12], 0 }
   0xb   :  { %20 = vsyncpa [#allocation4], 0 }
   0xc   :  { %22 = vsyncpa [#allocation4 + $0x1], 0  ;;  %s1483_s24 = smov 0   ;;  %s1485_s25 = smov 0  }
   0xd   :  { %s1487_s26 = smov 0   ;;  %s1489_s27 = smov 0  }
   0xe LB: > { %1927 = sst [smem:[#allocation20_spill]] %s1412_s24  ;;  %s1504_s28 = sadd.s32 4294967295, %s1424_s27   ;;  %s1424_s27 = sphi %s1489_s27, %s1966_s27   ;;  %s1420_s26 = sphi %s1487_s26, %s1970_s26   ;;  %s1416_s25 = sphi %s1485_s25, %s1969_s25   ;;  %s1412_s24 = sphi %s1483_s24, %s1968_s24  }
   0xf   : > { %1928 = sst [smem:[#allocation21_spill]] %s1424_s27  ;;  %s924_s29 = sadd.s32 4294967294, %s1424_s27  }
  0x10   : > { %p48_p0 = scmp.ne.s32.totalorder %s1416_s25, %s1412_s24  ;;  %p1898_p1 = scmp.eq.s32.totalorder %s1504_s28, 0 }
  0x11   : > { %p214_p3 = scmp.eq.s32.totalorder %s924_s29, 1  ;;  %p925_p5 = scmp.ge.s32.totalorder %s1424_s27, 1 }
  0x12   : > { %p1513_p4 = por %p1898_p1, %p48_p0  ;;  %p221_p7 = scmp.lt.s32.totalorder %s1424_s27, 3 }
  0x13   : > { %p1518_p6 = por %p214_p3, %p48_p0  ;;  %s1426_s10 = smov [#allocation8]  }
  0x14   : > { %s1929_s30 = scalar_select %p1513_p4, 1, 0 }
  0x15   : > { %s1930_s8 = scalar_select %p1518_p6, 1, 0 }
  0x16   : > { %p1523_p8 = pnand %p925_p5, %p221_p7  ;;  %s233_s11 = sshll.u32 %s1426_s10, 4  ;;  %s1527_s11 = int_to_ptr.vmem [resolvable:$true] %s233_s11 }
  0x17   : > { %1931 = sst [smem:[#allocation22_spill]] %s1930_s8  ;;  %s1427_s13 = smov [#allocation11]  }
  0x18   : > { %s1932_s9 = scalar_select %p1523_p8, 1, 0 }
  0x19   : > { %p1043_p9 = pneg %p1523_p8  ;;  %s259_s14 = sshll.u32 %s1427_s13, 4  ;;  %s1538_s14 = int_to_ptr.vmem [resolvable:$true] %s259_s14 }
  0x1a   : > { %s1934_s3 = sld [smem:[#allocation26_spill]] }
  0x1b   : > { %p1534_p11 = pnand %p1043_p9, %p1898_p1 }
  0x1d   : > { %s1933_s12 = scalar_select %p1534_p11, 1, 0 }
  0x1e   : > { %p1548_p13 = pneg %p1534_p11 }
  0x20   : > { %s1144_s17 = scalar_lea.hbm %s1934_s3, 256 }
  0x21   : > { %p1145_p12 = scmp.ne.s32.totalorder %s1934_s3, %s1144_s17  ;;  %p1151_p5 = scmp.lt.u32.totalorder %s1144_s17, %s1934_s3 }
  0x22   : > { %s1935_s20 = scalar_select %p1548_p13, 1, 0 }
  0x23   : > { %p1147_p0 = pnand %p1548_p13, %p1145_p12 }
  0x25   : > { %p1148_p3 = pneg %p1147_p0 }
  0x27   : > { %p1153_p7 = pnand %p1151_p5, %p1148_p3 }
  0x29   : > { %1156 = shalt.err (!%p1153_p7)
}
  0x2a   : > { %s1157_s23 = scalar_lea.vmem %s1527_s11, 256  ;;  %p1165_p2 = scmp.lt.s32.totalorder %s1527_s11, %s1527_s11 }
  0x2b   : > { %p1158_p9 = scmp.ne.s32.totalorder %s1527_s11, %s1157_s23  ;;  %p1166_p6 = scmp.lt.s32.totalorder %s1157_s23, %s1157_s23 }
  0x2d   : > { %p1160_p10 = pnand %p1158_p9, %p1548_p13  ;;  %p1167_p12 = por %p1166_p6, %p1165_p2 }
  0x2f   : > { %p1161_p1 = pneg %p1160_p10 }
  0x31   : > { %p1168_p0 = pnand %p1167_p12, %p1161_p1 }
  0x33   : > { %1171 = shalt.err (!%p1168_p0)
}
  0x34   : > { %s1900_s29 = smov 64   ;;  %s1901_s10 = smov 4  }
  0x35   : > { %1046 = dma.hbm_to_vmem [thread:$0]  (!%p1534_p11), %s1934_s3, 256, %s1527_s11, [#allocation9], %s1900_s29, %s1900_s29, %s1901_s10  }
  0x36   : > { %s1936_s5 = sld [smem:[#allocation27_spill]] }
  0x3c   : > { %s1172_s18 = scalar_lea.hbm %s1936_s5, 320 }
  0x3d   : > { %p1173_p1 = scmp.ne.s32.totalorder %s1936_s5, %s1172_s18  ;;  %p1179_p10 = scmp.lt.u32.totalorder %s1172_s18, %s1936_s5 }
  0x3f   : > { %p1175_p2 = pnand %p1173_p1, %p1548_p13 }
  0x41   : > { %p1176_p6 = pneg %p1175_p2 }
  0x43   : > { %p1181_p3 = pnand %p1179_p10, %p1176_p6 }
  0x45   : > { %1184 = shalt.err (!%p1181_p3)
}
  0x46   : > { %s1185_s11 = scalar_lea.vmem %s1538_s14, 320  ;;  %p1193_p12 = scmp.lt.s32.totalorder %s1538_s14, %s1538_s14 }
  0x47   : > { %p1186_p5 = scmp.ne.s32.totalorder %s1538_s14, %s1185_s11  ;;  %p1194_p0 = scmp.lt.s32.totalorder %s1185_s11, %s1185_s11 }
  0x49   : > { %p1188_p7 = pnand %p1186_p5, %p1548_p13  ;;  %p1195_p1 = por %p1194_p0, %p1193_p12 }
  0x4b   : > { %p1189_p9 = pneg %p1188_p7 }
  0x4d   : > { %p1196_p2 = pnand %p1195_p1, %p1189_p9 }
  0x4f   : > { %1199 = shalt.err (!%p1196_p2)
}
  0x50   : > { %1052 = dma.hbm_to_vmem [thread:$0]  (!%p1534_p11), %s1936_s5, 320, %s1538_s14, [#allocation12], %s1900_s29, %s1900_s29, %s1901_s10  }
  0x51   : > { %s1599_s16 = sadd.s32 1, %s1424_s27   ;;  %s35_s17 = sadd.s32 1, %s1420_s26 }
  0x52   : > { %1937 = sst [smem:[#allocation23_spill]] %s1599_s16  ;;  %s32_s18 = ssub.s32 %s1424_s27, %s1599_s16 }
  0x53   : > { %p42_p6 = scmp.ne.s32.totalorder %s1420_s26, %s1416_s25  ;;  %p33_p10 = scmp.eq.s32.totalorder %s32_s18, 0 }
  0x54   : > { %p43_p3 = scmp.eq.s32.totalorder %s1424_s27, 0  ;;  %p1938_p5 = scmp.eq.s32.totalorder %s1504_s28, 1 }
  0x55   : > { %s1614_s21 = scalar_select %p33_p10, %s1420_s26, %s35_s17  }
  0x56   : > { %p1609_p7 = por %p1938_p5, %p42_p6  ;;  %p44_p9 = por %p43_p3, %p42_p6 }
  0x57   : > { %1940 = sst [smem:[#allocation24_spill]] %s1614_s21  ;;  %p1074_p12 = scmp.lt.s32.totalorder %s1424_s27, 2 }
  0x58   : > { %s1939_s19 = scalar_select %p1609_p7, 1, 0 }
  0x59   : > { %s1899_s22 = sand.u32 1, %s1420_s26   ;;  %s1623_s23 = sshll.u32 %s1424_s27, 9 }
  0x5a   : > { %s1620_s14 = sshll.u32 %s1899_s22, 5  ;;  %p1625_p0 = pnand %p1074_p12, %p44_p9 }
  0x5b   : > { %s307_s13 = sand.u32 1, %s1424_s27   ;;  %s1942_s1 = sld [smem:[#allocation25_spill]] }
  0x5c   : > { %s1941_s11 = scalar_select %p1625_p0, 1, 0 }
  0x5d   : > { %s311_s22 = scalar_lea.vmem [#allocation5], %s1620_s14  ;;  %s1430_s10 = smov [#allocation10]  }
  0x5e   : > { %s318_s29 = sshll.u32 %s311_s22, 4  ;;  %s1639_s3 = sshll.u32 %s1430_s10, 4  ;;  %s1637_s29 = int_to_ptr.vmem [resolvable:$true] %s318_s29  ;;  %s247_s3 = int_to_ptr.vmem [resolvable:$true] %s1639_s3 }
  0x5f   : > { %s1641_s5 = scalar_lea.sflag [#allocation6], %s307_s13  ;;  %p1647_p2 = pneg %p1625_p0 }
  0x61   : > { %s1634_s17 = scalar_lea.hbm %s1942_s1, %s1623_s23  ;;  %s1205_s16 = scalar_lea.hbm %s1942_s1, 1024 }
  0x62   : > { %s1200_s21 = scalar_lea.hbm %s1634_s17, 512  ;;  %p1206_p3 = scmp.lt.u32.totalorder %s1634_s17, %s1942_s1 }
  0x63   : > { %p1201_p1 = scmp.ne.s32.totalorder %s1634_s17, %s1200_s21  ;;  %p1207_p5 = scmp.lt.u32.totalorder %s1205_s16, %s1200_s21 }
  0x64   : > { %s1943_s15 = scalar_select %p1647_p2, 1, 0 }
  0x65   : > { %p1203_p6 = pnand %p1647_p2, %p1201_p1  ;;  %p1208_p9 = por %p1207_p5, %p1206_p3 }
  0x66   : > { %p1209_p12 = scmp.lt.u32.totalorder %s1200_s21, %s1634_s17 }
  0x67   : > { %p1204_p10 = pneg %p1203_p6 }
  0x68   : > { %p1210_p7 = por %p1209_p12, %p1208_p9 }
  0x6a   : > { %p1211_p4 = pnand %p1210_p7, %p1204_p10 }
  0x6c   : > { %1214 = shalt.err (!%p1211_p4)
}
  0x6d   : > { %s1215_s13 = scalar_lea.vmem %s1637_s29, 512  ;;  %s1431_s18 = smov [#allocation5]  }
  0x6e   : > { %p1216_p1 = scmp.ne.s32.totalorder %s1637_s29, %s1215_s13  ;;  %s1220_s22 = sshll.u32 %s1431_s18, 4  ;;  %s1221_s22 = int_to_ptr.vmem [resolvable:$false] %s1220_s22 }
  0x6f   : > { %s1222_s27 = scalar_lea.vmem %s1221_s22, 1024  ;;  %p1223_p11 = scmp.lt.s32.totalorder %s1637_s29, %s1221_s22 }
  0x70   : > { %p1218_p6 = pnand %p1216_p1, %p1647_p2  ;;  %p1224_p13 = scmp.lt.s32.totalorder %s1222_s27, %s1215_s13 }
  0x72   : > { %p1219_p8 = pneg %p1218_p6  ;;  %p1225_p3 = por %p1224_p13, %p1223_p11 }
  0x74   : > { %p1226_p5 = pnand %p1225_p3, %p1219_p8 }
  0x76   : > { %1229 = shalt.err (!%p1226_p5)
}
  0x77   : > { %s1916_s16 = smov 128   ;;  %s1918_s21 = smov 8  }
  0x78   : > { %1062 = dma.hbm_to_vmem [thread:$0]  (!%p1625_p0), %s1634_s17, 512, %s1637_s29, %s1641_s5, %s1916_s16, %s1916_s16, %s1918_s21  }
  0x79   : > { %s1230_s13 = scalar_lea.hbm %s1894_s4, 256  ;;  %p1944_p8 = scmp.ne.s32.totalorder %s1935_s20, 0 }
  0x7a   : > { %p1231_p4 = scmp.ne.s32.totalorder %s1894_s4, %s1230_s13  ;;  %p1237_p7 = scmp.lt.u32.totalorder %s1230_s13, %s1894_s4 }
  0x7c   : > { %p1233_p11 = pnand %p1231_p4, %p1944_p8 }
  0x7e   : > { %p1234_p13 = pneg %p1233_p11 }
  0x80   : > { %p1239_p10 = pnand %p1237_p7, %p1234_p13 }
  0x82   : > { %1242 = shalt.err (!%p1239_p10)
}
  0x83   : > { %s1243_s24 = scalar_lea.vmem %s247_s3, 256  ;;  %p1251_p6 = scmp.lt.s32.totalorder %s247_s3, %s247_s3 }
  0x84   : > { %p1244_p9 = scmp.ne.s32.totalorder %s247_s3, %s1243_s24  ;;  %p1252_p3 = scmp.lt.s32.totalorder %s1243_s24, %s1243_s24 }
  0x86   : > { %p1246_p12 = pnand %p1244_p9, %p1944_p8  ;;  %p1253_p5 = por %p1252_p3, %p1251_p6 }
  0x88   : > { %p1247_p1 = pneg %p1246_p12 }
  0x8a   : > { %p1254_p0 = pnand %p1253_p5, %p1247_p1 }
  0x8c   : > { %1257 = shalt.err (!%p1254_p0)
}
  0x8d   : > { %p1945_p4 = scmp.ne.s32.totalorder %s1933_s12, 0  ;;  %s1946_s29 = smov 4  }
  0x8e   : > { %s1947_s17 = smov 64   ;;  %s1434_s10 = smov [#allocation13]  }
  0x8f   : > { %1049 = dma.hbm_to_vmem [thread:$0]  (!%p1945_p4), %s1894_s4, 256, %s247_s3, [#allocation9], %s1947_s17, %s1947_s17, %s1946_s29  }
  0x90   : > { %s272_s18 = sshll.u32 %s1434_s10, 4  ;;  %s1258_s24 = scalar_lea.hbm %s1896_s6, 640  ;;  %s273_s18 = int_to_ptr.vmem [resolvable:$true] %s272_s18 }
  0x91   : > { %p1259_p0 = scmp.ne.s32.totalorder %s1896_s6, %s1258_s24  ;;  %p1265_p7 = scmp.lt.u32.totalorder %s1258_s24, %s1896_s6 }
  0x93   : > { %p1261_p11 = pnand %p1259_p0, %p1944_p8 }
  0x95   : > { %p1262_p13 = pneg %p1261_p11 }
  0x97   : > { %p1267_p10 = pnand %p1265_p7, %p1262_p13 }
  0x99   : > { %1270 = shalt.err (!%p1267_p10)
}
  0x9a   : > { %s1271_s3 = scalar_lea.vmem %s273_s18, 640  ;;  %p1279_p6 = scmp.lt.s32.totalorder %s273_s18, %s273_s18 }
  0x9b   : > { %p1272_p9 = scmp.ne.s32.totalorder %s273_s18, %s1271_s3  ;;  %p1280_p3 = scmp.lt.s32.totalorder %s1271_s3, %s1271_s3 }
  0x9d   : > { %p1274_p12 = pnand %p1272_p9, %p1944_p8  ;;  %p1281_p5 = por %p1280_p3, %p1279_p6 }
  0x9f   : > { %p1275_p1 = pneg %p1274_p12 }
  0xa1   : > { %p1282_p2 = pnand %p1281_p5, %p1275_p1 }
  0xa3   : > { %1285 = shalt.err (!%p1282_p2)
}
  0xa4   : > { %s1948_s16 = smov 8   ;;  %s1949_s29 = smov 128  }
  0xa5   : > { %1055 = dma.hbm_to_vmem [thread:$0]  (!%p1945_p4), %s1896_s6, 640, %s273_s18, [#allocation12], %s1949_s29, %s1949_s29, %s1948_s16  }
  0xa6   : > { %s1721_s1 = scalar_lea.hbm %s1890_s0, %s1623_s23  ;;  %s290_s12 = scalar_lea.vmem [#allocation2], %s1620_s14 }
  0xa7   : > { %s297_s8 = sshll.u32 %s290_s12, 4  ;;  %s1950_s10 = sand.u32 1, %s1420_s26   ;;  %s1724_s8 = int_to_ptr.vmem [resolvable:$true] %s297_s8 }
  0xa8   : > { %s1728_s13 = scalar_lea.sflag [#allocation3], %s1950_s10  ;;  %s1286_s22 = scalar_lea.hbm %s1721_s1, 512 }
  0xa9   : > { %p1287_p2 = scmp.ne.s32.totalorder %s1721_s1, %s1286_s22  ;;  %p1951_p8 = scmp.ne.s32.totalorder %s1943_s15, 0 }
  0xaa   : > { %s1291_s27 = scalar_lea.hbm %s1890_s0, 1024  ;;  %p1292_p11 = scmp.lt.u32.totalorder %s1721_s1, %s1890_s0 }
  0xab   : > { %p1289_p4 = pnand %p1287_p2, %p1951_p8  ;;  %p1293_p13 = scmp.lt.u32.totalorder %s1291_s27, %s1286_s22 }
  0xac   : > { %p1295_p10 = scmp.lt.u32.totalorder %s1286_s22, %s1721_s1 }
  0xad   : > { %p1290_p0 = pneg %p1289_p4  ;;  %p1294_p7 = por %p1293_p13, %p1292_p11 }
  0xaf   : > { %p1296_p9 = por %p1295_p10, %p1294_p7 }
  0xb1   : > { %p1297_p12 = pnand %p1296_p9, %p1290_p0 }
  0xb3   : > { %1300 = shalt.err (!%p1297_p12)
}
  0xb4   : > { %s1301_s21 = scalar_lea.vmem %s1724_s8, 512  ;;  %s1435_s20 = smov [#allocation2]  }
  0xb5   : > { %p1302_p1 = scmp.ne.s32.totalorder %s1724_s8, %s1301_s21  ;;  %s1306_s17 = sshll.u32 %s1435_s20, 4  ;;  %s1307_s17 = int_to_ptr.vmem [resolvable:$false] %s1306_s17 }
  0xb6   : > { %s1308_s12 = scalar_lea.vmem %s1307_s17, 1024  ;;  %p1309_p5 = scmp.lt.s32.totalorder %s1724_s8, %s1307_s17 }
  0xb7   : > { %p1304_p6 = pnand %p1302_p1, %p1951_p8  ;;  %p1310_p2 = scmp.lt.s32.totalorder %s1308_s12, %s1301_s21 }
  0xb9   : > { %p1305_p3 = pneg %p1304_p6  ;;  %p1311_p4 = por %p1310_p2, %p1309_p5 }
  0xbb   : > { %p1312_p11 = pnand %p1311_p4, %p1305_p3 }
  0xbd   : > { %1315 = shalt.err (!%p1312_p11)
}
  0xbe   : > { %p1952_p0 = scmp.ne.s32.totalorder %s1941_s11, 0  ;;  %s1759_s18 = scalar_lea.hbm %s1892_s2, %s1623_s23 }
  0xbf   : > { %s332_s24 = scalar_lea.vmem [#allocation7], %s1620_s14  ;;  %s1316_s3 = scalar_lea.hbm %s1759_s18, 512 }
  0xc0   : > { %1059 = dma.hbm_to_vmem [thread:$0]  (!%p1952_p0), %s1721_s1, 512, %s1724_s8, %s1728_s13, %s1949_s29, %s1949_s29, %s1948_s16  }
  0xc1   : > { %s339_s27 = sshll.u32 %s332_s24, 4  ;;  %p1317_p13 = scmp.ne.s32.totalorder %s1759_s18, %s1316_s3  ;;  %s1762_s27 = int_to_ptr.vmem [resolvable:$true] %s339_s27 }
  0xc2   : > { %s1321_s8 = scalar_lea.hbm %s1892_s2, 1024  ;;  %p1322_p9 = scmp.lt.u32.totalorder %s1759_s18, %s1892_s2 }
  0xc3   : > { %p1319_p7 = pnand %p1317_p13, %p1951_p8  ;;  %p1323_p12 = scmp.lt.u32.totalorder %s1321_s8, %s1316_s3 }
  0xc4   : > { %p1325_p6 = scmp.lt.u32.totalorder %s1316_s3, %s1759_s18 }
  0xc5   : > { %p1320_p10 = pneg %p1319_p7  ;;  %p1324_p1 = por %p1323_p12, %p1322_p9 }
  0xc7   : > { %p1326_p3 = por %p1325_p6, %p1324_p1 }
  0xc9   : > { %p1327_p5 = pnand %p1326_p3, %p1320_p10 }
  0xcb   : > { %1330 = shalt.err (!%p1327_p5)
}
  0xcc   : > { %s1331_s14 = scalar_lea.vmem %s1762_s27, 512  ;;  %s1436_s21 = smov [#allocation7]  }
  0xcd   : > { %p1332_p2 = scmp.ne.s32.totalorder %s1762_s27, %s1331_s14  ;;  %s1336_s20 = sshll.u32 %s1436_s21, 4  ;;  %s1337_s20 = int_to_ptr.vmem [resolvable:$false] %s1336_s20 }
  0xce   : > { %s1338_s17 = scalar_lea.vmem %s1337_s20, 1024  ;;  %p1339_p13 = scmp.lt.s32.totalorder %s1762_s27, %s1337_s20 }
  0xcf   : > { %p1334_p4 = pnand %p1332_p2, %p1951_p8  ;;  %p1340_p7 = scmp.lt.s32.totalorder %s1338_s17, %s1331_s14 }
  0xd1   : > { %p1335_p11 = pneg %p1334_p4  ;;  %p1341_p9 = por %p1340_p7, %p1339_p13 }
  0xd3   : > { %p1342_p12 = pnand %p1341_p9, %p1335_p11 }
  0xd5   : > { %1345 = shalt.err (!%p1342_p12)
}
  0xd6   : > { %1065 = dma.hbm_to_vmem [thread:$0]  (!%p1952_p0), %s1759_s18, 512, %s1762_s27, %s1641_s5, %s1949_s29, %s1949_s29, %s1948_s16  }
  0xd7   : > { %p1953_p8 = scmp.ne.s32.totalorder %s1932_s9, 0 }
  0xd8   : > { %s1792_s15 = sand.u32 (!%p1953_p8), 1, %s1416_s25   ;;  %p1954_p10 = scmp.ne.s32.totalorder (!%p1953_p8), %s1929_s30, 0 }
  0xd9   : > { %351 = sbr.rel (%p1953_p8) target bundleno = 744 (0x2e8), region = 48  ;;  %s941_s12 = sshll.u32 (!%p1953_p8), %s1792_s15, 5 }
  0xda   : > { %s354_s10 = scalar_lea.sflag (!%p1953_p8), [#allocation3], %s1792_s15  ;;  %s1796_s22 = scalar_lea.vmem (!%p1953_p8), [#allocation2], %s941_s12 }
  0xe0   : > { %1391 = dma.done.wait (%p1954_p10), %s354_s10, 512  }
  0xe1   : > { %1393 = vsyncadd (%p1954_p10), %s354_s10, 4294966784  ;;  %s362_s5 = sand.u32 1, %s1504_s28   ;;  %s366_s11 = scalar_lea.vmem [#allocation5], %s941_s12 }
  0xe2   : > { %s363_s9 = scalar_lea.sflag [#allocation6], %s362_s5 }
  0xe3   : > { %1395 = dma.done.wait (%p1954_p10), %s363_s9, 1024  }
  0xe4   : > { %1397 = vsyncadd (%p1954_p10), %s363_s9, 4294966272  ;;  %s1807_s16 = scalar_lea.vmem [#allocation7], %s941_s12  ;;  %p1955_p0 = scmp.eq.s32.totalorder %s1504_s28, 0 }
  0xe6   : > { %1399 = dma.done.wait (%p1955_p0), [#allocation9], 512   ;;  %p1956_p1 = pmov %p1955_p0 }
  0xe7   : > { %p1957_p6 = pmov %p1955_p0 }
  0xe8   : > { %1401 = vsyncadd (%p1956_p1), [#allocation9], 4294966784 }
  0xe9   : > { %1403 = dma.done.wait (%p1957_p6), [#allocation12], 960   ;;  %p1958_p3 = pmov %p1955_p0 }
  0xea   : > { %v1437_v0 = vmov 0   ;;  %v447_v1 = vld [vmem:[%s366_s11] sm:$0xff]  ;;  %v448_v2 = vld [vmem:[%s366_s11 + $0x8] sm:$0xff]  ;;  %v449_v3 = vld [vmem:[%s366_s11 + $0x10] sm:$0xff]  ;;  %vm463_vm0 = vcmask 261120   ;;  %v1438_v26 = vmov 0.0  }
  0xeb   : > { %1405 = vsyncadd (%p1958_p3), [#allocation12], 4294966336  ;;  %1125 = vset.pattern.permute.xlu0 %v1437_v0  ;;  %1126 = vset.pattern.permute.xlu1 %v1437_v0  ;;  %v451_v4 = vpack.c.bf16 %v448_v2, %v447_v1  ;;  %v450_v5 = vld [vmem:[%s366_s11 + $0x18] sm:$0xff]  ;;  %v1127_v7 = vld [vmem:[#allocation10] sm:$0xff]   ;;  %vm1439_vm1 = vmmov 0   ;;  %s1017_s30 = smul.u32 40, %s1792_s15 }
  0xec   : > { %v452_v6 = vpack.c.bf16 %v450_v5, %v449_v3  ;;  %v437_v8 = vld [vmem:[%s1796_s22] sm:$0xff]  ;;  %v438_v9 = vld [vmem:[%s1796_s22 + $0x8] sm:$0xff]  ;;  %985 = vmatprep.mubr.msk.bf16.mxu0 %vm463_vm0, %v1127_v7  ;;  %v439_v11 = vld [vmem:[%s1796_s22 + $0x10] sm:$0xff]  ;;  %997 = vmatprep.subr.bf16.mxu1 %v1438_v26  ;;  %vm749_vm6 = vcmask 523264   ;;  %s1018_s18 = smul.u32 640, %s1504_s28  ;;  %vm754_vm7 = vcmask 516096  }
  0xed   : > { %981 = vmatprep.subr.bf16.mxu0 %v451_v4  ;;  %v441_v10 = vpack.c.bf16 %v438_v9, %v437_v8  ;;  %v440_v12 = vld [vmem:[%s1796_s22 + $0x18] sm:$0xff]  ;;  %v584_v13 = vld [vmem:[%s1807_s16] sm:$0xff]  ;;  %v586_v15 = vld [vmem:[%s1807_s16 + $0x10] sm:$0xff]  ;;  %1001 = vmatprep.mubr.msk.bf16.mxu1 %vm1439_vm1, %v1438_v26  ;;  %s431_s29 = scalar_lea.vmem [#allocation14], %s1017_s30  ;;  %s1959_s7 = sld [smem:[#allocation28_spill]] }
  0xee   : > { %982 = vmatpush3.bf16.msra.mxu0 %v451_v4  ;;  %v1128_v14 = vld [vmem:[#allocation10 + $0x8] sm:$0xff]   ;;  %590 = vperm.xlu0 %1125, %v584_v13   ;;  %v1129_v16 = vld [vmem:[#allocation8] sm:$0xff]   ;;  %v585_v17 = vld [vmem:[%s1807_s16 + $0x8] sm:$0xff]  ;;  %v442_v18 = vpack.c.bf16 %v440_v12, %v439_v11  ;;  %s770_s24 = sshll.u32 %s431_s29, 4  ;;  %s757_s8 = scalar_lea.sflag [#allocation4], %s1792_s15  ;;  %s1846_s24 = int_to_ptr.vmem [resolvable:$true] %s770_s24 }
  0xef   : > { %983 = vmatprep.subr.bf16.mxu0 %v452_v6  ;;  %600 = vperm.xlu1 %1126, %v586_v15   ;;  %v587_v19 = vld [vmem:[%s1807_s16 + $0x18] sm:$0xff]  ;;  %v633_v22 = vld [vmem:[#allocation13 + $0x10] sm:$0xff]  ;;  %v634_v23 = vld [vmem:[#allocation13 + $0x18] sm:$0xff]  ;;  %s1346_s13 = scalar_lea.vmem %s1846_s24, 640  ;;  %p1960_p2 = scmp.ne.s32.totalorder %s1939_s19, 0 }
  0xf0   : > { %v631_v20 = vld [vmem:[#allocation13] sm:$0xff]  ;;  %v632_v21 = vld [vmem:[#allocation13 + $0x8] sm:$0xff]  ;;  %v1130_v24 = vld [vmem:[#allocation8 + $0x8] sm:$0xff]   ;;  %p1347_p5 = scmp.ne.s32.totalorder %s1846_s24, %s1346_s13  ;;  %s1440_s28 = smov [#allocation14]  }
  0xf1   : > { %v635_v25 = vld [vmem:[#allocation13 + $0x20] sm:$0x1]  ;;  %v1131_v49 = vld [vmem:[#allocation11] sm:$0xff]   ;;  %v1132_v50 = vld [vmem:[#allocation11 + $0x8] sm:$0xff]   ;;  %s1350_s23 = sshll.u32 %s1440_s28, 4  ;;  %s1351_s23 = int_to_ptr.vmem [resolvable:$false] %s1350_s23 }
  0xf2   : > { %984 = vmatpush3.bf16.msra.mxu0 %v452_v6  ;;  %595 = vperm.xlu0 %1125, %v585_v17   ;;  %v1133_v51 = vld [vmem:[#allocation11 + $0x10] ss:$0 sps:$4 sm:$0x11]   ;;  %p1348_p4 = pnand %p1347_p5, %p1960_p2  ;;  %s1352_s14 = scalar_lea.vmem %s1351_s23, 1280 }
  0xf3   : > { %989 = vmatprep.subr.bf16.mxu0 %v441_v10  ;;  %605 = vperm.xlu1 %1126, %v587_v19   ;;  %s1844_s1 = scalar_lea.hbm %s1959_s7, %s1018_s18  ;;  %p1353_p13 = scmp.lt.s32.totalorder %s1846_s24, %s1351_s23 }
  0xf4   : > { %p1349_p11 = pneg %p1348_p4  ;;  %p1354_p7 = scmp.lt.s32.totalorder %s1352_s14, %s1346_s13 }
  0xf5   : > { %986 = vmatmul.mubr.msk.bf16.vlgmr.msra.gmra.mrb[0].mxu0 %vm463_vm0, %v1128_v14 }
  0xf6   : > { %990 = vmatpush3.bf16.msra.mxu0 %v441_v10  ;;  %993 = vmatprep.mubr.msk.bf16.mxu0 %vm463_vm0, %v1129_v16  ;;  %p1355_p9 = por %p1354_p7, %p1353_p13 }
  0xf7   : > { %991 = vmatprep.subr.bf16.mxu0 %v442_v18  ;;  %638 = vperm.xlu0 %1125, %v631_v20  }
  0xf8   : > { %643 = vperm.xlu1 %1126, %v632_v21   ;;  %p1356_p12 = pnand %p1355_p9, %p1349_p11 }
  0xfa   : > { %992 = vmatpush3.bf16.msra.mxu0 %v442_v18 }
  0xfb   : > { %648 = vperm.xlu0 %1125, %v633_v22  }
  0xfc   : > { %653 = vperm.xlu1 %1126, %v634_v23  }
  0xff   : > { %658 = vperm.xlu0 %1125, %v635_v25  }
 0x101   : > { %994 = vmatmul.mubr.msk.bf16.vlgmr.msra.gmra.mrb[0].mxu0 %vm463_vm0, %v1130_v24 }
 0x16d   : > { %v591_v28 = vpop.permute.xlu0 %590 }
 0x16e   : > { %v601_v27 = vpop.permute.xlu1 %600 }
 0x171   : > { %v596_v35 = vpop.permute.xlu0 %595 }
 0x172   : > { %v606_v32 = vpop.permute.xlu1 %605 }
 0x176   : > { %v639_v52 = vpop.permute.xlu0 %638 }
 0x177   : > { %v644_v56 = vpop.permute.xlu1 %643 }
 0x17a   : > { %v649_v62 = vpop.permute.xlu0 %648 }
 0x17b   : > { %v654_v2 = vpop.permute.xlu1 %653 }
 0x17e   : > { %v659_v9 = vpop.permute.xlu0 %658 }
 0x1d4   : > { %v995_v29 = vpop.f32.mrb[0].mxu0 }
 0x1d5   : > { %v610_v30 = vadd.f32 %v995_v29, %v601_v27  ;;  %v569_v31 = vpop.f32.mrb[1].mxu0 }
 0x1d6   : > { %v608_v33 = vadd.f32 %v591_v28, %v569_v31  ;;  %v996_v34 = vpop.f32.mrb[2].mxu0 }
 0x1d7   : > { %v618_v36 = vmul.f32 0.2, %v610_v30  ;;  %v611_v37 = vadd.f32 %v996_v34, %v606_v32  ;;  %v572_v38 = vpop.f32.mrb[3].mxu0  ;;  %vm614_vm2 = vcmp.ge.f32.partialorder %v610_v30, 0.0 }
 0x1d8   : > { %v616_v39 = vmul.f32 0.2, %v608_v33  ;;  %v609_v40 = vadd.f32 %v596_v35, %v572_v38  ;;  %vm612_vm4 = vcmp.ge.f32.partialorder %v608_v33, 0.0 }
 0x1d9   : > { %vm615_vm3 = vcmp.ge.f32.partialorder %v611_v37, 0.0  ;;  %v619_v41 = vmul.f32 0.2, %v611_v37  ;;  %v622_v43 = vsel %vm614_vm2, %v610_v30, %v618_v36 }
 0x1da   : > { %v617_v42 = vmul.f32 0.2, %v609_v40  ;;  %vm613_vm5 = vcmp.ge.f32.partialorder %v609_v40, 0.0  ;;  %v620_v45 = vsel %vm612_vm4, %v608_v33, %v616_v39 }
 0x1db   : > { %v623_v44 = vsel %vm615_vm3, %v611_v37, %v619_v41 }
 0x1dc   : > { %v621_v46 = vsel %vm613_vm5, %v609_v40, %v617_v42  ;;  %v630_v47 = vpack.c.bf16 %v623_v44, %v622_v43 }
 0x1dd   : > { %v629_v48 = vpack.c.bf16 %v621_v46, %v620_v45 }
 0x1df   : > { %998 = vmatpush3.bf16.msra.mxu1 %v629_v48 }
 0x1e0   : > { %999 = vmatprep.subr.bf16.mxu1 %v1438_v26 }
 0x1e3   : > { %1000 = vmatpush3.bf16.msra.mxu1 %v630_v47 }
 0x1e6   : > { %1002 = vmatmul.mubr.msk.bf16.vlgmr.msra.gmra.mrb[0].mxu1 %vm463_vm0, %v1131_v49 }
 0x1e7   : > { %1005 = vmatprep.mubr.msk.bf16.mxu1 %vm1439_vm1, %v1438_v26 }
 0x1ee   : > { %1006 = vmatmul.mubr.msk.bf16.gmra.mrb[4].mxu1 %vm463_vm0, %v1132_v50 }
 0x1ef   : > { %1009 = vmatprep.mubr.msk.bf16.mxu1 %vm1439_vm1, %v1438_v26 }
 0x1f6   : > { %1010 = vmatmul.mubr.msk.bf16.gmra.mrb[8].mxu1 %vm463_vm0, %v1133_v51 }
 0x2b9   : > { %v717_v53 = vpop.f32.mrb[0].mxu1 }
 0x2ba   : > { %v718_v54 = vadd.f32 %v717_v53, %v639_v52  ;;  %v1003_v55 = vpop.f32.mrb[1].mxu1 }
 0x2bb   : > { %v720_v57 = vpop.f32.mrb[2].mxu1 }
 0x2bc   : > { %v739_v58 = vmul.f32 1.442695, %v718_v54  ;;  %v721_v59 = vadd.f32 %v720_v57, %v644_v56  ;;  %v1004_v60 = vpop.f32.mrb[3].mxu1 }
 0x2be   : > { %1134 = vpow2.f32 %v739_v58  ;;  %v741_v61 = vmul.f32 1.442695, %v721_v59 }
 0x2c0   : > { %1136 = vpow2.f32 %v741_v61 }
 0x2c1   : > { %v725_v63 = vpop.f32.mrb[4].mxu1 }
 0x2c2   : > { %v726_v0 = vadd.f32 %v725_v63, %v649_v62  ;;  %v1007_v1 = vpop.f32.mrb[5].mxu1 }
 0x2c3   : > { %v728_v3 = vpop.f32.mrb[6].mxu1 }
 0x2c4   : > { %v743_v4 = vmul.f32 1.442695, %v726_v0  ;;  %v729_v5 = vadd.f32 %v728_v3, %v654_v2  ;;  %v1008_v6 = vpop.f32.mrb[7].mxu1 }
 0x2c6   : > { %1138 = vpow2.f32 %v743_v4  ;;  %v745_v7 = vmul.f32 1.442695, %v729_v5 }
 0x2c8   : > { %v1135_v8 = vpop.eup %1134  ;;  %1140 = vpow2.f32 %v745_v7 }
 0x2c9   : > { %v733_v10 = vpop.f32.mrb[8].mxu1  ;;  %750 = vst.msk [vmem:[%s431_s29] sm:$0xff] %vm749_vm6, %v1135_v8 }
 0x2ca   : > { %v1137_v11 = vpop.eup %1136  ;;  %v734_v12 = vadd.f32 %v733_v10, %v659_v9  ;;  %v1011_v13 = vpop.f32.mrb[9].mxu1 }
 0x2cb   : > { %v736_v14 = vpop.f32.mrb[10].mxu1  ;;  %751 = vst.msk [vmem:[%s431_s29 + $0x8] sm:$0xff] %vm749_vm6, %v1137_v11 }
 0x2cc   : > { %v747_v15 = vmul.f32 1.442695, %v734_v12  ;;  %v1012_v16 = vpop.f32.mrb[11].mxu1 }
 0x2ce   : > { %1142 = vpow2.f32 %v747_v15 }
 0x2d0   : > { %v1139_v17 = vpop.eup %1138 }
 0x2d1   : > { %752 = vst.msk [vmem:[%s431_s29 + $0x10] sm:$0xff] %vm749_vm6, %v1139_v17 }
 0x2d2   : > { %v1141_v18 = vpop.eup %1140 }
 0x2d3   : > { %753 = vst.msk [vmem:[%s431_s29 + $0x18] sm:$0xff] %vm749_vm6, %v1141_v18 }
 0x2d8   : > { %v1143_v19 = vpop.eup %1142 }
 0x2d9   : > { %755 = vst.msk [vmem:[%s431_s29 + $0x20] sm:$0x1] %vm754_vm7, %v1143_v19 }
 0x2da   : > { %1359 = shalt.err (!%p1356_p12)
}
 0x2db   : > { %s1360_s21 = scalar_lea.hbm %s1844_s1, 640  ;;  %s1364_s12 = scalar_lea.hbm %s1959_s7, 1280 }
 0x2dc   : > { %p1361_p8 = scmp.ne.s32.totalorder %s1844_s1, %s1360_s21  ;;  %p1365_p1 = scmp.lt.u32.totalorder %s1844_s1, %s1959_s7 }
 0x2dd   : > { %p1366_p6 = scmp.lt.u32.totalorder %s1364_s12, %s1360_s21  ;;  %p1368_p5 = scmp.lt.u32.totalorder %s1360_s21, %s1844_s1 }
 0x2de   : > { %p1362_p10 = pnand %p1361_p8, %p1960_p2 }
 0x2df   : > { %p1367_p3 = por %p1366_p6, %p1365_p1 }
 0x2e0   : > { %p1363_p0 = pneg %p1362_p10 }
 0x2e1   : > { %p1369_p4 = por %p1368_p5, %p1367_p3 }
 0x2e3   : > { %p1370_p11 = pnand %p1369_p4, %p1363_p0 }
 0x2e5   : > { %1373 = shalt.err (!%p1370_p11)
}
 0x2e6   : > { %s1441_s5 = smov 128   ;;  %s1442_s9 = smov 8  }
 0x2e7   : > { %1041 = dma.vmem_to_hbm [thread:$0]  (%p1960_p2), %s1846_s24, 640, %s1844_s1, %s757_s8, %s1441_s5, %s1441_s5, %s1442_s9  }
 0x2e8 PF: > { %s1961_s11 = sld [smem:[#allocation20_spill]]  ;;  %s1962_s16 = sld [smem:[#allocation22_spill]] }
 0x2e9   : > { %s1963_s30 = sld [smem:[#allocation21_spill]] }
 0x2ee   : > { %s785_s29 = sand.u32 1, %s1961_s11   ;;  %p1964_p13 = scmp.ne.s32.totalorder %s1962_s16, 0 }
 0x2ef   : > { %p1965_p7 = scmp.ge.s32.totalorder %s1963_s30, 2  ;;  %s786_s18 = scalar_lea.sflag [#allocation4], %s785_s29 }
 0x2f1   : > { %p1067_p9 = pnand %p1965_p7, %p1964_p13 }
 0x2f3   : > { %1407 = dma.done.wait (!%p1067_p9), %s786_s18, 640  }
 0x2f4   : > { %1409 = vsyncadd (!%p1067_p9), %s786_s18, 4294966656  ;;  %s1966_s27 = sld [smem:[#allocation23_spill]]  ;;  %s1967_s3 = sld [smem:[#allocation24_spill]] }
 0x2f5   : > { %s1968_s24 = smov %s1416_s25  ;;  %s1969_s25 = smov %s1420_s26 }
 0x2fa   : > { %p25_p12 = scmp.ge.s32.totalorder %s1966_s27, 4   ;;  %s1970_s26 = smov %s1967_s3 }
 0x2fc   :  { %27 = sbr.rel (!%p25_p12) target bundleno = 14 (0xe), region = 133 }
 0x303   :  { %791 = vsyncpa [#allocation3], 1 }
 0x304   :  { %793 = vsyncpa [#allocation3 + $0x1], 1 }
 0x305   :  { %794 = vsyncpa [#allocation6], 1 }
 0x306   :  { %796 = vsyncpa [#allocation6 + $0x1], 1 }
 0x307   :  { %797 = vsyncpa [#allocation9], 1 }
 0x308   :  { %798 = vsyncpa [#allocation12], 1 }
 0x309   :  { %799 = vsyncpa [#allocation4], 1 }
 0x30a   :  { %801 = vsyncpa [#allocation4 + $0x1], 1 }

</bundles_post_ra>
